<compile_context>
chip_gen: v5e
topology: v5e:2x2
jax: 0.10.0
libtpu: 0.0.40
codegen_flags: <defaults>
</compile_context>

<pallas_src>
import functools

import jax
import jax.numpy as jnp
from jax.experimental import pallas as pl
from jax.experimental.pallas import tpu as pltpu

# ----------------------------- configuration -------------------------------
EMBED_DIM = 4            # NOTE: the reference's final broadcast matmul
                         # (4-D image feats @ text_feats.T) only type-checks
                         # when embed_dim == spatial grid size.
IMAGE_RESOLUTION = 16
PATCH_SIZE = 4
VISION_WIDTH = 64
VISION_LAYERS = 2
VISION_HEADS = VISION_WIDTH // 64     # = 1  (as in CLIP.__init__)
CONTEXT_LENGTH = 8
VOCAB_SIZE = 100
T_WIDTH = 64
T_HEADS = 4
T_LAYERS = 2
LN_EPS = 1e-5
NEG_INF = -1e30

_BLOCK_KEYS = ("ln1_w", "ln1_b", "wqkv", "bqkv", "wproj", "bproj",
               "ln2_w", "ln2_b", "wfc", "bfc", "wcproj", "bcproj")


# ------------------------------- helpers ------------------------------------
def _full_spec(shape):
    """Full-array BlockSpec with a constant block index (DMA'd once per call)."""
    zeros = (0,) * len(shape)
    return pl.BlockSpec(shape, lambda l: zeros)


def _layer_spec(shape):
    """Per-layer BlockSpec: leading (squeezed) layer dim indexed by the grid."""
    return pl.BlockSpec((None,) + tuple(shape[1:]), lambda l: (l, 0, 0))


def _ln(x, w, b, eps):
    """LayerNorm over the last axis in fp32 (matches the LayerNorm subclass)."""
    mu = jnp.mean(x, axis=-1, keepdims=True)
    var = jnp.mean(jnp.square(x - mu), axis=-1, keepdims=True)
    return (x - mu) * jax.lax.rsqrt(var + eps) * w + b


def _make_bias(rows, n_batch, causal):
    """In-kernel additive mask over the flattened (seq*batch) row axis.

    Row i corresponds to batch = i % n_batch; attention only between rows with
    the same batch index (block-diagonal) and, if causal, key row <= query row.
    Built with broadcasted_iota (VPU) instead of an (M,M) HBM input.
    """
    row = jax.lax.broadcasted_iota(jnp.int32, (rows, rows), 0)
    col = jax.lax.broadcasted_iota(jnp.int32, (rows, rows), 1)
    keep = (row % n_batch) == (col % n_batch)
    if causal:
        keep = jnp.logical_and(keep, col <= row)
    return jnp.where(keep, 0.0, NEG_INF).astype(jnp.float32)


# -------------------------- fused residual block -----------------------------
def _layer_body(x, bias, ln1_w, ln1_b, wqkv, bqkv, wproj, bproj,
                ln2_w, ln2_b, wfc, bfc, wcproj, bcproj, *, num_heads, eps):
    """One residual attention block on a (M, C) f32 activation, all in VMEM."""
    M, C = x.shape
    hd = C // num_heads

    # ---- attention branch (1/sqrt(hd) pre-folded into the Q columns) ----
    a = _ln(x, ln1_w, ln1_b, eps)
    qkv = jnp.dot(a.astype(jnp.bfloat16), wqkv,
                  preferred_element_type=jnp.float32) + bqkv
    q = qkv[:, :C].astype(jnp.bfloat16)
    k = qkv[:, C:2 * C].astype(jnp.bfloat16)
    v = qkv[:, 2 * C:].astype(jnp.bfloat16)

    # (H, M, hd) head batch -> single batched MXU issue for scores and PV.
    qh = jnp.stack([q[:, h * hd:(h + 1) * hd] for h in range(num_heads)], axis=0)
    kh = jnp.stack([k[:, h * hd:(h + 1) * hd] for h in range(num_heads)], axis=0)
    vh = jnp.stack([v[:, h * hd:(h + 1) * hd] for h in range(num_heads)], axis=0)

    s = jax.lax.dot_general(qh, kh, (((2,), (2,)), ((0,), (0,))),
                            preferred_element_type=jnp.float32)
    s = s + bias[None, :, :]
    s = s - jnp.max(s, axis=-1, keepdims=True)
    e = jnp.exp(s)
    p = e * pl.reciprocal(jnp.sum(e, axis=-1, keepdims=True), approx=True)
    o = jax.lax.dot_general(p.astype(jnp.bfloat16), vh, (((2,), (1,)), ((0,), (0,))),
                            preferred_element_type=jnp.float32)

    # Concat heads along lanes, then ONE (M,C)@(C,C) output projection.
    if num_heads == 1:
        o_cat = o[0]
    else:
        o_cat = jnp.concatenate([o[h] for h in range(num_heads)], axis=1)
    x = x + jnp.dot(o_cat.astype(jnp.bfloat16), wproj,
                    preferred_element_type=jnp.float32) + bproj      # fused residual

    # ---- MLP branch: LN2 -> c_fc + QuickGELU -> c_proj ----
    a2 = _ln(x, ln2_w, ln2_b, eps)
    m = jnp.dot(a2.astype(jnp.bfloat16), wfc,
                preferred_element_type=jnp.float32) + bfc
    m = m * pl.reciprocal(1.0 + jnp.exp(-1.702 * m), approx=True)     # QuickGELU (EUP)
    m = jnp.dot(m.astype(jnp.bfloat16), wcproj,
                preferred_element_type=jnp.float32) + bcproj
    return x + m                                                      # fused residual


# ----------------------------- encoder kernels -------------------------------
def _text_encoder_kernel(x_ref,
                         ln1_w_ref, ln1_b_ref, wqkv_ref, bqkv_ref, wproj_ref, bproj_ref,
                         ln2_w_ref, ln2_b_ref, wfc_ref, bfc_ref, wcproj_ref, bcproj_ref,
                         lnf_w_ref, lnf_b_ref,
                         o_ref, x_scr,
                         *, num_heads, n_batch, causal, eps):
    """Whole text transformer: grid axis = layer; x lives in VMEM scratch."""
    layer = pl.program_id(0)

    @pl.when(layer == 0)
    def _():
        x_scr[...] = x_ref[...].astype(jnp.float32)

    M = x_scr.shape[0]
    bias = _make_bias(M, n_batch, causal)
    x = _layer_body(x_scr[...], bias,
                    ln1_w_ref[...], ln1_b_ref[...], wqkv_ref[...], bqkv_ref[...],
                    wproj_ref[...], bproj_ref[...],
                    ln2_w_ref[...], ln2_b_ref[...], wfc_ref[...], bfc_ref[...],
                    wcproj_ref[...], bcproj_ref[...],
                    num_heads=num_heads, eps=eps)
    x_scr[...] = x

    @pl.when(layer == pl.num_programs(0) - 1)
    def _():
        o_ref[...] = _ln(x, lnf_w_ref[...], lnf_b_ref[...], eps).astype(o_ref.dtype)


def _vision_encoder_kernel(patches_ref, conv_w_ref, stem_add_ref,
                           lnpre_w_ref, lnpre_b_ref,
                           ln1_w_ref, ln1_b_ref, wqkv_ref, bqkv_ref, wproj_ref, bproj_ref,
                           ln2_w_ref, ln2_b_ref, wfc_ref, bfc_ref, wcproj_ref, bcproj_ref,
                           lnpost_w_ref, lnpost_b_ref,
                           o_ref, x_scr,
                           *, num_heads, n_batch, eps):
    """Whole visual transformer incl. stem (step 0) and ln_post (last step)."""
    layer = pl.program_id(0)

    @pl.when(layer == 0)
    def _():
        # Fused stem: patch-conv matmul (CLS rows are zero rows of `patches`),
        # + (pos + class) additive slab, + ln_pre.  Single full-slab store.
        x0 = jnp.dot(patches_ref[...], conv_w_ref[...],
                     preferred_element_type=jnp.float32) + stem_add_ref[...]
        x_scr[...] = _ln(x0, lnpre_w_ref[...], lnpre_b_ref[...], eps)

    M = x_scr.shape[0]
    # NOTE: reference omits the (L,B,C) permute, so visual attention runs over the
    # image-batch axis -> groups are "same position" i.e. same residue mod seq.
    bias = _make_bias(M, n_batch, causal=False)
    x = _layer_body(x_scr[...], bias,
                    ln1_w_ref[...], ln1_b_ref[...], wqkv_ref[...], bqkv_ref[...],
                    wproj_ref[...], bproj_ref[...],
                    ln2_w_ref[...], ln2_b_ref[...], wfc_ref[...], bfc_ref[...],
                    wcproj_ref[...], bcproj_ref[...],
                    num_heads=num_heads, eps=eps)
    x_scr[...] = x

    @pl.when(layer == pl.num_programs(0) - 1)
    def _():
        o_ref[...] = _ln(x, lnpost_w_ref[...], lnpost_b_ref[...], eps).astype(o_ref.dtype)


# ------------------------------- wrappers ------------------------------------
def text_encode(x, blocks, lnf_w, lnf_b, *, num_heads, n_batch, causal):
    M, C = x.shape
    L = blocks["wqkv"].shape[0]
    layer_args = tuple(blocks[k] for k in _BLOCK_KEYS)
    args = (x,) + layer_args + (lnf_w, lnf_b)
    in_specs = ([_full_spec(x.shape)]
                + [_layer_spec(a.shape) for a in layer_args]
                + [_full_spec(lnf_w.shape), _full_spec(lnf_b.shape)])
    return pl.pallas_call(
        functools.partial(_text_encoder_kernel, num_heads=num_heads,
                          n_batch=n_batch, causal=causal, eps=LN_EPS),
        out_shape=jax.ShapeDtypeStruct((M, C), jnp.float32),
        grid=(L,),
        in_specs=in_specs,
        out_specs=_full_spec((M, C)),
        scratch_shapes=[pltpu.VMEM((M, C), jnp.float32)],
        compiler_params=pltpu.CompilerParams(dimension_semantics=("arbitrary",)),
    )(*args)


def vision_encode(patches_ext, stem_add, p, *, seq):
    M = patches_ext.shape[0]
    C = VISION_WIDTH
    blocks = p["visual_blocks"]
    L = blocks["wqkv"].shape[0]
    layer_args = tuple(blocks[k] for k in _BLOCK_KEYS)
    stem_args = (patches_ext, p["conv_w"], stem_add, p["ln_pre_w"], p["ln_pre_b"])
    args = stem_args + layer_args + (p["ln_post_w"], p["ln_post_b"])
    in_specs = ([_full_spec(a.shape) for a in stem_args]
                + [_layer_spec(a.shape) for a in layer_args]
                + [_full_spec(p["ln_post_w"].shape), _full_spec(p["ln_post_b"].shape)])
    return pl.pallas_call(
        functools.partial(_vision_encoder_kernel, num_heads=VISION_HEADS,
                          n_batch=seq, eps=LN_EPS),
        out_shape=jax.ShapeDtypeStruct((M, C), jnp.float32),
        grid=(L,),
        in_specs=in_specs,
        out_specs=_full_spec((M, C)),
        scratch_shapes=[pltpu.VMEM((M, C), jnp.float32)],
        compiler_params=pltpu.CompilerParams(dimension_semantics=("arbitrary",)),
    )(*args)


# ------------------------------ encoders -------------------------------------
def encode_image(image, p):
    """LoraVisualTransformer.forward; returns (B, EMBED_DIM, gh, gw)."""
    B, nc, H, W = image.shape
    ps, width = PATCH_SIZE, VISION_WIDTH
    gh, gw = H // ps, W // ps
    seq = gh * gw + 1
    M = B * seq

    # Patch extraction + zero CLS-placeholder row per image: pure layout plumbing,
    # done wrapper-side so the kernel sees one lane/sublane-dense slab.
    patches = (image.reshape(B, nc, gh, ps, gw, ps)
                    .transpose(0, 2, 4, 1, 3, 5)
                    .reshape(B, gh * gw, nc * ps * ps))
    patches_ext = jnp.concatenate(
        [jnp.zeros((B, 1, nc * ps * ps), patches.dtype), patches], axis=1
    ).reshape(M, nc * ps * ps).astype(jnp.bfloat16)
    # Per-row additive term: positional embedding (+ class embedding on CLS rows).
    stem_add = jnp.tile(p["v_stem_add"], (B, 1))                    # (M, width)

    x = vision_encode(patches_ext, stem_add, p, seq=seq)            # (M, width) f32

    x = x.reshape(B, seq, width)[:, 1:, :]                          # drop CLS token
    x = x @ p["visual_proj"]                                        # lane-sparse -> XLA
    x = jnp.transpose(x, (0, 2, 1)).reshape(B, EMBED_DIM, gh, gw)
    return x


def encode_text(text, p):
    """CLIP.encode_text; returns (B_text, EMBED_DIM)."""
    Bt, ctx = text.shape
    width = T_WIDTH
    # TODO(synk): token-embedding gather + EOT pooling stay in XLA (data-dependent
    # gathers on tiny tensors; no benefit from a Pallas kernel at this size).
    x = jnp.take(p["token_embedding"], text, axis=0) + p["t_pos_embedding"]
    x = jnp.transpose(x, (1, 0, 2)).reshape(ctx * Bt, width)        # seq-first rows

    x = text_encode(x, p["text_blocks"], p["ln_final_w"], p["ln_final_b"],
                    num_heads=T_HEADS, n_batch=Bt, causal=True)

    x = x.reshape(ctx, Bt, width).transpose(1, 0, 2)                # (Bt, ctx, width)
    eot = jnp.argmax(text, axis=-1)
    pooled = x[jnp.arange(Bt), eot]                                 # (Bt, width)
    return pooled @ p["text_projection"]                            # lane-sparse -> XLA


def clip_forward(image, text, p):
    image_features = encode_image(image, p)                         # (B, E, gh, gw)
    text_features = encode_text(text, p)                            # (Bt, E)

    # l2 normalization + logits are tiny 4-wide ops -> plain XLA.
    img_n = image_features / jnp.sqrt(
        jnp.sum(jnp.square(image_features), axis=-1, keepdims=True))
    txt_n = text_features / jnp.sqrt(
        jnp.sum(jnp.square(text_features), axis=-1, keepdims=True))
    logit_scale = jnp.exp(p["logit_scale"])

    # logits_per_image = (logit_scale * image_features) @ text_features.t()
    # torch broadcast matmul of (B,E,gh,gw) with (Bt,E).T requires gw == EMBED_DIM.
    logits_per_image = jnp.matmul(logit_scale * img_n, txt_n.T)     # (B, E, gh, Bt)

    # TODO(synk): `image_features.t()` on a 4-D tensor raises in PyTorch, so the
    # reference's logits_per_text is not executable; return the closest
    # well-defined analog (transpose of the last two axes of logits_per_image).
    logits_per_text = jnp.swapaxes(logits_per_image, -1, -2)
    return logits_per_image, logits_per_text


# ----------------------------- parameter init --------------------------------
def _make_block(keys, d):
    def nrm(shape, std):
        return std * jax.random.normal(next(keys), shape, jnp.float32)
    return dict(
        ln1_w=jnp.ones((d,), jnp.float32), ln1_b=jnp.zeros((d,), jnp.float32),
        wqkv=nrm((d, 3 * d), d ** -0.5), bqkv=jnp.zeros((3 * d,), jnp.float32),
        wproj=nrm((d, d), d ** -0.5), bproj=jnp.zeros((d,), jnp.float32),
        ln2_w=jnp.ones((d,), jnp.float32), ln2_b=jnp.zeros((d,), jnp.float32),
        wfc=nrm((d, 4 * d), (2 * d) ** -0.5), bfc=jnp.zeros((4 * d,), jnp.float32),
        wcproj=nrm((4 * d, d), d ** -0.5), bcproj=jnp.zeros((d,), jnp.float32),
    )


def _stack_blocks(blocks, d, num_heads):
    """Stack per-layer params with a leading layer dim, fold the 1/sqrt(hd) scale
    into the Q columns, and pre-cast matmul weights to bf16 (one-time transform)."""
    L = len(blocks)
    scale = (d // num_heads) ** -0.5          # power of two -> exact in bf16

    def st(name):
        return jnp.stack([blk[name] for blk in blocks], axis=0)

    q_scale = jnp.concatenate([jnp.full((d,), scale, jnp.float32),
                               jnp.ones((2 * d,), jnp.float32)])
    return dict(
        ln1_w=st("ln1_w").reshape(L, 1, d), ln1_b=st("ln1_b").reshape(L, 1, d),
        wqkv=(st("wqkv") * q_scale).astype(jnp.bfloat16),
        bqkv=(st("bqkv") * q_scale).reshape(L, 1, 3 * d),
        wproj=st("wproj").astype(jnp.bfloat16),
        bproj=st("bproj").reshape(L, 1, d),
        ln2_w=st("ln2_w").reshape(L, 1, d), ln2_b=st("ln2_b").reshape(L, 1, d),
        wfc=st("wfc").astype(jnp.bfloat16),
        bfc=st("bfc").reshape(L, 1, 4 * d),
        wcproj=st("wcproj").astype(jnp.bfloat16),
        bcproj=st("bcproj").reshape(L, 1, d),
    )


def init_params(key):
    # TODO(synk): load_pretrain() reads a TorchScript checkpoint; replaced by
    # deterministic synthetic init (shapes match the module __init__).
    keys = iter(jax.random.split(key, 64))

    def nrm(shape, std):
        return std * jax.random.normal(next(keys), shape, jnp.float32)

    grid = IMAGE_RESOLUTION // PATCH_SIZE
    seq = grid * grid + 1
    C = VISION_WIDTH
    vscale = C ** -0.5

    class_embedding = nrm((C,), vscale)
    v_pos_embedding = nrm((seq, C), vscale)
    # Per-row stem additive slab: pos embedding, plus class embedding on the CLS row.
    v_stem_add = v_pos_embedding.at[0].add(class_embedding)

    vis_blocks = [_make_block(keys, C) for _ in range(VISION_LAYERS)]
    txt_blocks = [_make_block(keys, T_WIDTH) for _ in range(T_LAYERS)]

    return dict(
        # Linear / conv weights stored in (in, out) layout (== torch weight.T).
        conv_w=nrm((3 * PATCH_SIZE * PATCH_SIZE, C), 0.02).astype(jnp.bfloat16),
        v_stem_add=v_stem_add,
        ln_pre_w=jnp.ones((1, C), jnp.float32),
        ln_pre_b=jnp.zeros((1, C), jnp.float32),
        visual_blocks=_stack_blocks(vis_blocks, C, VISION_HEADS),
        ln_post_w=jnp.ones((1, C), jnp.float32),
        ln_post_b=jnp.zeros((1, C), jnp.float32),
        visual_proj=nrm((C, EMBED_DIM), vscale),
        token_embedding=nrm((VOCAB_SIZE, T_WIDTH), 0.02),
        t_pos_embedding=nrm((CONTEXT_LENGTH, T_WIDTH), 0.01),
        text_blocks=_stack_blocks(txt_blocks, T_WIDTH, T_HEADS),
        ln_final_w=jnp.ones((1, T_WIDTH), jnp.float32),
        ln_final_b=jnp.zeros((1, T_WIDTH), jnp.float32),
        text_projection=nrm((T_WIDTH, EMBED_DIM), T_WIDTH ** -0.5),
        logit_scale=jnp.log(jnp.float32(1.0 / 0.07)),
    )


# --------------------------------- main ---------------------------------------
if __name__ == "__main__":
    key = jax.random.PRNGKey(0)
    k_img, k_txt, k_par = jax.random.split(key, 3)

    image = jax.random.normal(k_img, (2, 3, IMAGE_RESOLUTION, IMAGE_RESOLUTION),
                              jnp.float32)                           # NCHW
    text = jax.random.randint(k_txt, (2, CONTEXT_LENGTH), 0, VOCAB_SIZE,
                              dtype=jnp.int32)
    params = init_params(k_par)

    fwd = jax.jit(clip_forward)
    logits_per_image, logits_per_text = fwd(image, text, params)
    jax.block_until_ready((logits_per_image, logits_per_text))
    print("KERNEL_OK")
</pallas_src>

<mosaic_0001>
module attributes {stable_mosaic.version = 11 : i64} {
  func.func @_vision_encoder_kernel(%arg0: i32, %arg1: memref<34x48xbf16, #tpu.memory_space<vmem>>, %arg2: memref<48x64xbf16, #tpu.memory_space<vmem>>, %arg3: memref<34x64xf32, #tpu.memory_space<vmem>>, %arg4: memref<1x64xf32, #tpu.memory_space<vmem>>, %arg5: memref<1x64xf32, #tpu.memory_space<vmem>>, %arg6: memref<1x1x64xf32, #tpu.memory_space<vmem>>, %arg7: memref<1x1x64xf32, #tpu.memory_space<vmem>>, %arg8: memref<1x64x192xbf16, #tpu.memory_space<vmem>>, %arg9: memref<1x1x192xf32, #tpu.memory_space<vmem>>, %arg10: memref<1x64x64xbf16, #tpu.memory_space<vmem>>, %arg11: memref<1x1x64xf32, #tpu.memory_space<vmem>>, %arg12: memref<1x1x64xf32, #tpu.memory_space<vmem>>, %arg13: memref<1x1x64xf32, #tpu.memory_space<vmem>>, %arg14: memref<1x64x256xbf16, #tpu.memory_space<vmem>>, %arg15: memref<1x1x256xf32, #tpu.memory_space<vmem>>, %arg16: memref<1x256x64xbf16, #tpu.memory_space<vmem>>, %arg17: memref<1x1x64xf32, #tpu.memory_space<vmem>>, %arg18: memref<1x64xf32, #tpu.memory_space<vmem>>, %arg19: memref<1x64xf32, #tpu.memory_space<vmem>>, %arg20: memref<34x64xf32, #tpu.memory_space<vmem>>, %arg21: memref<34x64xf32, #tpu.memory_space<vmem>>) attributes {dimension_semantics = [#tpu.dimension_semantics<arbitrary>], iteration_bounds = array<i64: 2>, scalar_prefetch = 0 : i64, scratch_operands = 1 : i64, tpu.core_type = #tpu.core_type<tc>, window_params = [{pipeline_mode = #tpu.pipeline_mode<synchronous>, transform_indices = @transform_0, window_bounds = array<i64: 34, 48>}, {pipeline_mode = #tpu.pipeline_mode<synchronous>, transform_indices = @transform_1, window_bounds = array<i64: 48, 64>}, {pipeline_mode = #tpu.pipeline_mode<synchronous>, transform_indices = @transform_2, window_bounds = array<i64: 34, 64>}, {pipeline_mode = #tpu.pipeline_mode<synchronous>, transform_indices = @transform_3, window_bounds = array<i64: 1, 64>}, {pipeline_mode = #tpu.pipeline_mode<synchronous>, transform_indices = @transform_4, window_bounds = array<i64: 1, 64>}, {transform_indices = @transform_5, window_bounds = array<i64: 1, 1, 64>}, {transform_indices = @transform_6, window_bounds = array<i64: 1, 1, 64>}, {transform_indices = @transform_7, window_bounds = array<i64: 1, 64, 192>}, {transform_indices = @transform_8, window_bounds = array<i64: 1, 1, 192>}, {transform_indices = @transform_9, window_bounds = array<i64: 1, 64, 64>}, {transform_indices = @transform_10, window_bounds = array<i64: 1, 1, 64>}, {transform_indices = @transform_11, window_bounds = array<i64: 1, 1, 64>}, {transform_indices = @transform_12, window_bounds = array<i64: 1, 1, 64>}, {transform_indices = @transform_13, window_bounds = array<i64: 1, 64, 256>}, {transform_indices = @transform_14, window_bounds = array<i64: 1, 1, 256>}, {transform_indices = @transform_15, window_bounds = array<i64: 1, 256, 64>}, {transform_indices = @transform_16, window_bounds = array<i64: 1, 1, 64>}, {pipeline_mode = #tpu.pipeline_mode<synchronous>, transform_indices = @transform_17, window_bounds = array<i64: 1, 64>}, {pipeline_mode = #tpu.pipeline_mode<synchronous>, transform_indices = @transform_18, window_bounds = array<i64: 1, 64>}, {pipeline_mode = #tpu.pipeline_mode<synchronous>, transform_indices = @transform_19, window_bounds = array<i64: 34, 64>}]} {
    %c0_i32 = arith.constant 0 : i32
    %0 = arith.cmpi eq, %arg0, %c0_i32 : i32
    %1 = arith.extui %0 : i1 to i32
    %c0_i32_0 = arith.constant 0 : i32
    %2 = arith.cmpi ne, %1, %c0_i32_0 : i32
    scf.if %2 {
      %c0_73 = arith.constant 0 : index
      %c0_74 = arith.constant 0 : index
      %164 = vector.load %arg1[%c0_73, %c0_74] : memref<34x48xbf16, #tpu.memory_space<vmem>>, vector<34x48xbf16>
      %c0_75 = arith.constant 0 : index
      %c0_76 = arith.constant 0 : index
      %165 = vector.load %arg2[%c0_75, %c0_76] : memref<48x64xbf16, #tpu.memory_space<vmem>>, vector<48x64xbf16>
      %cst_77 = arith.constant dense<0.000000e+00> : vector<34x64xf32>
      %166 = tpu.matmul %164, %165, %cst_77 {dimension_numbers = #tpu.dot_dimension_numbers<[1], [0], [0], [1], [0, 0, 1, 1], [], []>} : vector<34x48xbf16>, vector<48x64xbf16>, vector<34x64xf32> -> vector<34x64xf32>
      %c0_78 = arith.constant 0 : index
      %c0_79 = arith.constant 0 : index
      %167 = vector.load %arg3[%c0_78, %c0_79] : memref<34x64xf32, #tpu.memory_space<vmem>>, vector<34x64xf32>
      %168 = arith.addf %166, %167 : vector<34x64xf32>
      %c0_80 = arith.constant 0 : index
      %c0_81 = arith.constant 0 : index
      %169 = vector.load %arg4[%c0_80, %c0_81] : memref<1x64xf32, #tpu.memory_space<vmem>>, vector<1x64xf32>
      %c0_82 = arith.constant 0 : index
      %c0_83 = arith.constant 0 : index
      %170 = vector.load %arg5[%c0_82, %c0_83] : memref<1x64xf32, #tpu.memory_space<vmem>>, vector<1x64xf32>
      %cst_84 = arith.constant dense<0.000000e+00> : vector<34xf32>
      %171 = vector.multi_reduction <add>, %168, %cst_84 [1] : vector<34x64xf32> to vector<34xf32>
      %172 = vector.shape_cast %171 : vector<34xf32> to vector<34x1xf32>
      %cst_85 = arith.constant 6.400000e+01 : f32
      %173 = vector.broadcast %cst_85 : f32 to vector<34x1xf32>
      %174 = arith.divf %172, %173 : vector<34x1xf32>
      %175 = vector.broadcast %174 : vector<34x1xf32> to vector<34x64xf32>
      %176 = arith.subf %168, %175 : vector<34x64xf32>
      %177 = arith.mulf %176, %176 : vector<34x64xf32>
      %cst_86 = arith.constant dense<0.000000e+00> : vector<34xf32>
      %178 = vector.multi_reduction <add>, %177, %cst_86 [1] : vector<34x64xf32> to vector<34xf32>
      %179 = vector.shape_cast %178 : vector<34xf32> to vector<34x1xf32>
      %cst_87 = arith.constant 6.400000e+01 : f32
      %180 = vector.broadcast %cst_87 : f32 to vector<34x1xf32>
      %181 = arith.divf %179, %180 : vector<34x1xf32>
      %182 = vector.broadcast %174 : vector<34x1xf32> to vector<34x64xf32>
      %183 = arith.subf %168, %182 : vector<34x64xf32>
      %cst_88 = arith.constant 9.99999974E-6 : f32
      %184 = vector.broadcast %cst_88 : f32 to vector<34x1xf32>
      %185 = arith.addf %181, %184 : vector<34x1xf32>
      %186 = math.rsqrt %185 : vector<34x1xf32>
      %187 = vector.broadcast %186 : vector<34x1xf32> to vector<34x64xf32>
      %188 = arith.mulf %183, %187 : vector<34x64xf32>
      %189 = vector.broadcast %169 : vector<1x64xf32> to vector<34x64xf32>
      %190 = arith.mulf %188, %189 : vector<34x64xf32>
      %191 = vector.broadcast %170 : vector<1x64xf32> to vector<34x64xf32>
      %192 = arith.addf %190, %191 : vector<34x64xf32>
      %c0_89 = arith.constant 0 : index
      %c0_90 = arith.constant 0 : index
      %193 = vector.load %arg21[%c0_89, %c0_90] : memref<34x64xf32, #tpu.memory_space<vmem>>, vector<34x64xf32>
      tpu.vector_store %arg21[%c0_89, %c0_90], %192 {strides = array<i32>} : memref<34x64xf32, #tpu.memory_space<vmem>>, vector<34x64xf32>,
    } else {
    }
    %3 = tpu.iota {dimensions = array<i32: 0>} : vector<34x34xi32>
    %4 = tpu.iota {dimensions = array<i32: 1>} : vector<34x34xi32>
    %c17_i32 = arith.constant 17 : i32
    %c0_i32_1 = arith.constant 0 : i32
    %5 = arith.cmpi eq, %c17_i32, %c0_i32_1 : i32
    %c1_i32 = arith.constant 1 : i32
    %6 = arith.select %5, %c1_i32, %c17_i32 : i32
    %7 = vector.broadcast %6 : i32 to vector<34x34xi32>
    %8 = arith.remsi %3, %7 : vector<34x34xi32>
    %c0_i32_2 = arith.constant 0 : i32
    %9 = vector.broadcast %c0_i32_2 : i32 to vector<34x34xi32>
    %10 = arith.cmpi ne, %8, %9 : vector<34x34xi32>
    %c0_i32_3 = arith.constant 0 : i32
    %11 = vector.broadcast %c0_i32_3 : i32 to vector<34x34xi32>
    %12 = arith.cmpi slt, %8, %11 : vector<34x34xi32>
    %c0_i32_4 = arith.constant 0 : i32
    %13 = arith.cmpi slt, %6, %c0_i32_4 : i32
    %14 = vector.broadcast %13 : i1 to vector<34x34xi1>
    %15 = vector.broadcast %14 : vector<34x34xi1> to vector<34x34xi1>
    %16 = arith.xori %12, %15 : vector<34x34xi1>
    %17 = arith.andi %16, %10 : vector<34x34xi1>
    %18 = vector.broadcast %6 : i32 to vector<34x34xi32>
    %19 = arith.addi %8, %18 : vector<34x34xi32>
    %20 = arith.select %17, %19, %8 : vector<34x34xi1>, vector<34x34xi32>
    %c17_i32_5 = arith.constant 17 : i32
    %c0_i32_6 = arith.constant 0 : i32
    %21 = arith.cmpi eq, %c17_i32_5, %c0_i32_6 : i32
    %c1_i32_7 = arith.constant 1 : i32
    %22 = arith.select %21, %c1_i32_7, %c17_i32_5 : i32
    %23 = vector.broadcast %22 : i32 to vector<34x34xi32>
    %24 = arith.remsi %4, %23 : vector<34x34xi32>
    %c0_i32_8 = arith.constant 0 : i32
    %25 = vector.broadcast %c0_i32_8 : i32 to vector<34x34xi32>
    %26 = arith.cmpi ne, %24, %25 : vector<34x34xi32>
    %c0_i32_9 = arith.constant 0 : i32
    %27 = vector.broadcast %c0_i32_9 : i32 to vector<34x34xi32>
    %28 = arith.cmpi slt, %24, %27 : vector<34x34xi32>
    %c0_i32_10 = arith.constant 0 : i32
    %29 = arith.cmpi slt, %22, %c0_i32_10 : i32
    %30 = vector.broadcast %29 : i1 to vector<34x34xi1>
    %31 = vector.broadcast %30 : vector<34x34xi1> to vector<34x34xi1>
    %32 = arith.xori %28, %31 : vector<34x34xi1>
    %33 = arith.andi %32, %26 : vector<34x34xi1>
    %34 = vector.broadcast %22 : i32 to vector<34x34xi32>
    %35 = arith.addi %24, %34 : vector<34x34xi32>
    %36 = arith.select %33, %35, %24 : vector<34x34xi1>, vector<34x34xi32>
    %37 = arith.cmpi eq, %20, %36 : vector<34x34xi32>
    %cst = arith.constant 0.000000e+00 : f32
    %cst_11 = arith.constant -1.000000e+30 : f32
    %38 = vector.broadcast %cst : f32 to vector<34x34xf32>
    %39 = vector.broadcast %cst_11 : f32 to vector<34x34xf32>
    %40 = arith.select %37, %38, %39 : vector<34x34xi1>, vector<34x34xf32>
    %c0 = arith.constant 0 : index
    %c0_12 = arith.constant 0 : index
    %41 = vector.load %arg21[%c0, %c0_12] : memref<34x64xf32, #tpu.memory_space<vmem>>, vector<34x64xf32>
    %c0_13 = arith.constant 0 : index
    %c0_14 = arith.constant 0 : index
    %c0_15 = arith.constant 0 : index
    %42 = vector.load %arg6[%c0_13, %c0_14, %c0_15] : memref<1x1x64xf32, #tpu.memory_space<vmem>>, vector<1x1x64xf32>
    %43 = vector.shape_cast %42 : vector<1x1x64xf32> to vector<1x64xf32>
    %c0_16 = arith.constant 0 : index
    %c0_17 = arith.constant 0 : index
    %c0_18 = arith.constant 0 : index
    %44 = vector.load %arg7[%c0_16, %c0_17, %c0_18] : memref<1x1x64xf32, #tpu.memory_space<vmem>>, vector<1x1x64xf32>
    %45 = vector.shape_cast %44 : vector<1x1x64xf32> to vector<1x64xf32>
    %c0_19 = arith.constant 0 : index
    %c0_20 = arith.constant 0 : index
    %c0_21 = arith.constant 0 : index
    %46 = vector.load %arg8[%c0_19, %c0_20, %c0_21] : memref<1x64x192xbf16, #tpu.memory_space<vmem>>, vector<1x64x192xbf16>
    %47 = vector.shape_cast %46 : vector<1x64x192xbf16> to vector<64x192xbf16>
    %c0_22 = arith.constant 0 : index
    %c0_23 = arith.constant 0 : index
    %c0_24 = arith.constant 0 : index
    %48 = vector.load %arg9[%c0_22, %c0_23, %c0_24] : memref<1x1x192xf32, #tpu.memory_space<vmem>>, vector<1x1x192xf32>
    %49 = vector.shape_cast %48 : vector<1x1x192xf32> to vector<1x192xf32>
    %c0_25 = arith.constant 0 : index
    %c0_26 = arith.constant 0 : index
    %c0_27 = arith.constant 0 : index
    %50 = vector.load %arg10[%c0_25, %c0_26, %c0_27] : memref<1x64x64xbf16, #tpu.memory_space<vmem>>, vector<1x64x64xbf16>
    %51 = vector.shape_cast %50 : vector<1x64x64xbf16> to vector<64x64xbf16>
    %c0_28 = arith.constant 0 : index
    %c0_29 = arith.constant 0 : index
    %c0_30 = arith.constant 0 : index
    %52 = vector.load %arg11[%c0_28, %c0_29, %c0_30] : memref<1x1x64xf32, #tpu.memory_space<vmem>>, vector<1x1x64xf32>
    %53 = vector.shape_cast %52 : vector<1x1x64xf32> to vector<1x64xf32>
    %c0_31 = arith.constant 0 : index
    %c0_32 = arith.constant 0 : index
    %c0_33 = arith.constant 0 : index
    %54 = vector.load %arg12[%c0_31, %c0_32, %c0_33] : memref<1x1x64xf32, #tpu.memory_space<vmem>>, vector<1x1x64xf32>
    %55 = vector.shape_cast %54 : vector<1x1x64xf32> to vector<1x64xf32>
    %c0_34 = arith.constant 0 : index
    %c0_35 = arith.constant 0 : index
    %c0_36 = arith.constant 0 : index
    %56 = vector.load %arg13[%c0_34, %c0_35, %c0_36] : memref<1x1x64xf32, #tpu.memory_space<vmem>>, vector<1x1x64xf32>
    %57 = vector.shape_cast %56 : vector<1x1x64xf32> to vector<1x64xf32>
    %c0_37 = arith.constant 0 : index
    %c0_38 = arith.constant 0 : index
    %c0_39 = arith.constant 0 : index
    %58 = vector.load %arg14[%c0_37, %c0_38, %c0_39] : memref<1x64x256xbf16, #tpu.memory_space<vmem>>, vector<1x64x256xbf16>
    %59 = vector.shape_cast %58 : vector<1x64x256xbf16> to vector<64x256xbf16>
    %c0_40 = arith.constant 0 : index
    %c0_41 = arith.constant 0 : index
    %c0_42 = arith.constant 0 : index
    %60 = vector.load %arg15[%c0_40, %c0_41, %c0_42] : memref<1x1x256xf32, #tpu.memory_space<vmem>>, vector<1x1x256xf32>
    %61 = vector.shape_cast %60 : vector<1x1x256xf32> to vector<1x256xf32>
    %c0_43 = arith.constant 0 : index
    %c0_44 = arith.constant 0 : index
    %c0_45 = arith.constant 0 : index
    %62 = vector.load %arg16[%c0_43, %c0_44, %c0_45] : memref<1x256x64xbf16, #tpu.memory_space<vmem>>, vector<1x256x64xbf16>
    %63 = vector.shape_cast %62 : vector<1x256x64xbf16> to vector<256x64xbf16>
    %c0_46 = arith.constant 0 : index
    %c0_47 = arith.constant 0 : index
    %c0_48 = arith.constant 0 : index
    %64 = vector.load %arg17[%c0_46, %c0_47, %c0_48] : memref<1x1x64xf32, #tpu.memory_space<vmem>>, vector<1x1x64xf32>
    %65 = vector.shape_cast %64 : vector<1x1x64xf32> to vector<1x64xf32>
    %cst_49 = arith.constant dense<0.000000e+00> : vector<34xf32>
    %66 = vector.multi_reduction <add>, %41, %cst_49 [1] : vector<34x64xf32> to vector<34xf32>
    %67 = vector.shape_cast %66 : vector<34xf32> to vector<34x1xf32>
    %cst_50 = arith.constant 6.400000e+01 : f32
    %68 = vector.broadcast %cst_50 : f32 to vector<34x1xf32>
    %69 = arith.divf %67, %68 : vector<34x1xf32>
    %70 = vector.broadcast %69 : vector<34x1xf32> to vector<34x64xf32>
    %71 = arith.subf %41, %70 : vector<34x64xf32>
    %72 = arith.mulf %71, %71 : vector<34x64xf32>
    %cst_51 = arith.constant dense<0.000000e+00> : vector<34xf32>
    %73 = vector.multi_reduction <add>, %72, %cst_51 [1] : vector<34x64xf32> to vector<34xf32>
    %74 = vector.shape_cast %73 : vector<34xf32> to vector<34x1xf32>
    %cst_52 = arith.constant 6.400000e+01 : f32
    %75 = vector.broadcast %cst_52 : f32 to vector<34x1xf32>
    %76 = arith.divf %74, %75 : vector<34x1xf32>
    %77 = vector.broadcast %69 : vector<34x1xf32> to vector<34x64xf32>
    %78 = arith.subf %41, %77 : vector<34x64xf32>
    %cst_53 = arith.constant 9.99999974E-6 : f32
    %79 = vector.broadcast %cst_53 : f32 to vector<34x1xf32>
    %80 = arith.addf %76, %79 : vector<34x1xf32>
    %81 = math.rsqrt %80 : vector<34x1xf32>
    %82 = vector.broadcast %81 : vector<34x1xf32> to vector<34x64xf32>
    %83 = arith.mulf %78, %82 : vector<34x64xf32>
    %84 = vector.broadcast %43 : vector<1x64xf32> to vector<34x64xf32>
    %85 = arith.mulf %83, %84 : vector<34x64xf32>
    %86 = vector.broadcast %45 : vector<1x64xf32> to vector<34x64xf32>
    %87 = arith.addf %85, %86 : vector<34x64xf32>
    %88 = arith.truncf %87 : vector<34x64xf32> to vector<34x64xbf16>
    %cst_54 = arith.constant dense<0.000000e+00> : vector<34x192xf32>
    %89 = tpu.matmul %88, %47, %cst_54 {dimension_numbers = #tpu.dot_dimension_numbers<[1], [0], [0], [1], [0, 0, 1, 1], [], []>} : vector<34x64xbf16>, vector<64x192xbf16>, vector<34x192xf32> -> vector<34x192xf32>
    %90 = vector.broadcast %49 : vector<1x192xf32> to vector<34x192xf32>
    %91 = arith.addf %89, %90 : vector<34x192xf32>
    %92 = vector.extract_strided_slice %91 {offsets = [0, 0], sizes = [34, 64], strides = [1, 1]} : vector<34x192xf32> to vector<34x64xf32>
    %93 = arith.truncf %92 : vector<34x64xf32> to vector<34x64xbf16>
    %94 = vector.extract_strided_slice %91 {offsets = [0, 64], sizes = [34, 64], strides = [1, 1]} : vector<34x192xf32> to vector<34x64xf32>
    %95 = arith.truncf %94 : vector<34x64xf32> to vector<34x64xbf16>
    %96 = vector.extract_strided_slice %91 {offsets = [0, 128], sizes = [34, 64], strides = [1, 1]} : vector<34x192xf32> to vector<34x64xf32>
    %97 = arith.truncf %96 : vector<34x64xf32> to vector<34x64xbf16>
    %98 = vector.shape_cast %93 : vector<34x64xbf16> to vector<1x34x64xbf16>
    %99 = vector.shape_cast %95 : vector<34x64xbf16> to vector<1x34x64xbf16>
    %100 = vector.shape_cast %97 : vector<34x64xbf16> to vector<1x34x64xbf16>
    %cst_55 = arith.constant dense<0.000000e+00> : vector<1x34x34xf32>
    %101 = tpu.matmul %98, %99, %cst_55 {dimension_numbers = #tpu.dot_dimension_numbers<[2], [2], [1], [1], [0, 0, 0, 1, 1, 1], [0], [0]>} : vector<1x34x64xbf16>, vector<1x34x64xbf16>, vector<1x34x34xf32> -> vector<1x34x34xf32>
    %102 = vector.shape_cast %40 : vector<34x34xf32> to vector<1x34x34xf32>
    %103 = arith.addf %101, %102 : vector<1x34x34xf32>
    %cst_56 = arith.constant dense<0xFF800000> : vector<1x34xf32>
    %104 = vector.multi_reduction <maximumf>, %103, %cst_56 [2] : vector<1x34x34xf32> to vector<1x34xf32>
    %105 = vector.shape_cast %104 : vector<1x34xf32> to vector<1x34x1xf32>
    %106 = vector.broadcast %105 : vector<1x34x1xf32> to vector<1x34x34xf32>
    %107 = arith.subf %103, %106 : vector<1x34x34xf32>
    %108 = math.exp %107 : vector<1x34x34xf32>
    %cst_57 = arith.constant dense<0.000000e+00> : vector<1x34xf32>
    %109 = vector.multi_reduction <add>, %108, %cst_57 [2] : vector<1x34x34xf32> to vector<1x34xf32>
    %110 = vector.shape_cast %109 : vector<1x34xf32> to vector<1x34x1xf32>
    %111 = tpu.reciprocal %110 {approx = true} : vector<1x34x1xf32> -> vector<1x34x1xf32>
    %112 = vector.broadcast %111 : vector<1x34x1xf32> to vector<1x34x34xf32>
    %113 = arith.mulf %108, %112 : vector<1x34x34xf32>
    %114 = arith.truncf %113 : vector<1x34x34xf32> to vector<1x34x34xbf16>
    %cst_58 = arith.constant dense<0.000000e+00> : vector<1x34x64xf32>
    %115 = tpu.matmul %114, %100, %cst_58 {dimension_numbers = #tpu.dot_dimension_numbers<[2], [1], [1], [2], [0, 0, 0, 1, 1, 2], [0], [0]>} : vector<1x34x34xbf16>, vector<1x34x64xbf16>, vector<1x34x64xf32> -> vector<1x34x64xf32>
    %116 = vector.shape_cast %115 : vector<1x34x64xf32> to vector<34x64xf32>
    %117 = arith.truncf %116 : vector<34x64xf32> to vector<34x64xbf16>
    %cst_59 = arith.constant dense<0.000000e+00> : vector<34x64xf32>
    %118 = tpu.matmul %117, %51, %cst_59 {dimension_numbers = #tpu.dot_dimension_numbers<[1], [0], [0], [1], [0, 0, 1, 1], [], []>} : vector<34x64xbf16>, vector<64x64xbf16>, vector<34x64xf32> -> vector<34x64xf32>
    %119 = arith.addf %41, %118 : vector<34x64xf32>
    %120 = vector.broadcast %53 : vector<1x64xf32> to vector<34x64xf32>
    %121 = arith.addf %119, %120 : vector<34x64xf32>
    %cst_60 = arith.constant dense<0.000000e+00> : vector<34xf32>
    %122 = vector.multi_reduction <add>, %121, %cst_60 [1] : vector<34x64xf32> to vector<34xf32>
    %123 = vector.shape_cast %122 : vector<34xf32> to vector<34x1xf32>
    %cst_61 = arith.constant 6.400000e+01 : f32
    %124 = vector.broadcast %cst_61 : f32 to vector<34x1xf32>
    %125 = arith.divf %123, %124 : vector<34x1xf32>
    %126 = vector.broadcast %125 : vector<34x1xf32> to vector<34x64xf32>
    %127 = arith.subf %121, %126 : vector<34x64xf32>
    %128 = arith.mulf %127, %127 : vector<34x64xf32>
    %cst_62 = arith.constant dense<0.000000e+00> : vector<34xf32>
    %129 = vector.multi_reduction <add>, %128, %cst_62 [1] : vector<34x64xf32> to vector<34xf32>
    %130 = vector.shape_cast %129 : vector<34xf32> to vector<34x1xf32>
    %cst_63 = arith.constant 6.400000e+01 : f32
    %131 = vector.broadcast %cst_63 : f32 to vector<34x1xf32>
    %132 = arith.divf %130, %131 : vector<34x1xf32>
    %133 = vector.broadcast %125 : vector<34x1xf32> to vector<34x64xf32>
    %134 = arith.subf %121, %133 : vector<34x64xf32>
    %cst_64 = arith.constant 9.99999974E-6 : f32
    %135 = vector.broadcast %cst_64 : f32 to vector<34x1xf32>
    %136 = arith.addf %132, %135 : vector<34x1xf32>
    %137 = math.rsqrt %136 : vector<34x1xf32>
    %138 = vector.broadcast %137 : vector<34x1xf32> to vector<34x64xf32>
    %139 = arith.mulf %134, %138 : vector<34x64xf32>
    %140 = vector.broadcast %55 : vector<1x64xf32> to vector<34x64xf32>
    %141 = arith.mulf %139, %140 : vector<34x64xf32>
    %142 = vector.broadcast %57 : vector<1x64xf32> to vector<34x64xf32>
    %143 = arith.addf %141, %142 : vector<34x64xf32>
    %144 = arith.truncf %143 : vector<34x64xf32> to vector<34x64xbf16>
    %cst_65 = arith.constant dense<0.000000e+00> : vector<34x256xf32>
    %145 = tpu.matmul %144, %59, %cst_65 {dimension_numbers = #tpu.dot_dimension_numbers<[1], [0], [0], [1], [0, 0, 1, 1], [], []>} : vector<34x64xbf16>, vector<64x256xbf16>, vector<34x256xf32> -> vector<34x256xf32>
    %146 = vector.broadcast %61 : vector<1x256xf32> to vector<34x256xf32>
    %147 = arith.addf %145, %146 : vector<34x256xf32>
    %cst_66 = arith.constant -1.702000e+00 : f32
    %148 = vector.broadcast %cst_66 : f32 to vector<34x256xf32>
    %149 = arith.mulf %148, %147 : vector<34x256xf32>
    %150 = math.exp %149 : vector<34x256xf32>
    %cst_67 = arith.constant 1.000000e+00 : f32
    %151 = vector.broadcast %cst_67 : f32 to vector<34x256xf32>
    %152 = arith.addf %151, %150 : vector<34x256xf32>
    %153 = tpu.reciprocal %152 {approx = true} : vector<34x256xf32> -> vector<34x256xf32>
    %154 = arith.mulf %147, %153 : vector<34x256xf32>
    %155 = arith.truncf %154 : vector<34x256xf32> to vector<34x256xbf16>
    %cst_68 = arith.constant dense<0.000000e+00> : vector<34x64xf32>
    %156 = tpu.matmul %155, %63, %cst_68 {dimension_numbers = #tpu.dot_dimension_numbers<[1], [0], [0], [1], [0, 0, 1, 1], [], []>} : vector<34x256xbf16>, vector<256x64xbf16>, vector<34x64xf32> -> vector<34x64xf32>
    %157 = vector.broadcast %65 : vector<1x64xf32> to vector<34x64xf32>
    %158 = arith.addf %156, %157 : vector<34x64xf32>
    %159 = arith.addf %121, %158 : vector<34x64xf32>
    %c0_69 = arith.constant 0 : index
    %c0_70 = arith.constant 0 : index
    %160 = vector.load %arg21[%c0_69, %c0_70] : memref<34x64xf32, #tpu.memory_space<vmem>>, vector<34x64xf32>
    tpu.vector_store %arg21[%c0_69, %c0_70], %159 {strides = array<i32>} : memref<34x64xf32, #tpu.memory_space<vmem>>, vector<34x64xf32>,
    %c1_i32_71 = arith.constant 1 : i32
    %161 = arith.cmpi eq, %arg0, %c1_i32_71 : i32
    %162 = arith.extui %161 : i1 to i32
    %c0_i32_72 = arith.constant 0 : i32
    %163 = arith.cmpi ne, %162, %c0_i32_72 : i32
    scf.if %163 {
      %c0_73 = arith.constant 0 : index
      %c0_74 = arith.constant 0 : index
      %164 = vector.load %arg18[%c0_73, %c0_74] : memref<1x64xf32, #tpu.memory_space<vmem>>, vector<1x64xf32>
      %c0_75 = arith.constant 0 : index
      %c0_76 = arith.constant 0 : index
      %165 = vector.load %arg19[%c0_75, %c0_76] : memref<1x64xf32, #tpu.memory_space<vmem>>, vector<1x64xf32>
      %cst_77 = arith.constant dense<0.000000e+00> : vector<34xf32>
      %166 = vector.multi_reduction <add>, %159, %cst_77 [1] : vector<34x64xf32> to vector<34xf32>
      %167 = vector.shape_cast %166 : vector<34xf32> to vector<34x1xf32>
      %cst_78 = arith.constant 6.400000e+01 : f32
      %168 = vector.broadcast %cst_78 : f32 to vector<34x1xf32>
      %169 = arith.divf %167, %168 : vector<34x1xf32>
      %170 = vector.broadcast %169 : vector<34x1xf32> to vector<34x64xf32>
      %171 = arith.subf %159, %170 : vector<34x64xf32>
      %172 = arith.mulf %171, %171 : vector<34x64xf32>
      %cst_79 = arith.constant dense<0.000000e+00> : vector<34xf32>
      %173 = vector.multi_reduction <add>, %172, %cst_79 [1] : vector<34x64xf32> to vector<34xf32>
      %174 = vector.shape_cast %173 : vector<34xf32> to vector<34x1xf32>
      %cst_80 = arith.constant 6.400000e+01 : f32
      %175 = vector.broadcast %cst_80 : f32 to vector<34x1xf32>
      %176 = arith.divf %174, %175 : vector<34x1xf32>
      %177 = vector.broadcast %169 : vector<34x1xf32> to vector<34x64xf32>
      %178 = arith.subf %159, %177 : vector<34x64xf32>
      %cst_81 = arith.constant 9.99999974E-6 : f32
      %179 = vector.broadcast %cst_81 : f32 to vector<34x1xf32>
      %180 = arith.addf %176, %179 : vector<34x1xf32>
      %181 = math.rsqrt %180 : vector<34x1xf32>
      %182 = vector.broadcast %181 : vector<34x1xf32> to vector<34x64xf32>
      %183 = arith.mulf %178, %182 : vector<34x64xf32>
      %184 = vector.broadcast %164 : vector<1x64xf32> to vector<34x64xf32>
      %185 = arith.mulf %183, %184 : vector<34x64xf32>
      %186 = vector.broadcast %165 : vector<1x64xf32> to vector<34x64xf32>
      %187 = arith.addf %185, %186 : vector<34x64xf32>
      %c0_82 = arith.constant 0 : index
      %c0_83 = arith.constant 0 : index
      %188 = vector.load %arg20[%c0_82, %c0_83] : memref<34x64xf32, #tpu.memory_space<vmem>>, vector<34x64xf32>
      tpu.vector_store %arg20[%c0_82, %c0_83], %187 {strides = array<i32>} : memref<34x64xf32, #tpu.memory_space<vmem>>, vector<34x64xf32>,
    } else {
    }
    return
  }
  func.func @transform_0(%arg0: i32) -> (i32, i32) {
    %c0_i32 = arith.constant 0 : i32
    %c0_i32_0 = arith.constant 0 : i32
    %c0_i32_1 = arith.constant 0 : i32
    return %c0_i32, %c0_i32_0 : i32, i32
  }
  func.func @transform_1(%arg0: i32) -> (i32, i32) {
    %c0_i32 = arith.constant 0 : i32
    %c0_i32_0 = arith.constant 0 : i32
    %c0_i32_1 = arith.constant 0 : i32
    return %c0_i32, %c0_i32_0 : i32, i32
  }
  func.func @transform_2(%arg0: i32) -> (i32, i32) {
    %c0_i32 = arith.constant 0 : i32
    %c0_i32_0 = arith.constant 0 : i32
    %c0_i32_1 = arith.constant 0 : i32
    return %c0_i32, %c0_i32_0 : i32, i32
  }
  func.func @transform_3(%arg0: i32) -> (i32, i32) {
    %c0_i32 = arith.constant 0 : i32
    %c0_i32_0 = arith.constant 0 : i32
    %c0_i32_1 = arith.constant 0 : i32
    return %c0_i32, %c0_i32_0 : i32, i32
  }
  func.func @transform_4(%arg0: i32) -> (i32, i32) {
    %c0_i32 = arith.constant 0 : i32
    %c0_i32_0 = arith.constant 0 : i32
    %c0_i32_1 = arith.constant 0 : i32
    return %c0_i32, %c0_i32_0 : i32, i32
  }
  func.func @transform_5(%arg0: i32) -> (i32, i32, i32) {
    %c0_i32 = arith.constant 0 : i32
    %c0_i32_0 = arith.constant 0 : i32
    %c0_i32_1 = arith.constant 0 : i32
    return %arg0, %c0_i32, %c0_i32_0 : i32, i32, i32
  }
  func.func @transform_6(%arg0: i32) -> (i32, i32, i32) {
    %c0_i32 = arith.constant 0 : i32
    %c0_i32_0 = arith.constant 0 : i32
    %c0_i32_1 = arith.constant 0 : i32
    return %arg0, %c0_i32, %c0_i32_0 : i32, i32, i32
  }
  func.func @transform_7(%arg0: i32) -> (i32, i32, i32) {
    %c0_i32 = arith.constant 0 : i32
    %c0_i32_0 = arith.constant 0 : i32
    %c0_i32_1 = arith.constant 0 : i32
    return %arg0, %c0_i32, %c0_i32_0 : i32, i32, i32
  }
  func.func @transform_8(%arg0: i32) -> (i32, i32, i32) {
    %c0_i32 = arith.constant 0 : i32
    %c0_i32_0 = arith.constant 0 : i32
    %c0_i32_1 = arith.constant 0 : i32
    return %arg0, %c0_i32, %c0_i32_0 : i32, i32, i32
  }
  func.func @transform_9(%arg0: i32) -> (i32, i32, i32) {
    %c0_i32 = arith.constant 0 : i32
    %c0_i32_0 = arith.constant 0 : i32
    %c0_i32_1 = arith.constant 0 : i32
    return %arg0, %c0_i32, %c0_i32_0 : i32, i32, i32
  }
  func.func @transform_10(%arg0: i32) -> (i32, i32, i32) {
    %c0_i32 = arith.constant 0 : i32
    %c0_i32_0 = arith.constant 0 : i32
    %c0_i32_1 = arith.constant 0 : i32
    return %arg0, %c0_i32, %c0_i32_0 : i32, i32, i32
  }
  func.func @transform_11(%arg0: i32) -> (i32, i32, i32) {
    %c0_i32 = arith.constant 0 : i32
    %c0_i32_0 = arith.constant 0 : i32
    %c0_i32_1 = arith.constant 0 : i32
    return %arg0, %c0_i32, %c0_i32_0 : i32, i32, i32
  }
  func.func @transform_12(%arg0: i32) -> (i32, i32, i32) {
    %c0_i32 = arith.constant 0 : i32
    %c0_i32_0 = arith.constant 0 : i32
    %c0_i32_1 = arith.constant 0 : i32
    return %arg0, %c0_i32, %c0_i32_0 : i32, i32, i32
  }
  func.func @transform_13(%arg0: i32) -> (i32, i32, i32) {
    %c0_i32 = arith.constant 0 : i32
    %c0_i32_0 = arith.constant 0 : i32
    %c0_i32_1 = arith.constant 0 : i32
    return %arg0, %c0_i32, %c0_i32_0 : i32, i32, i32
  }
  func.func @transform_14(%arg0: i32) -> (i32, i32, i32) {
    %c0_i32 = arith.constant 0 : i32
    %c0_i32_0 = arith.constant 0 : i32
    %c0_i32_1 = arith.constant 0 : i32
    return %arg0, %c0_i32, %c0_i32_0 : i32, i32, i32
  }
  func.func @transform_15(%arg0: i32) -> (i32, i32, i32) {
    %c0_i32 = arith.constant 0 : i32
    %c0_i32_0 = arith.constant 0 : i32
    %c0_i32_1 = arith.constant 0 : i32
    return %arg0, %c0_i32, %c0_i32_0 : i32, i32, i32
  }
  func.func @transform_16(%arg0: i32) -> (i32, i32, i32) {
    %c0_i32 = arith.constant 0 : i32
    %c0_i32_0 = arith.constant 0 : i32
    %c0_i32_1 = arith.constant 0 : i32
    return %arg0, %c0_i32, %c0_i32_0 : i32, i32, i32
  }
  func.func @transform_17(%arg0: i32) -> (i32, i32) {
    %c0_i32 = arith.constant 0 : i32
    %c0_i32_0 = arith.constant 0 : i32
    %c0_i32_1 = arith.constant 0 : i32
    return %c0_i32, %c0_i32_0 : i32, i32
  }
  func.func @transform_18(%arg0: i32) -> (i32, i32) {
    %c0_i32 = arith.constant 0 : i32
    %c0_i32_0 = arith.constant 0 : i32
    %c0_i32_1 = arith.constant 0 : i32
    return %c0_i32, %c0_i32_0 : i32, i32
  }
  func.func @transform_19(%arg0: i32) -> (i32, i32) {
    %c0_i32 = arith.constant 0 : i32
    %c0_i32_0 = arith.constant 0 : i32
    %c0_i32_1 = arith.constant 0 : i32
    return %c0_i32, %c0_i32_0 : i32, i32
  }
}

module attributes {stable_mosaic.version = 11 : i64} {
  func.func @_text_encoder_kernel(%arg0: i32, %arg1: memref<16x64xf32, #tpu.memory_space<vmem>>, %arg2: memref<1x1x64xf32, #tpu.memory_space<vmem>>, %arg3: memref<1x1x64xf32, #tpu.memory_space<vmem>>, %arg4: memref<1x64x192xbf16, #tpu.memory_space<vmem>>, %arg5: memref<1x1x192xf32, #tpu.memory_space<vmem>>, %arg6: memref<1x64x64xbf16, #tpu.memory_space<vmem>>, %arg7: memref<1x1x64xf32, #tpu.memory_space<vmem>>, %arg8: memref<1x1x64xf32, #tpu.memory_space<vmem>>, %arg9: memref<1x1x64xf32, #tpu.memory_space<vmem>>, %arg10: memref<1x64x256xbf16, #tpu.memory_space<vmem>>, %arg11: memref<1x1x256xf32, #tpu.memory_space<vmem>>, %arg12: memref<1x256x64xbf16, #tpu.memory_space<vmem>>, %arg13: memref<1x1x64xf32, #tpu.memory_space<vmem>>, %arg14: memref<1x64xf32, #tpu.memory_space<vmem>>, %arg15: memref<1x64xf32, #tpu.memory_space<vmem>>, %arg16: memref<16x64xf32, #tpu.memory_space<vmem>>, %arg17: memref<16x64xf32, #tpu.memory_space<vmem>>) attributes {dimension_semantics = [#tpu.dimension_semantics<arbitrary>], iteration_bounds = array<i64: 2>, scalar_prefetch = 0 : i64, scratch_operands = 1 : i64, tpu.core_type = #tpu.core_type<tc>, window_params = [{pipeline_mode = #tpu.pipeline_mode<synchronous>, transform_indices = @transform_0, window_bounds = array<i64: 16, 64>}, {transform_indices = @transform_1, window_bounds = array<i64: 1, 1, 64>}, {transform_indices = @transform_2, window_bounds = array<i64: 1, 1, 64>}, {transform_indices = @transform_3, window_bounds = array<i64: 1, 64, 192>}, {transform_indices = @transform_4, window_bounds = array<i64: 1, 1, 192>}, {transform_indices = @transform_5, window_bounds = array<i64: 1, 64, 64>}, {transform_indices = @transform_6, window_bounds = array<i64: 1, 1, 64>}, {transform_indices = @transform_7, window_bounds = array<i64: 1, 1, 64>}, {transform_indices = @transform_8, window_bounds = array<i64: 1, 1, 64>}, {transform_indices = @transform_9, window_bounds = array<i64: 1, 64, 256>}, {transform_indices = @transform_10, window_bounds = array<i64: 1, 1, 256>}, {transform_indices = @transform_11, window_bounds = array<i64: 1, 256, 64>}, {transform_indices = @transform_12, window_bounds = array<i64: 1, 1, 64>}, {pipeline_mode = #tpu.pipeline_mode<synchronous>, transform_indices = @transform_13, window_bounds = array<i64: 1, 64>}, {pipeline_mode = #tpu.pipeline_mode<synchronous>, transform_indices = @transform_14, window_bounds = array<i64: 1, 64>}, {pipeline_mode = #tpu.pipeline_mode<synchronous>, transform_indices = @transform_15, window_bounds = array<i64: 16, 64>}]} {
    %c0_i32 = arith.constant 0 : i32
    %0 = arith.cmpi eq, %arg0, %c0_i32 : i32
    %1 = arith.extui %0 : i1 to i32
    %c0_i32_0 = arith.constant 0 : i32
    %2 = arith.cmpi ne, %1, %c0_i32_0 : i32
    scf.if %2 {
      %c0_73 = arith.constant 0 : index
      %c0_74 = arith.constant 0 : index
      %199 = vector.load %arg1[%c0_73, %c0_74] : memref<16x64xf32, #tpu.memory_space<vmem>>, vector<16x64xf32>
      %c0_75 = arith.constant 0 : index
      %c0_76 = arith.constant 0 : index
      %200 = vector.load %arg17[%c0_75, %c0_76] : memref<16x64xf32, #tpu.memory_space<vmem>>, vector<16x64xf32>
      tpu.vector_store %arg17[%c0_75, %c0_76], %199 {strides = array<i32>} : memref<16x64xf32, #tpu.memory_space<vmem>>, vector<16x64xf32>,
    } else {
    }
    %3 = tpu.iota {dimensions = array<i32: 0>} : vector<16x16xi32>
    %4 = tpu.iota {dimensions = array<i32: 1>} : vector<16x16xi32>
    %c2_i32 = arith.constant 2 : i32
    %c0_i32_1 = arith.constant 0 : i32
    %5 = arith.cmpi eq, %c2_i32, %c0_i32_1 : i32
    %c1_i32 = arith.constant 1 : i32
    %6 = arith.select %5, %c1_i32, %c2_i32 : i32
    %7 = vector.broadcast %6 : i32 to vector<16x16xi32>
    %8 = arith.remsi %3, %7 : vector<16x16xi32>
    %c0_i32_2 = arith.constant 0 : i32
    %9 = vector.broadcast %c0_i32_2 : i32 to vector<16x16xi32>
    %10 = arith.cmpi ne, %8, %9 : vector<16x16xi32>
    %c0_i32_3 = arith.constant 0 : i32
    %11 = vector.broadcast %c0_i32_3 : i32 to vector<16x16xi32>
    %12 = arith.cmpi slt, %8, %11 : vector<16x16xi32>
    %c0_i32_4 = arith.constant 0 : i32
    %13 = arith.cmpi slt, %6, %c0_i32_4 : i32
    %14 = vector.broadcast %13 : i1 to vector<16x16xi1>
    %15 = vector.broadcast %14 : vector<16x16xi1> to vector<16x16xi1>
    %16 = arith.xori %12, %15 : vector<16x16xi1>
    %17 = arith.andi %16, %10 : vector<16x16xi1>
    %18 = vector.broadcast %6 : i32 to vector<16x16xi32>
    %19 = arith.addi %8, %18 : vector<16x16xi32>
    %20 = arith.select %17, %19, %8 : vector<16x16xi1>, vector<16x16xi32>
    %c2_i32_5 = arith.constant 2 : i32
    %c0_i32_6 = arith.constant 0 : i32
    %21 = arith.cmpi eq, %c2_i32_5, %c0_i32_6 : i32
    %c1_i32_7 = arith.constant 1 : i32
    %22 = arith.select %21, %c1_i32_7, %c2_i32_5 : i32
    %23 = vector.broadcast %22 : i32 to vector<16x16xi32>
    %24 = arith.remsi %4, %23 : vector<16x16xi32>
    %c0_i32_8 = arith.constant 0 : i32
    %25 = vector.broadcast %c0_i32_8 : i32 to vector<16x16xi32>
    %26 = arith.cmpi ne, %24, %25 : vector<16x16xi32>
    %c0_i32_9 = arith.constant 0 : i32
    %27 = vector.broadcast %c0_i32_9 : i32 to vector<16x16xi32>
    %28 = arith.cmpi slt, %24, %27 : vector<16x16xi32>
    %c0_i32_10 = arith.constant 0 : i32
    %29 = arith.cmpi slt, %22, %c0_i32_10 : i32
    %30 = vector.broadcast %29 : i1 to vector<16x16xi1>
    %31 = vector.broadcast %30 : vector<16x16xi1> to vector<16x16xi1>
    %32 = arith.xori %28, %31 : vector<16x16xi1>
    %33 = arith.andi %32, %26 : vector<16x16xi1>
    %34 = vector.broadcast %22 : i32 to vector<16x16xi32>
    %35 = arith.addi %24, %34 : vector<16x16xi32>
    %36 = arith.select %33, %35, %24 : vector<16x16xi1>, vector<16x16xi32>
    %37 = arith.cmpi eq, %20, %36 : vector<16x16xi32>
    %38 = arith.cmpi sle, %4, %3 : vector<16x16xi32>
    %39 = arith.andi %37, %38 : vector<16x16xi1>
    %cst = arith.constant 0.000000e+00 : f32
    %cst_11 = arith.constant -1.000000e+30 : f32
    %40 = vector.broadcast %cst : f32 to vector<16x16xf32>
    %41 = vector.broadcast %cst_11 : f32 to vector<16x16xf32>
    %42 = arith.select %39, %40, %41 : vector<16x16xi1>, vector<16x16xf32>
    %c0 = arith.constant 0 : index
    %c0_12 = arith.constant 0 : index
    %43 = vector.load %arg17[%c0, %c0_12] : memref<16x64xf32, #tpu.memory_space<vmem>>, vector<16x64xf32>
    %c0_13 = arith.constant 0 : index
    %c0_14 = arith.constant 0 : index
    %c0_15 = arith.constant 0 : index
    %44 = vector.load %arg2[%c0_13, %c0_14, %c0_15] : memref<1x1x64xf32, #tpu.memory_space<vmem>>, vector<1x1x64xf32>
    %45 = vector.shape_cast %44 : vector<1x1x64xf32> to vector<1x64xf32>
    %c0_16 = arith.constant 0 : index
    %c0_17 = arith.constant 0 : index
    %c0_18 = arith.constant 0 : index
    %46 = vector.load %arg3[%c0_16, %c0_17, %c0_18] : memref<1x1x64xf32, #tpu.memory_space<vmem>>, vector<1x1x64xf32>
    %47 = vector.shape_cast %46 : vector<1x1x64xf32> to vector<1x64xf32>
    %c0_19 = arith.constant 0 : index
    %c0_20 = arith.constant 0 : index
    %c0_21 = arith.constant 0 : index
    %48 = vector.load %arg4[%c0_19, %c0_20, %c0_21] : memref<1x64x192xbf16, #tpu.memory_space<vmem>>, vector<1x64x192xbf16>
    %49 = vector.shape_cast %48 : vector<1x64x192xbf16> to vector<64x192xbf16>
    %c0_22 = arith.constant 0 : index
    %c0_23 = arith.constant 0 : index
    %c0_24 = arith.constant 0 : index
    %50 = vector.load %arg5[%c0_22, %c0_23, %c0_24] : memref<1x1x192xf32, #tpu.memory_space<vmem>>, vector<1x1x192xf32>
    %51 = vector.shape_cast %50 : vector<1x1x192xf32> to vector<1x192xf32>
    %c0_25 = arith.constant 0 : index
    %c0_26 = arith.constant 0 : index
    %c0_27 = arith.constant 0 : index
    %52 = vector.load %arg6[%c0_25, %c0_26, %c0_27] : memref<1x64x64xbf16, #tpu.memory_space<vmem>>, vector<1x64x64xbf16>
    %53 = vector.shape_cast %52 : vector<1x64x64xbf16> to vector<64x64xbf16>
    %c0_28 = arith.constant 0 : index
    %c0_29 = arith.constant 0 : index
    %c0_30 = arith.constant 0 : index
    %54 = vector.load %arg7[%c0_28, %c0_29, %c0_30] : memref<1x1x64xf32, #tpu.memory_space<vmem>>, vector<1x1x64xf32>
    %55 = vector.shape_cast %54 : vector<1x1x64xf32> to vector<1x64xf32>
    %c0_31 = arith.constant 0 : index
    %c0_32 = arith.constant 0 : index
    %c0_33 = arith.constant 0 : index
    %56 = vector.load %arg8[%c0_31, %c0_32, %c0_33] : memref<1x1x64xf32, #tpu.memory_space<vmem>>, vector<1x1x64xf32>
    %57 = vector.shape_cast %56 : vector<1x1x64xf32> to vector<1x64xf32>
    %c0_34 = arith.constant 0 : index
    %c0_35 = arith.constant 0 : index
    %c0_36 = arith.constant 0 : index
    %58 = vector.load %arg9[%c0_34, %c0_35, %c0_36] : memref<1x1x64xf32, #tpu.memory_space<vmem>>, vector<1x1x64xf32>
    %59 = vector.shape_cast %58 : vector<1x1x64xf32> to vector<1x64xf32>
    %c0_37 = arith.constant 0 : index
    %c0_38 = arith.constant 0 : index
    %c0_39 = arith.constant 0 : index
    %60 = vector.load %arg10[%c0_37, %c0_38, %c0_39] : memref<1x64x256xbf16, #tpu.memory_space<vmem>>, vector<1x64x256xbf16>
    %61 = vector.shape_cast %60 : vector<1x64x256xbf16> to vector<64x256xbf16>
    %c0_40 = arith.constant 0 : index
    %c0_41 = arith.constant 0 : index
    %c0_42 = arith.constant 0 : index
    %62 = vector.load %arg11[%c0_40, %c0_41, %c0_42] : memref<1x1x256xf32, #tpu.memory_space<vmem>>, vector<1x1x256xf32>
    %63 = vector.shape_cast %62 : vector<1x1x256xf32> to vector<1x256xf32>
    %c0_43 = arith.constant 0 : index
    %c0_44 = arith.constant 0 : index
    %c0_45 = arith.constant 0 : index
    %64 = vector.load %arg12[%c0_43, %c0_44, %c0_45] : memref<1x256x64xbf16, #tpu.memory_space<vmem>>, vector<1x256x64xbf16>
    %65 = vector.shape_cast %64 : vector<1x256x64xbf16> to vector<256x64xbf16>
    %c0_46 = arith.constant 0 : index
    %c0_47 = arith.constant 0 : index
    %c0_48 = arith.constant 0 : index
    %66 = vector.load %arg13[%c0_46, %c0_47, %c0_48] : memref<1x1x64xf32, #tpu.memory_space<vmem>>, vector<1x1x64xf32>
    %67 = vector.shape_cast %66 : vector<1x1x64xf32> to vector<1x64xf32>
    %cst_49 = arith.constant dense<0.000000e+00> : vector<16xf32>
    %68 = vector.multi_reduction <add>, %43, %cst_49 [1] : vector<16x64xf32> to vector<16xf32>
    %69 = vector.shape_cast %68 : vector<16xf32> to vector<16x1xf32>
    %cst_50 = arith.constant 6.400000e+01 : f32
    %70 = vector.broadcast %cst_50 : f32 to vector<16x1xf32>
    %71 = arith.divf %69, %70 : vector<16x1xf32>
    %72 = vector.broadcast %71 : vector<16x1xf32> to vector<16x64xf32>
    %73 = arith.subf %43, %72 : vector<16x64xf32>
    %74 = arith.mulf %73, %73 : vector<16x64xf32>
    %cst_51 = arith.constant dense<0.000000e+00> : vector<16xf32>
    %75 = vector.multi_reduction <add>, %74, %cst_51 [1] : vector<16x64xf32> to vector<16xf32>
    %76 = vector.shape_cast %75 : vector<16xf32> to vector<16x1xf32>
    %cst_52 = arith.constant 6.400000e+01 : f32
    %77 = vector.broadcast %cst_52 : f32 to vector<16x1xf32>
    %78 = arith.divf %76, %77 : vector<16x1xf32>
    %79 = vector.broadcast %71 : vector<16x1xf32> to vector<16x64xf32>
    %80 = arith.subf %43, %79 : vector<16x64xf32>
    %cst_53 = arith.constant 9.99999974E-6 : f32
    %81 = vector.broadcast %cst_53 : f32 to vector<16x1xf32>
    %82 = arith.addf %78, %81 : vector<16x1xf32>
    %83 = math.rsqrt %82 : vector<16x1xf32>
    %84 = vector.broadcast %83 : vector<16x1xf32> to vector<16x64xf32>
    %85 = arith.mulf %80, %84 : vector<16x64xf32>
    %86 = vector.broadcast %45 : vector<1x64xf32> to vector<16x64xf32>
    %87 = arith.mulf %85, %86 : vector<16x64xf32>
    %88 = vector.broadcast %47 : vector<1x64xf32> to vector<16x64xf32>
    %89 = arith.addf %87, %88 : vector<16x64xf32>
    %90 = arith.truncf %89 : vector<16x64xf32> to vector<16x64xbf16>
    %cst_54 = arith.constant dense<0.000000e+00> : vector<16x192xf32>
    %91 = tpu.matmul %90, %49, %cst_54 {dimension_numbers = #tpu.dot_dimension_numbers<[1], [0], [0], [1], [0, 0, 1, 1], [], []>} : vector<16x64xbf16>, vector<64x192xbf16>, vector<16x192xf32> -> vector<16x192xf32>
    %92 = vector.broadcast %51 : vector<1x192xf32> to vector<16x192xf32>
    %93 = arith.addf %91, %92 : vector<16x192xf32>
    %94 = vector.extract_strided_slice %93 {offsets = [0, 0], sizes = [16, 64], strides = [1, 1]} : vector<16x192xf32> to vector<16x64xf32>
    %95 = arith.truncf %94 : vector<16x64xf32> to vector<16x64xbf16>
    %96 = vector.extract_strided_slice %93 {offsets = [0, 64], sizes = [16, 64], strides = [1, 1]} : vector<16x192xf32> to vector<16x64xf32>
    %97 = arith.truncf %96 : vector<16x64xf32> to vector<16x64xbf16>
    %98 = vector.extract_strided_slice %93 {offsets = [0, 128], sizes = [16, 64], strides = [1, 1]} : vector<16x192xf32> to vector<16x64xf32>
    %99 = arith.truncf %98 : vector<16x64xf32> to vector<16x64xbf16>
    %100 = vector.extract_strided_slice %95 {offsets = [0, 0], sizes = [16, 16], strides = [1, 1]} : vector<16x64xbf16> to vector<16x16xbf16>
    %101 = vector.extract_strided_slice %95 {offsets = [0, 16], sizes = [16, 16], strides = [1, 1]} : vector<16x64xbf16> to vector<16x16xbf16>
    %102 = vector.extract_strided_slice %95 {offsets = [0, 32], sizes = [16, 16], strides = [1, 1]} : vector<16x64xbf16> to vector<16x16xbf16>
    %103 = vector.extract_strided_slice %95 {offsets = [0, 48], sizes = [16, 16], strides = [1, 1]} : vector<16x64xbf16> to vector<16x16xbf16>
    %104 = vector.shape_cast %100 : vector<16x16xbf16> to vector<1x16x16xbf16>
    %105 = vector.shape_cast %101 : vector<16x16xbf16> to vector<1x16x16xbf16>
    %106 = vector.shape_cast %102 : vector<16x16xbf16> to vector<1x16x16xbf16>
    %107 = vector.shape_cast %103 : vector<16x16xbf16> to vector<1x16x16xbf16>
    %108 = tpu.concatenate %104, %105, %106, %107 in 0 : vector<1x16x16xbf16>, vector<1x16x16xbf16>, vector<1x16x16xbf16>, vector<1x16x16xbf16> -> vector<4x16x16xbf16>
    %109 = vector.extract_strided_slice %97 {offsets = [0, 0], sizes = [16, 16], strides = [1, 1]} : vector<16x64xbf16> to vector<16x16xbf16>
    %110 = vector.extract_strided_slice %97 {offsets = [0, 16], sizes = [16, 16], strides = [1, 1]} : vector<16x64xbf16> to vector<16x16xbf16>
    %111 = vector.extract_strided_slice %97 {offsets = [0, 32], sizes = [16, 16], strides = [1, 1]} : vector<16x64xbf16> to vector<16x16xbf16>
    %112 = vector.extract_strided_slice %97 {offsets = [0, 48], sizes = [16, 16], strides = [1, 1]} : vector<16x64xbf16> to vector<16x16xbf16>
    %113 = vector.shape_cast %109 : vector<16x16xbf16> to vector<1x16x16xbf16>
    %114 = vector.shape_cast %110 : vector<16x16xbf16> to vector<1x16x16xbf16>
    %115 = vector.shape_cast %111 : vector<16x16xbf16> to vector<1x16x16xbf16>
    %116 = vector.shape_cast %112 : vector<16x16xbf16> to vector<1x16x16xbf16>
    %117 = tpu.concatenate %113, %114, %115, %116 in 0 : vector<1x16x16xbf16>, vector<1x16x16xbf16>, vector<1x16x16xbf16>, vector<1x16x16xbf16> -> vector<4x16x16xbf16>
    %118 = vector.extract_strided_slice %99 {offsets = [0, 0], sizes = [16, 16], strides = [1, 1]} : vector<16x64xbf16> to vector<16x16xbf16>
    %119 = vector.extract_strided_slice %99 {offsets = [0, 16], sizes = [16, 16], strides = [1, 1]} : vector<16x64xbf16> to vector<16x16xbf16>
    %120 = vector.extract_strided_slice %99 {offsets = [0, 32], sizes = [16, 16], strides = [1, 1]} : vector<16x64xbf16> to vector<16x16xbf16>
    %121 = vector.extract_strided_slice %99 {offsets = [0, 48], sizes = [16, 16], strides = [1, 1]} : vector<16x64xbf16> to vector<16x16xbf16>
    %122 = vector.shape_cast %118 : vector<16x16xbf16> to vector<1x16x16xbf16>
    %123 = vector.shape_cast %119 : vector<16x16xbf16> to vector<1x16x16xbf16>
    %124 = vector.shape_cast %120 : vector<16x16xbf16> to vector<1x16x16xbf16>
    %125 = vector.shape_cast %121 : vector<16x16xbf16> to vector<1x16x16xbf16>
    %126 = tpu.concatenate %122, %123, %124, %125 in 0 : vector<1x16x16xbf16>, vector<1x16x16xbf16>, vector<1x16x16xbf16>, vector<1x16x16xbf16> -> vector<4x16x16xbf16>
    %cst_55 = arith.constant dense<0.000000e+00> : vector<4x16x16xf32>
    %127 = tpu.matmul %108, %117, %cst_55 {dimension_numbers = #tpu.dot_dimension_numbers<[2], [2], [1], [1], [0, 0, 0, 1, 1, 1], [0], [0]>} : vector<4x16x16xbf16>, vector<4x16x16xbf16>, vector<4x16x16xf32> -> vector<4x16x16xf32>
    %128 = vector.shape_cast %42 : vector<16x16xf32> to vector<1x16x16xf32>
    %129 = vector.broadcast %128 : vector<1x16x16xf32> to vector<4x16x16xf32>
    %130 = arith.addf %127, %129 : vector<4x16x16xf32>
    %cst_56 = arith.constant dense<0xFF800000> : vector<4x16xf32>
    %131 = vector.multi_reduction <maximumf>, %130, %cst_56 [2] : vector<4x16x16xf32> to vector<4x16xf32>
    %132 = vector.shape_cast %131 : vector<4x16xf32> to vector<4x16x1xf32>
    %133 = vector.broadcast %132 : vector<4x16x1xf32> to vector<4x16x16xf32>
    %134 = arith.subf %130, %133 : vector<4x16x16xf32>
    %135 = math.exp %134 : vector<4x16x16xf32>
    %cst_57 = arith.constant dense<0.000000e+00> : vector<4x16xf32>
    %136 = vector.multi_reduction <add>, %135, %cst_57 [2] : vector<4x16x16xf32> to vector<4x16xf32>
    %137 = vector.shape_cast %136 : vector<4x16xf32> to vector<4x16x1xf32>
    %138 = tpu.reciprocal %137 {approx = true} : vector<4x16x1xf32> -> vector<4x16x1xf32>
    %139 = vector.broadcast %138 : vector<4x16x1xf32> to vector<4x16x16xf32>
    %140 = arith.mulf %135, %139 : vector<4x16x16xf32>
    %141 = arith.truncf %140 : vector<4x16x16xf32> to vector<4x16x16xbf16>
    %cst_58 = arith.constant dense<0.000000e+00> : vector<4x16x16xf32>
    %142 = tpu.matmul %141, %126, %cst_58 {dimension_numbers = #tpu.dot_dimension_numbers<[2], [1], [1], [2], [0, 0, 0, 1, 1, 2], [0], [0]>} : vector<4x16x16xbf16>, vector<4x16x16xbf16>, vector<4x16x16xf32> -> vector<4x16x16xf32>
    %143 = vector.extract_strided_slice %142 {offsets = [0, 0, 0], sizes = [1, 16, 16], strides = [1, 1, 1]} : vector<4x16x16xf32> to vector<1x16x16xf32>
    %144 = vector.shape_cast %143 : vector<1x16x16xf32> to vector<16x16xf32>
    %145 = vector.extract_strided_slice %142 {offsets = [1, 0, 0], sizes = [1, 16, 16], strides = [1, 1, 1]} : vector<4x16x16xf32> to vector<1x16x16xf32>
    %146 = vector.shape_cast %145 : vector<1x16x16xf32> to vector<16x16xf32>
    %147 = vector.extract_strided_slice %142 {offsets = [2, 0, 0], sizes = [1, 16, 16], strides = [1, 1, 1]} : vector<4x16x16xf32> to vector<1x16x16xf32>
    %148 = vector.shape_cast %147 : vector<1x16x16xf32> to vector<16x16xf32>
    %149 = vector.extract_strided_slice %142 {offsets = [3, 0, 0], sizes = [1, 16, 16], strides = [1, 1, 1]} : vector<4x16x16xf32> to vector<1x16x16xf32>
    %150 = vector.shape_cast %149 : vector<1x16x16xf32> to vector<16x16xf32>
    %151 = tpu.concatenate %144, %146, %148, %150 in 1 : vector<16x16xf32>, vector<16x16xf32>, vector<16x16xf32>, vector<16x16xf32> -> vector<16x64xf32>
    %152 = arith.truncf %151 : vector<16x64xf32> to vector<16x64xbf16>
    %cst_59 = arith.constant dense<0.000000e+00> : vector<16x64xf32>
    %153 = tpu.matmul %152, %53, %cst_59 {dimension_numbers = #tpu.dot_dimension_numbers<[1], [0], [0], [1], [0, 0, 1, 1], [], []>} : vector<16x64xbf16>, vector<64x64xbf16>, vector<16x64xf32> -> vector<16x64xf32>
    %154 = arith.addf %43, %153 : vector<16x64xf32>
    %155 = vector.broadcast %55 : vector<1x64xf32> to vector<16x64xf32>
    %156 = arith.addf %154, %155 : vector<16x64xf32>
    %cst_60 = arith.constant dense<0.000000e+00> : vector<16xf32>
    %157 = vector.multi_reduction <add>, %156, %cst_60 [1] : vector<16x64xf32> to vector<16xf32>
    %158 = vector.shape_cast %157 : vector<16xf32> to vector<16x1xf32>
    %cst_61 = arith.constant 6.400000e+01 : f32
    %159 = vector.broadcast %cst_61 : f32 to vector<16x1xf32>
    %160 = arith.divf %158, %159 : vector<16x1xf32>
    %161 = vector.broadcast %160 : vector<16x1xf32> to vector<16x64xf32>
    %162 = arith.subf %156, %161 : vector<16x64xf32>
    %163 = arith.mulf %162, %162 : vector<16x64xf32>
    %cst_62 = arith.constant dense<0.000000e+00> : vector<16xf32>
    %164 = vector.multi_reduction <add>, %163, %cst_62 [1] : vector<16x64xf32> to vector<16xf32>
    %165 = vector.shape_cast %164 : vector<16xf32> to vector<16x1xf32>
    %cst_63 = arith.constant 6.400000e+01 : f32
    %166 = vector.broadcast %cst_63 : f32 to vector<16x1xf32>
    %167 = arith.divf %165, %166 : vector<16x1xf32>
    %168 = vector.broadcast %160 : vector<16x1xf32> to vector<16x64xf32>
    %169 = arith.subf %156, %168 : vector<16x64xf32>
    %cst_64 = arith.constant 9.99999974E-6 : f32
    %170 = vector.broadcast %cst_64 : f32 to vector<16x1xf32>
    %171 = arith.addf %167, %170 : vector<16x1xf32>
    %172 = math.rsqrt %171 : vector<16x1xf32>
    %173 = vector.broadcast %172 : vector<16x1xf32> to vector<16x64xf32>
    %174 = arith.mulf %169, %173 : vector<16x64xf32>
    %175 = vector.broadcast %57 : vector<1x64xf32> to vector<16x64xf32>
    %176 = arith.mulf %174, %175 : vector<16x64xf32>
    %177 = vector.broadcast %59 : vector<1x64xf32> to vector<16x64xf32>
    %178 = arith.addf %176, %177 : vector<16x64xf32>
    %179 = arith.truncf %178 : vector<16x64xf32> to vector<16x64xbf16>
    %cst_65 = arith.constant dense<0.000000e+00> : vector<16x256xf32>
    %180 = tpu.matmul %179, %61, %cst_65 {dimension_numbers = #tpu.dot_dimension_numbers<[1], [0], [0], [1], [0, 0, 1, 1], [], []>} : vector<16x64xbf16>, vector<64x256xbf16>, vector<16x256xf32> -> vector<16x256xf32>
    %181 = vector.broadcast %63 : vector<1x256xf32> to vector<16x256xf32>
    %182 = arith.addf %180, %181 : vector<16x256xf32>
    %cst_66 = arith.constant -1.702000e+00 : f32
    %183 = vector.broadcast %cst_66 : f32 to vector<16x256xf32>
    %184 = arith.mulf %183, %182 : vector<16x256xf32>
    %185 = math.exp %184 : vector<16x256xf32>
    %cst_67 = arith.constant 1.000000e+00 : f32
    %186 = vector.broadcast %cst_67 : f32 to vector<16x256xf32>
    %187 = arith.addf %186, %185 : vector<16x256xf32>
    %188 = tpu.reciprocal %187 {approx = true} : vector<16x256xf32> -> vector<16x256xf32>
    %189 = arith.mulf %182, %188 : vector<16x256xf32>
    %190 = arith.truncf %189 : vector<16x256xf32> to vector<16x256xbf16>
    %cst_68 = arith.constant dense<0.000000e+00> : vector<16x64xf32>
    %191 = tpu.matmul %190, %65, %cst_68 {dimension_numbers = #tpu.dot_dimension_numbers<[1], [0], [0], [1], [0, 0, 1, 1], [], []>} : vector<16x256xbf16>, vector<256x64xbf16>, vector<16x64xf32> -> vector<16x64xf32>
    %192 = vector.broadcast %67 : vector<1x64xf32> to vector<16x64xf32>
    %193 = arith.addf %191, %192 : vector<16x64xf32>
    %194 = arith.addf %156, %193 : vector<16x64xf32>
    %c0_69 = arith.constant 0 : index
    %c0_70 = arith.constant 0 : index
    %195 = vector.load %arg17[%c0_69, %c0_70] : memref<16x64xf32, #tpu.memory_space<vmem>>, vector<16x64xf32>
    tpu.vector_store %arg17[%c0_69, %c0_70], %194 {strides = array<i32>} : memref<16x64xf32, #tpu.memory_space<vmem>>, vector<16x64xf32>,
    %c1_i32_71 = arith.constant 1 : i32
    %196 = arith.cmpi eq, %arg0, %c1_i32_71 : i32
    %197 = arith.extui %196 : i1 to i32
    %c0_i32_72 = arith.constant 0 : i32
    %198 = arith.cmpi ne, %197, %c0_i32_72 : i32
    scf.if %198 {
      %c0_73 = arith.constant 0 : index
      %c0_74 = arith.constant 0 : index
      %199 = vector.load %arg14[%c0_73, %c0_74] : memref<1x64xf32, #tpu.memory_space<vmem>>, vector<1x64xf32>
      %c0_75 = arith.constant 0 : index
      %c0_76 = arith.constant 0 : index
      %200 = vector.load %arg15[%c0_75, %c0_76] : memref<1x64xf32, #tpu.memory_space<vmem>>, vector<1x64xf32>
      %cst_77 = arith.constant dense<0.000000e+00> : vector<16xf32>
      %201 = vector.multi_reduction <add>, %194, %cst_77 [1] : vector<16x64xf32> to vector<16xf32>
      %202 = vector.shape_cast %201 : vector<16xf32> to vector<16x1xf32>
      %cst_78 = arith.constant 6.400000e+01 : f32
      %203 = vector.broadcast %cst_78 : f32 to vector<16x1xf32>
      %204 = arith.divf %202, %203 : vector<16x1xf32>
      %205 = vector.broadcast %204 : vector<16x1xf32> to vector<16x64xf32>
      %206 = arith.subf %194, %205 : vector<16x64xf32>
      %207 = arith.mulf %206, %206 : vector<16x64xf32>
      %cst_79 = arith.constant dense<0.000000e+00> : vector<16xf32>
      %208 = vector.multi_reduction <add>, %207, %cst_79 [1] : vector<16x64xf32> to vector<16xf32>
      %209 = vector.shape_cast %208 : vector<16xf32> to vector<16x1xf32>
      %cst_80 = arith.constant 6.400000e+01 : f32
      %210 = vector.broadcast %cst_80 : f32 to vector<16x1xf32>
      %211 = arith.divf %209, %210 : vector<16x1xf32>
      %212 = vector.broadcast %204 : vector<16x1xf32> to vector<16x64xf32>
      %213 = arith.subf %194, %212 : vector<16x64xf32>
      %cst_81 = arith.constant 9.99999974E-6 : f32
      %214 = vector.broadcast %cst_81 : f32 to vector<16x1xf32>
      %215 = arith.addf %211, %214 : vector<16x1xf32>
      %216 = math.rsqrt %215 : vector<16x1xf32>
      %217 = vector.broadcast %216 : vector<16x1xf32> to vector<16x64xf32>
      %218 = arith.mulf %213, %217 : vector<16x64xf32>
      %219 = vector.broadcast %199 : vector<1x64xf32> to vector<16x64xf32>
      %220 = arith.mulf %218, %219 : vector<16x64xf32>
      %221 = vector.broadcast %200 : vector<1x64xf32> to vector<16x64xf32>
      %222 = arith.addf %220, %221 : vector<16x64xf32>
      %c0_82 = arith.constant 0 : index
      %c0_83 = arith.constant 0 : index
      %223 = vector.load %arg16[%c0_82, %c0_83] : memref<16x64xf32, #tpu.memory_space<vmem>>, vector<16x64xf32>
      tpu.vector_store %arg16[%c0_82, %c0_83], %222 {strides = array<i32>} : memref<16x64xf32, #tpu.memory_space<vmem>>, vector<16x64xf32>,
    } else {
    }
    return
  }
  func.func @transform_0(%arg0: i32) -> (i32, i32) {
    %c0_i32 = arith.constant 0 : i32
    %c0_i32_0 = arith.constant 0 : i32
    %c0_i32_1 = arith.constant 0 : i32
    return %c0_i32, %c0_i32_0 : i32, i32
  }
  func.func @transform_1(%arg0: i32) -> (i32, i32, i32) {
    %c0_i32 = arith.constant 0 : i32
    %c0_i32_0 = arith.constant 0 : i32
    %c0_i32_1 = arith.constant 0 : i32
    return %arg0, %c0_i32, %c0_i32_0 : i32, i32, i32
  }
  func.func @transform_2(%arg0: i32) -> (i32, i32, i32) {
    %c0_i32 = arith.constant 0 : i32
    %c0_i32_0 = arith.constant 0 : i32
    %c0_i32_1 = arith.constant 0 : i32
    return %arg0, %c0_i32, %c0_i32_0 : i32, i32, i32
  }
  func.func @transform_3(%arg0: i32) -> (i32, i32, i32) {
    %c0_i32 = arith.constant 0 : i32
    %c0_i32_0 = arith.constant 0 : i32
    %c0_i32_1 = arith.constant 0 : i32
    return %arg0, %c0_i32, %c0_i32_0 : i32, i32, i32
  }
  func.func @transform_4(%arg0: i32) -> (i32, i32, i32) {
    %c0_i32 = arith.constant 0 : i32
    %c0_i32_0 = arith.constant 0 : i32
    %c0_i32_1 = arith.constant 0 : i32
    return %arg0, %c0_i32, %c0_i32_0 : i32, i32, i32
  }
  func.func @transform_5(%arg0: i32) -> (i32, i32, i32) {
    %c0_i32 = arith.constant 0 : i32
    %c0_i32_0 = arith.constant 0 : i32
    %c0_i32_1 = arith.constant 0 : i32
    return %arg0, %c0_i32, %c0_i32_0 : i32, i32, i32
  }
  func.func @transform_6(%arg0: i32) -> (i32, i32, i32) {
    %c0_i32 = arith.constant 0 : i32
    %c0_i32_0 = arith.constant 0 : i32
    %c0_i32_1 = arith.constant 0 : i32
    return %arg0, %c0_i32, %c0_i32_0 : i32, i32, i32
  }
  func.func @transform_7(%arg0: i32) -> (i32, i32, i32) {
    %c0_i32 = arith.constant 0 : i32
    %c0_i32_0 = arith.constant 0 : i32
    %c0_i32_1 = arith.constant 0 : i32
    return %arg0, %c0_i32, %c0_i32_0 : i32, i32, i32
  }
  func.func @transform_8(%arg0: i32) -> (i32, i32, i32) {
    %c0_i32 = arith.constant 0 : i32
    %c0_i32_0 = arith.constant 0 : i32
    %c0_i32_1 = arith.constant 0 : i32
    return %arg0, %c0_i32, %c0_i32_0 : i32, i32, i32
  }
  func.func @transform_9(%arg0: i32) -> (i32, i32, i32) {
    %c0_i32 = arith.constant 0 : i32
    %c0_i32_0 = arith.constant 0 : i32
    %c0_i32_1 = arith.constant 0 : i32
    return %arg0, %c0_i32, %c0_i32_0 : i32, i32, i32
  }
  func.func @transform_10(%arg0: i32) -> (i32, i32, i32) {
    %c0_i32 = arith.constant 0 : i32
    %c0_i32_0 = arith.constant 0 : i32
    %c0_i32_1 = arith.constant 0 : i32
    return %arg0, %c0_i32, %c0_i32_0 : i32, i32, i32
  }
  func.func @transform_11(%arg0: i32) -> (i32, i32, i32) {
    %c0_i32 = arith.constant 0 : i32
    %c0_i32_0 = arith.constant 0 : i32
    %c0_i32_1 = arith.constant 0 : i32
    return %arg0, %c0_i32, %c0_i32_0 : i32, i32, i32
  }
  func.func @transform_12(%arg0: i32) -> (i32, i32, i32) {
    %c0_i32 = arith.constant 0 : i32
    %c0_i32_0 = arith.constant 0 : i32
    %c0_i32_1 = arith.constant 0 : i32
    return %arg0, %c0_i32, %c0_i32_0 : i32, i32, i32
  }
  func.func @transform_13(%arg0: i32) -> (i32, i32) {
    %c0_i32 = arith.constant 0 : i32
    %c0_i32_0 = arith.constant 0 : i32
    %c0_i32_1 = arith.constant 0 : i32
    return %c0_i32, %c0_i32_0 : i32, i32
  }
  func.func @transform_14(%arg0: i32) -> (i32, i32) {
    %c0_i32 = arith.constant 0 : i32
    %c0_i32_0 = arith.constant 0 : i32
    %c0_i32_1 = arith.constant 0 : i32
    return %c0_i32, %c0_i32_0 : i32, i32
  }
  func.func @transform_15(%arg0: i32) -> (i32, i32) {
    %c0_i32 = arith.constant 0 : i32
    %c0_i32_0 = arith.constant 0 : i32
    %c0_i32_1 = arith.constant 0 : i32
    return %c0_i32, %c0_i32_0 : i32, i32
  }
}

</mosaic_0001>

<bundles_post_ra>
// kernel: tile.9
= control target key start
LH: loop header
LB: loop body
LE: loop exit
PB: predicated region body
PF: predicated region fallthrough
CT: control target
= control target key end

     0   :  { %vm3_vm0 = vcmask 523264   ;;  %s11_s6 = smov 3  ;;  %s74_s0 = inlined_call_operand.vmem [shape: f32[2,17,64], index: 0, kind: input, shape index: {}]   ;;  %s75_s1 = inlined_call_operand.vmem [shape: f32[34,64], index: 1, kind: output, shape index: {}]  }
   0x1   :  { %v2_v0 = vld [vmem:[%s74_s0] sm:$0xff]   ;;  %v26_v1 = vld [vmem:[%s74_s0 + $0x8] sm:$0xff]  }
   0x2   :  { %v28_v2 = vld [vmem:[%s74_s0 + $0x10] ss:$8 sm:%s11_s6]   ;;  %4 = vst.msk [vmem:[%s75_s1] sm:$0xff] %vm3_vm0, %v2_v0  }
   0x3   :  { %v30_v3 = vld [vmem:[%s74_s0 + $0x19] sm:$0xff]   ;;  %27 = vst.msk [vmem:[%s75_s1 + $0x8] sm:$0xff] %vm3_vm0, %v26_v1   ;;  %v32_v4 = vld [vmem:[%s74_s0 + $0x21] sm:$0xff]  }
   0x4   :  { %29 = vst.msk [vmem:[%s75_s1 + $0x10] sm:$0x3] %vm3_vm0, %v28_v2  }
   0x5   :  { %31 = vst.msk [vmem:[%s75_s1 + $0x12] sm:$0xff] %vm3_vm0, %v30_v3  }
   0x6   :  { %33 = vst.msk [vmem:[%s75_s1 + $0x1a] sm:$0xff] %vm3_vm0, %v32_v4  }

// kernel: clip_forward.2
= control target key start
LH: loop header
LB: loop body
LE: loop exit
PB: predicated region body
PF: predicated region fallthrough
CT: control target
= control target key end

     0   :  { %s3604_s0 = inlined_call_operand.vmem [shape: bf16[34,48], index: 0, kind: input, shape index: {}]   ;;  %s3605_s1 = inlined_call_operand.vmem [shape: bf16[48,64], index: 1, kind: input, shape index: {}]   ;;  %s3606_s2 = inlined_call_operand.vmem [shape: f32[34,64], index: 2, kind: input, shape index: {}]   ;;  %s3607_s3 = inlined_call_operand.vmem [shape: f32[1,64], index: 3, kind: input, shape index: {}]   ;;  %s3608_s4 = inlined_call_operand.vmem [shape: f32[1,64], index: 4, kind: input, shape index: {}]   ;;  %s3609_s5 = inlined_call_operand.vmem [shape: f32[2,1,64], index: 5, kind: input, shape index: {}]   ;;  %s3610_s6 = inlined_call_operand.vmem [shape: f32[2,1,64], index: 6, kind: input, shape index: {}]   ;;  %s3611_s7 = inlined_call_operand.vmem [shape: bf16[2,64,192], index: 7, kind: input, shape index: {}]   ;;  %s3612_s8 = inlined_call_operand.vmem [shape: f32[2,1,192], index: 8, kind: input, shape index: {}]   ;;  %s3613_s9 = inlined_call_operand.vmem [shape: bf16[2,64,64], index: 9, kind: input, shape index: {}]   ;;  %s3614_s10 = inlined_call_operand.vmem [shape: f32[2,1,64], index: 10, kind: input, shape index: {}]   ;;  %s3615_s11 = inlined_call_operand.vmem [shape: f32[2,1,64], index: 11, kind: input, shape index: {}]   ;;  %s3616_s12 = inlined_call_operand.vmem [shape: f32[2,1,64], index: 12, kind: input, shape index: {}]   ;;  %s3617_s13 = inlined_call_operand.vmem [shape: bf16[2,64,256], index: 13, kind: input, shape index: {}]   ;;  %s3618_s14 = inlined_call_operand.vmem [shape: f32[2,1,256], index: 14, kind: input, shape index: {}]   ;;  %s3619_s15 = inlined_call_operand.vmem [shape: bf16[2,256,64], index: 15, kind: input, shape index: {}]   ;;  %s3620_s16 = inlined_call_operand.vmem [shape: f32[2,1,64], index: 16, kind: input, shape index: {}]   ;;  %s3621_s17 = inlined_call_operand.vmem [shape: f32[1,64], index: 17, kind: input, shape index: {}]   ;;  %s3622_s18 = inlined_call_operand.vmem [shape: f32[1,64], index: 18, kind: input, shape index: {}]   ;;  %s3623_s19 = inlined_call_operand.vmem [shape: f32[34,64], index: 19, kind: output, shape index: {}]  }
   0x1   :  { %3629 = sst [smem:[#allocation5_spill]] %s3604_s0  ;;  %s3027_s0 = smov 0  }
   0x2   :  { %3630 = sst [smem:[#allocation6_spill]] %s3605_s1 }
   0x3   :  { %3631 = sst [smem:[#allocation7_spill]] %s3606_s2 }
   0x4   :  { %3632 = sst [smem:[#allocation8_spill]] %s3607_s3 }
   0x5   :  { %3633 = sst [smem:[#allocation9_spill]] %s3610_s6 }
   0x6   :  { %3634 = sst [smem:[#allocation10_spill]] %s3611_s7 }
   0x7   :  { %3635 = sst [smem:[#allocation11_spill]] %s3612_s8 }
   0x8   :  { %3636 = sst [smem:[#allocation12_spill]] %s3621_s17 }
   0x9   :  { %3637 = sst [smem:[#allocation13_spill]] %s3622_s18 }
   0xa   :  { %3638 = sst [smem:[#allocation14_spill]] %s3623_s19 }
   0xb LB: > { %3639 = sst [smem:[#allocation3_spill]] %s2920_s0  ;;  %s3033_s30 = sadd.s32 4294967295, %s2920_s0   ;;  %s2920_s0 = sphi %s3027_s0, %s29_s0  }
   0xc   : > { %p2522_p0 = scmp.ge.s32.totalorder %s2920_s0, 1  ;;  %p628_p1 = scmp.lt.s32.totalorder %s2920_s0, 3 }
   0xe   : > { %p629_p2 = pnand %p2522_p0, %p628_p1 }
  0x10   : > { %632 = sbr.rel (%p629_p2) target bundleno = 2618 (0xa3a), region = 96 }
  0x15   : > { %p720_p3 = scmp.lt.s32.totalorder %s3033_s30, 1  ;;  %s3641_s7 = sld [smem:[#allocation10_spill]] }
  0x16   : > { %s3642_s8 = sld [smem:[#allocation11_spill]]  ;;  %p2533_p4 = scmp.ne.s32.totalorder %s3033_s30, 0 }
  0x17   : > { %s3039_s20 = scalar_select %p720_p3, %s3033_s30, 1 }
  0x18   : > { %s3644_s27 = sld [smem:[#allocation6_spill]] (!%p2533_p4) }
  0x19   : > { %s2725_s25 = sshll.u32 %s3039_s20, 6  ;;  %s2525_s3 = sshll.u32 %s3039_s20, 1 }
  0x1a   : > { %s2726_s0 = sshll.u32 %s3039_s20, 5  ;;  %s748_s29 = scalar_lea.vmem %s3616_s12, %s3039_s20 }
  0x1b   : > { %s3054_s28 = scalar_lea.vmem %s3641_s7, %s2725_s25  ;;  %s3069_s23 = scalar_lea.vmem %s3613_s9, %s2726_s0 }
  0x1c   : > { %s3059_s1 = scalar_lea.vmem %s3642_s8, %s2525_s3  ;;  %s3087_s22 = scalar_lea.vmem %s3618_s14, %s2525_s3 }
  0x1d   : > { %3643 = sst [smem:[#allocation4_spill]] %s3059_s1  ;;  %s3082_s1 = scalar_lea.vmem %s3617_s13, %s2725_s25 }
  0x1e   : > { %s2728_s17 = sshll.u32 %s3039_s20, 7  ;;  %s765_s7 = scalar_lea.vmem %s3620_s16, %s3039_s20 }
  0x1f   : > { %s3093_s6 = scalar_lea.vmem %s3619_s15, %s2728_s17  ;;  %770 = sbr.rel (%p2533_p4) target bundleno = 461 (0x1cd), region = 100 }
  0x20   : > { %s3645_s17 = sld [smem:[#allocation5_spill]] (!%p2533_p4) }
  0x21   : > { %s3646_s18 = sld [smem:[#allocation7_spill]] (!%p2533_p4) }
  0x22   : > { %s3647_s26 = sld [smem:[#allocation8_spill]] (!%p2533_p4) }
  0x24   : > { %v2733_v0 = vld [vmem:[%s3644_s27 + $0x10] sm:$0xff]  ;;  %v2732_v1 = vld [vmem:[%s3644_s27 + $0x8] sm:$0xff]  ;;  %v2731_v3 = vld [vmem:[%s3644_s27] sm:$0xff]  ;;  %vm818_vm0 = vcmask 392192   ;;  %vm853_vm1 = vcmask 523264   ;;  %vm866_vm2 = vcmask 517120  }
  0x25   : > { %833 = vmatpush.bf16.msra.mxu0 %v2733_v0  ;;  %2770 = vmatpush.bf16.msra.mxu1 %v2733_v0  ;;  %v2922_v29 = vmov 64.0  }
  0x26   : > { %2771 = vmatpush.bf16.msra.mxu2 %v2733_v0  ;;  %v775_v2 = vld [vmem:[%s3645_s17 + $0x10] sm:$0x1]  ;;  %v2729_v5 = vld [vmem:[%s3645_s17] sm:$0xff]  ;;  %v2730_v6 = vld [vmem:[%s3645_s17 + $0x8] sm:$0xff]  ;;  %2797 = vrcp.f32 %v2922_v29 }
  0x27   : > { %v796_v4 = vunpack.c.l.b16 %v775_v2  ;;  %v782_v8 = vld [vmem:[%s3646_s18] sm:$0xff]  ;;  %v784_v9 = vld [vmem:[%s3646_s18 + $0x10] sm:$0xff]  ;;  %v783_v17 = vld [vmem:[%s3646_s18 + $0x8] sm:$0xff] }
  0x28   : > { %v786_v16 = vld [vmem:[%s3646_s18 + $0x20] sm:$0x3]  ;;  %v785_v18 = vld [vmem:[%s3646_s18 + $0x18] sm:$0xff] }
  0x29   : > { %834 = vmatpush.bf16.msra.mxu0 %v2732_v1  ;;  %2772 = vmatpush.bf16.msra.mxu1 %v2732_v1  ;;  %v799_v7 = vpack.c.b16 %v796_v4, %v796_v4 }
  0x2a   : > { %2773 = vmatpush.bf16.msra.mxu2 %v2732_v1 }
  0x2c   : > { %v2798_v30 = vpop.eup %2797 }
  0x2d   : > { %835 = vmatpush.bf16.msra.mxu0 %v2731_v3  ;;  %2774 = vmatpush.bf16.msra.mxu1 %v2731_v3  ;;  %v871_v31 = vmul.f32 64.0, %v2798_v30  ;;  %vm875_vm3 = vweird.f32 %v2798_v30 }
  0x2e   : > { %2775 = vmatpush.bf16.msra.mxu2 %v2731_v3 }
  0x2f   : > { %v872_v32 = vsub.f32 1.0, %v871_v31  ;;  %v2796_v31 = vld [vmem:[%s3608_s4] ss:$0 sm:$0xff] }
  0x30   : > { %2554 = vmatmul.msk.bf16.vlgmr.msra.gmra.mxu0 %vm818_vm0, %v2729_v5  ;;  %2555 = vmatmul.msk.bf16.vlgmr.msra.gmra.mxu1 %vm818_vm0, %v2730_v6 }
  0x31   : > { %2556 = vmatmul.msk.bf16.vlgmr.msra.gmra.mxu2 %vm818_vm0, %v799_v7  ;;  %v873_v33 = vmul.f32 %v2798_v30, %v872_v32 }
  0x33   : > { %v874_v34 = vadd.f32 %v2798_v30, %v873_v33 }
  0x35   : > { %v876_v35 = vsel %vm875_vm3, %v2798_v30, %v874_v34 }
  0xad   : > { %v837_v10 = vpop.f32.mrf.mxu0  ;;  %v842_v11 = vpop.f32.mrf.mxu1 }
  0xae   : > { %v838_v12 = vadd.f32 %v837_v10, %v782_v8  ;;  %v843_v13 = vadd.f32 %v842_v11, %v784_v9 }
  0xb0   : > { %v860_v14 = vsel %vm853_vm1, %v843_v13, 0.0  ;;  %v854_v15 = vsel %vm853_vm1, %v838_v12, 0.0 }
  0xb1   : > { %861 = vadd.xlane.f32.xlu1 %v860_v14  ;;  %855 = vadd.xlane.f32.xlu0 %v854_v15 }
  0xb4   : > { %v847_v19 = vpop.f32.mrf.mxu2 }
  0xb5   : > { %v848_v20 = vadd.f32 %v847_v19, %v786_v16  ;;  %v839_v21 = vpop.f32.mrf.mxu0  ;;  %v844_v22 = vpop.f32.mrf.mxu1 }
  0xb6   : > { %v840_v23 = vadd.f32 %v839_v21, %v783_v17  ;;  %v845_v24 = vadd.f32 %v844_v22, %v785_v18 }
  0xb7   : > { %v867_v25 = vsel %vm866_vm2, %v848_v20, 0.0 }
  0xb8   : > { %868 = vadd.xlane.f32.xlu2 %v867_v25  ;;  %v863_v26 = vsel %vm853_vm1, %v845_v24, 0.0  ;;  %v857_v27 = vsel %vm853_vm1, %v840_v23, 0.0 }
  0xb9   : > { %864 = vadd.xlane.f32.xlu1 %v863_v26  ;;  %858 = vadd.xlane.f32.xlu0 %v857_v27  ;;  %v2795_v26 = vld [vmem:[%s3647_s26] ss:$0 sm:$0xff] }
  0xbc   : > { %v849_v28 = vpop.f32.mrf.mxu2 }
 0x124   : > { %v862_v36 = vpop.xlane.xlu1 %861  ;;  %v856_v37 = vpop.xlane.xlu0 %855 }
 0x125   : > { %v879_v38 = vmul.f32 %v876_v35, %v862_v36  ;;  %v877_v39 = vmul.f32 %v876_v35, %v856_v37 }
 0x127   : > { %v3138_v40 = vsub.f32 %v843_v13, %v879_v38  ;;  %v3140_v41 = vsub.f32 %v838_v12, %v877_v39 }
 0x129   : > { %v889_v42 = vmul.f32 %v3138_v40, %v3138_v40  ;;  %v887_v43 = vmul.f32 %v3140_v41, %v3140_v41 }
 0x12b   : > { %v869_v44 = vpop.xlane.xlu2 %868  ;;  %v898_v45 = vsel %vm853_vm1, %v889_v42, 0.0  ;;  %v892_v46 = vsel %vm853_vm1, %v887_v43, 0.0 }
 0x12c   : > { %899 = vadd.xlane.f32.xlu1 %v898_v45  ;;  %v865_v47 = vpop.xlane.xlu1 %864  ;;  %893 = vadd.xlane.f32.xlu2 %v892_v46  ;;  %v859_v48 = vpop.xlane.xlu0 %858  ;;  %v881_v51 = vmul.f32 %v876_v35, %v869_v44 }
 0x12d   : > { %v880_v49 = vmul.f32 %v876_v35, %v865_v47  ;;  %v878_v50 = vmul.f32 %v876_v35, %v859_v48 }
 0x12e   : > { %v3156_v56 = vsub.f32 %v848_v20, %v881_v51 }
 0x12f   : > { %v3148_v52 = vsub.f32 %v845_v24, %v880_v49  ;;  %v3150_v53 = vsub.f32 %v840_v23, %v878_v50 }
 0x130   : > { %v891_v59 = vmul.f32 %v3156_v56, %v3156_v56 }
 0x131   : > { %v890_v54 = vmul.f32 %v3148_v52, %v3148_v52  ;;  %v888_v55 = vmul.f32 %v3150_v53, %v3150_v53 }
 0x132   : > { %v904_v60 = vsel %vm866_vm2, %v891_v59, 0.0 }
 0x133   : > { %v901_v57 = vsel %vm853_vm1, %v890_v54, 0.0  ;;  %v895_v58 = vsel %vm853_vm1, %v888_v55, 0.0 }
 0x134   : > { %902 = vadd.xlane.f32.xlu2 %v901_v57  ;;  %896 = vadd.xlane.f32.xlu0 %v895_v58 }
 0x13c   : > { %905 = vadd.xlane.f32.xlu0 %v904_v60 }
 0x19f   : > { %v900_v61 = vpop.xlane.xlu1 %899  ;;  %v894_v62 = vpop.xlane.xlu2 %893 }
 0x1a0   : > { %v909_v63 = vmul.f32 %v900_v61, %v876_v35  ;;  %v907_v0 = vmul.f32 %v894_v62, %v876_v35 }
 0x1a2   : > { %v914_v1 = vadd.f32 1e-05, %v909_v63  ;;  %v912_v2 = vadd.f32 1e-05, %v907_v0 }
 0x1a4   : > { %2799 = vrsqrt.f32 %v914_v1  ;;  %vm943_vm6 = vweird.f32 %v914_v1  ;;  %vm923_vm8 = vweird.f32 %v912_v2 }
 0x1a5   : > { %2801 = vrsqrt.f32 %v912_v2 }
 0x1a7   : > { %v903_v3 = vpop.xlane.xlu2 %902  ;;  %v897_v4 = vpop.xlane.xlu0 %896 }
 0x1a8   : > { %v910_v5 = vmul.f32 %v903_v3, %v876_v35  ;;  %v908_v6 = vmul.f32 %v897_v4, %v876_v35 }
 0x1aa   : > { %v2800_v7 = vpop.eup %2799  ;;  %v915_v8 = vadd.f32 1e-05, %v910_v5  ;;  %v913_v9 = vadd.f32 1e-05, %v908_v6 }
 0x1ab   : > { %v2802_v10 = vpop.eup %2801  ;;  %v938_v11 = vmul.f32 %v2800_v7, %v914_v1  ;;  %vm944_vm4 = vweird.f32 %v2800_v7 }
 0x1ac   : > { %v918_v12 = vmul.f32 %v2802_v10, %v912_v2  ;;  %2803 = vrsqrt.f32 %v915_v8  ;;  %vm924_vm5 = vweird.f32 %v2802_v10  ;;  %vm945_vm7 = vmor %vm943_vm6, %vm944_vm4  ;;  %vm953_vm12 = vweird.f32 %v915_v8 }
 0x1ad   : > { %v939_v13 = vmul.f32 %v2800_v7, %v938_v11  ;;  %2805 = vrsqrt.f32 %v913_v9  ;;  %vm925_vm9 = vmor %vm923_vm8, %vm924_vm5  ;;  %vm933_vm14 = vweird.f32 %v913_v9 }
 0x1ae   : > { %v919_v14 = vmul.f32 %v2802_v10, %v918_v12 }
 0x1af   : > { %v940_v15 = vmul.f32 0.5, %v939_v13  ;;  %v906_v16 = vpop.xlane.xlu0 %905 }
 0x1b0   : > { %v920_v17 = vmul.f32 0.5, %v919_v14  ;;  %v911_v18 = vmul.f32 %v906_v16, %v876_v35 }
 0x1b1   : > { %v941_v19 = vsub.f32 1.5, %v940_v15 }
 0x1b2   : > { %v2804_v20 = vpop.eup %2803  ;;  %v921_v21 = vsub.f32 1.5, %v920_v17  ;;  %v916_v22 = vadd.f32 1e-05, %v911_v18 }
 0x1b3   : > { %v2806_v23 = vpop.eup %2805  ;;  %v942_v24 = vmul.f32 %v2800_v7, %v941_v19  ;;  %v948_v25 = vmul.f32 %v2804_v20, %v915_v8  ;;  %vm954_vm10 = vweird.f32 %v2804_v20 }
 0x1b4   : > { %v922_v27 = vmul.f32 %v2802_v10, %v921_v21  ;;  %v928_v28 = vmul.f32 %v2806_v23, %v913_v9  ;;  %2807 = vrsqrt.f32 %v916_v22  ;;  %vm934_vm11 = vweird.f32 %v2806_v23  ;;  %vm955_vm13 = vmor %vm953_vm12, %vm954_vm10 }
 0x1b5   : > { %v946_v29 = vsel %vm945_vm7, %v2800_v7, %v942_v24  ;;  %v949_v30 = vmul.f32 %v2804_v20, %v948_v25  ;;  %vm935_vm15 = vmor %vm933_vm14, %vm934_vm11  ;;  %vm963_vm3 = vweird.f32 %v916_v22 }
 0x1b6   : > { %v969_v32 = vmul.f32 %v946_v29, %v3138_v40  ;;  %v926_v33 = vsel %vm925_vm9, %v2802_v10, %v922_v27  ;;  %v929_v34 = vmul.f32 %v2806_v23, %v928_v28 }
 0x1b7   : > { %v967_v35 = vmul.f32 %v926_v33, %v3140_v41  ;;  %v950_v36 = vmul.f32 0.5, %v949_v30 }
 0x1b8   : > { %v977_v37 = vmul.f32 %v2795_v26, %v969_v32  ;;  %v930_v38 = vmul.f32 0.5, %v929_v34 }
 0x1b9   : > { %v975_v39 = vmul.f32 %v2795_v26, %v967_v35  ;;  %v951_v42 = vsub.f32 1.5, %v950_v36 }
 0x1ba   : > { %v2808_v43 = vpop.eup %2807  ;;  %v985_v44 = vadd.f32 %v2796_v31, %v977_v37  ;;  %v931_v45 = vsub.f32 1.5, %v930_v38 }
 0x1bb   : > { %v983_v46 = vadd.f32 %v2796_v31, %v975_v39  ;;  %v952_v47 = vmul.f32 %v2804_v20, %v951_v42  ;;  %v958_v48 = vmul.f32 %v2808_v43, %v916_v22  ;;  %vm964_vm0 = vweird.f32 %v2808_v43 }
 0x1bc   : > { %990 = vst.msk [vmem:[#allocation2 + $0x10] sm:$0xff] %vm853_vm1, %v985_v44  ;;  %v932_v40 = vmul.f32 %v2806_v23, %v931_v45  ;;  %vm965_vm4 = vmor %vm963_vm3, %vm964_vm0 }
 0x1bd   : > { %988 = vst.msk [vmem:[#allocation2] sm:$0xff] %vm853_vm1, %v983_v46  ;;  %v956_v41 = vsel %vm955_vm13, %v2804_v20, %v952_v47  ;;  %v959_v49 = vmul.f32 %v2808_v43, %v958_v48 }
 0x1be   : > { %v970_v50 = vmul.f32 %v956_v41, %v3148_v52  ;;  %v936_v51 = vsel %vm935_vm15, %v2806_v23, %v932_v40 }
 0x1bf   : > { %v968_v54 = vmul.f32 %v936_v51, %v3150_v53  ;;  %v960_v55 = vmul.f32 0.5, %v959_v49 }
 0x1c0   : > { %v978_v57 = vmul.f32 %v2795_v26, %v970_v50 }
 0x1c1   : > { %v976_v58 = vmul.f32 %v2795_v26, %v968_v54  ;;  %v961_v59 = vsub.f32 1.5, %v960_v55 }
 0x1c2   : > { %v986_v60 = vadd.f32 %v2796_v31, %v978_v57 }
 0x1c3   : > { %v984_v61 = vadd.f32 %v2796_v31, %v976_v58  ;;  %v962_v62 = vmul.f32 %v2808_v43, %v961_v59 }
 0x1c4   : > { %991 = vst.msk [vmem:[#allocation2 + $0x18] sm:$0xff] %vm853_vm1, %v986_v60 }
 0x1c5   : > { %989 = vst.msk [vmem:[#allocation2 + $0x8] sm:$0xff] %vm853_vm1, %v984_v61  ;;  %v966_v63 = vsel %vm965_vm4, %v2808_v43, %v962_v62 }
 0x1c6   : > { %v971_v52 = vmul.f32 %v966_v63, %v3156_v56 }
 0x1c8   : > { %v979_v0 = vmul.f32 %v2795_v26, %v971_v52 }
 0x1ca   : > { %v987_v1 = vadd.f32 %v2796_v31, %v979_v0 }
 0x1cc   : > { %992 = vst.msk [vmem:[#allocation2 + $0x20] sm:$0x3] %vm866_vm2, %v987_v1 }
 0x1cd PF: > { %v1217_v53 = vld [vmem:[#allocation2 + $0x10] sm:$0xff]  ;;  %vm1284_vm5 = vcmask 523264   ;;  %v1215_v2 = vld [vmem:[#allocation2] sm:$0xff]  ;;  %vm1297_vm6 = vcmask 517120   ;;  %v1218_v56 = vld [vmem:[#allocation2 + $0x18] sm:$0xff]  ;;  %v2923_v10 = vmov 64.0   ;;  %s3648_s8 = scalar_lea.vmem %s3609_s5, %s3039_s20 }
 0x1ce   : > { %v1291_v3 = vsel %vm1284_vm5, %v1217_v53, 0.0  ;;  %v1285_v4 = vsel %vm1284_vm5, %v1215_v2, 0.0  ;;  %v1216_v7 = vld [vmem:[#allocation2 + $0x8] sm:$0xff]  ;;  %v1294_v8 = vsel %vm1284_vm5, %v1218_v56, 0.0  ;;  %2815 = vrcp.f32 %v2923_v10  ;;  %v2583_v44 = vld [vmem:[%s3054_s28 + $0x30] sm:$0xf] }
 0x1cf   : > { %1292 = vadd.xlane.f32.xlu1 %v1291_v3  ;;  %1286 = vadd.xlane.f32.xlu0 %v1285_v4  ;;  %v1288_v9 = vsel %vm1284_vm5, %v1216_v7, 0.0  ;;  %v2741_v45 = vld [vmem:[%s3054_s28 + $0x34] sm:$0xf0]  ;;  %v2740_v46 = vld [vmem:[%s3054_s28 + $0x34] sm:$0xf]  ;;  %s3649_s21 = sld [smem:[#allocation9_spill]] }
 0x1d0   : > { %v2584_v47 = vor.u32 %v2741_v45, %v2583_v44  ;;  %v2585_v48 = vld [vmem:[%s3054_s28 + $0x38] sm:$0xf0]  ;;  %v2575_v41 = vld [vmem:[%s3054_s28 + $0x20] sm:$0xf]  ;;  %v2739_v49 = vld [vmem:[%s3054_s28 + $0x24] sm:$0xf0] }
 0x1d1   : > { %v2588_v40 = vor.u32 %v2740_v46, %v2585_v48  ;;  %v2738_v50 = vld [vmem:[%s3054_s28 + $0x24] sm:$0xf]  ;;  %v2576_v51 = vor.u32 %v2739_v49, %v2575_v41  ;;  %v2577_v54 = vld [vmem:[%s3054_s28 + $0x28] sm:$0xf0]  ;;  %v2567_v57 = vld [vmem:[%s3054_s28 + $0x10] sm:$0xf] }
 0x1d2   : > { %1480 = vmatpush.bf16.msra.mxu0 %v2584_v47  ;;  %v2580_v55 = vor.u32 %v2738_v50, %v2577_v54  ;;  %v2737_v58 = vld [vmem:[%s3054_s28 + $0x14] sm:$0xf0]  ;;  %v2736_v59 = vld [vmem:[%s3054_s28 + $0x14] sm:$0xf]  ;;  %v2569_v61 = vld [vmem:[%s3054_s28 + $0x18] sm:$0xf0] }
 0x1d3   : > { %v1219_v5 = vld [vmem:[#allocation2 + $0x20] sm:$0x3]  ;;  %1503 = vmatpush.bf16.msra.mxu1 %v2588_v40  ;;  %v2568_v60 = vor.u32 %v2737_v58, %v2567_v57  ;;  %v2572_v63 = vor.u32 %v2736_v59, %v2569_v61  ;;  %s3651_s26 = sld [smem:[#allocation4_spill]]  ;;  %s2924_s0 = smov 64  }
 0x1d4   : > { %v1298_v6 = vsel %vm1297_vm6, %v1219_v5, 0.0  ;;  %v2816_v11 = vpop.eup %2815  ;;  %v2559_v1 = vld [vmem:[%s3054_s28] sm:$0xf]  ;;  %p2722_p5 = scmp.ne.s32.totalorder %s3033_s30, 1 }
 0x1d5   : > { %1299 = vadd.xlane.f32.xlu2 %v1298_v6  ;;  %v1302_v12 = vmul.f32 64.0, %v2816_v11  ;;  %vm1306_vm1 = vweird.f32 %v2816_v11  ;;  %v2809_v45 = vld [vmem:[%s3648_s8] ss:$0 sm:$0xff]  ;;  %s3650_s19 = scalar_lea.vmem %s3649_s21, %s3039_s20  ;;  %s3655_s8 = scalar_lea.vmem %s3615_s11, %s3039_s20 }
 0x1d6   : > { %1481 = vmatpush.bf16.msra.mxu0 %v2576_v51  ;;  %s3658_s2 = sld [smem:[#allocation14_spill]] (!%p2722_p5) }
 0x1d7   : > { %1295 = vadd.xlane.f32.xlu1 %v1294_v8  ;;  %1289 = vadd.xlane.f32.xlu0 %v1288_v9  ;;  %v1303_v13 = vsub.f32 1.0, %v1302_v12 }
 0x1d8   : > { %1504 = vmatpush.bf16.msra.mxu1 %v2580_v55 }
 0x1d9   : > { %v1304_v14 = vmul.f32 %v2816_v11, %v1303_v13 }
 0x1da   : > { %1482 = vmatpush.bf16.msra.mxu0 %v2568_v60 }
 0x1db   : > { %v1305_v15 = vadd.f32 %v2816_v11, %v1304_v14 }
 0x1dc   : > { %1505 = vmatpush.bf16.msra.mxu1 %v2572_v63 }
 0x1dd   : > { %v3184_v16 = vsel %vm1306_vm1, %v2816_v11, %v1305_v15 }
 0x242   : > { %v1293_v17 = vpop.xlane.xlu1 %1292  ;;  %v1287_v18 = vpop.xlane.xlu0 %1286 }
 0x243   : > { %v1310_v19 = vmul.f32 %v3184_v16, %v1293_v17  ;;  %v1308_v20 = vmul.f32 %v3184_v16, %v1287_v18 }
 0x245   : > { %v3188_v21 = vsub.f32 %v1217_v53, %v1310_v19  ;;  %v3190_v22 = vsub.f32 %v1215_v2, %v1308_v20  ;;  %v2735_v53 = vld [vmem:[%s3054_s28 + $0x4] sm:$0xf0]  ;;  %v2734_v2 = vld [vmem:[%s3054_s28 + $0x4] sm:$0xf] }
 0x246   : > { %v2560_v4 = vor.u32 %v2735_v53, %v2559_v1 }
 0x247   : > { %v1320_v23 = vmul.f32 %v3188_v21, %v3188_v21  ;;  %v1318_v24 = vmul.f32 %v3190_v22, %v3190_v22 }
 0x248   : > { %v1300_v25 = vpop.xlane.xlu2 %1299  ;;  %1483 = vmatpush.bf16.msra.mxu0 %v2560_v4 }
 0x249   : > { %v1329_v26 = vsel %vm1284_vm5, %v1320_v23, 0.0  ;;  %v1323_v27 = vsel %vm1284_vm5, %v1318_v24, 0.0  ;;  %v1312_v32 = vmul.f32 %v3184_v16, %v1300_v25 }
 0x24a   : > { %1330 = vadd.xlane.f32.xlu1 %v1329_v26  ;;  %v1296_v28 = vpop.xlane.xlu1 %1295  ;;  %1324 = vadd.xlane.f32.xlu2 %v1323_v27  ;;  %v1290_v29 = vpop.xlane.xlu0 %1289 }
 0x24b   : > { %v1311_v30 = vmul.f32 %v3184_v16, %v1296_v28  ;;  %v1309_v31 = vmul.f32 %v3184_v16, %v1290_v29  ;;  %v3205_v35 = vsub.f32 %v1219_v5, %v1312_v32  ;;  %v2561_v5 = vld [vmem:[%s3054_s28 + $0x8] sm:$0xf0] }
 0x24d   : > { %v3201_v33 = vsub.f32 %v1218_v56, %v1311_v30  ;;  %v3203_v34 = vsub.f32 %v1216_v7, %v1309_v31  ;;  %v1322_v42 = vmul.f32 %v3205_v35, %v3205_v35  ;;  %v2564_v56 = vor.u32 %v2734_v2, %v2561_v5 }
 0x24f   : > { %v1321_v36 = vmul.f32 %v3201_v33, %v3201_v33  ;;  %v1319_v37 = vmul.f32 %v3203_v34, %v3203_v34  ;;  %v1335_v43 = vsel %vm1297_vm6, %v1322_v42, 0.0  ;;  %1506 = vmatpush.bf16.msra.mxu1 %v2564_v56 }
 0x251   : > { %v1332_v38 = vsel %vm1284_vm5, %v1321_v36, 0.0  ;;  %v1326_v39 = vsel %vm1284_vm5, %v1319_v37, 0.0 }
 0x252   : > { %1333 = vadd.xlane.f32.xlu2 %v1332_v38  ;;  %1327 = vadd.xlane.f32.xlu0 %v1326_v39 }
 0x25a   : > { %1336 = vadd.xlane.f32.xlu0 %v1335_v43 }
 0x2bd   : > { %v1325_v62 = vpop.xlane.xlu2 %1324  ;;  %v1331_v52 = vpop.xlane.xlu1 %1330 }
 0x2be   : > { %v1338_v0 = vmul.f32 %v1325_v62, %v3184_v16  ;;  %v1340_v6 = vmul.f32 %v1331_v52, %v3184_v16 }
 0x2c0   : > { %v1343_v3 = vadd.f32 1e-05, %v1338_v0  ;;  %v1345_v7 = vadd.f32 1e-05, %v1340_v6 }
 0x2c2   : > { %2817 = vrsqrt.f32 %v1343_v3  ;;  %vm1354_vm7 = vweird.f32 %v1343_v3  ;;  %vm1374_vm14 = vweird.f32 %v1345_v7 }
 0x2c3   : > { %2819 = vrsqrt.f32 %v1345_v7 }
 0x2c5   : > { %v1334_v8 = vpop.xlane.xlu2 %1333  ;;  %v1328_v9 = vpop.xlane.xlu0 %1327 }
 0x2c6   : > { %v1341_v10 = vmul.f32 %v1334_v8, %v3184_v16  ;;  %v1339_v11 = vmul.f32 %v1328_v9, %v3184_v16 }
 0x2c8   : > { %v1346_v12 = vadd.f32 1e-05, %v1341_v10  ;;  %v1344_v13 = vadd.f32 1e-05, %v1339_v11  ;;  %v2818_v14 = vpop.eup %2817  ;;  %v1230_v10 = vld [vmem:[%s3651_s26] sm:$0x3] }
 0x2c9   : > { %v1349_v15 = vmul.f32 %v2818_v14, %v1343_v3  ;;  %v2820_v20 = vpop.eup %2819  ;;  %vm1355_vm2 = vweird.f32 %v2818_v14 }
 0x2ca   : > { %2821 = vrsqrt.f32 %v1346_v12  ;;  %v1369_v28 = vmul.f32 %v2820_v20, %v1345_v7  ;;  %vm1356_vm8 = vmor %vm1354_vm7, %vm1355_vm2  ;;  %vm1364_vm10 = vweird.f32 %v1344_v13  ;;  %vm1384_vm12 = vweird.f32 %v1346_v12 }
 0x2cb   : > { %2823 = vrsqrt.f32 %v1344_v13  ;;  %v1350_v17 = vmul.f32 %v2818_v14, %v1349_v15  ;;  %vm1375_vm15 = vweird.f32 %v2820_v20  ;;  %vm1691_vm7 = vcmask 1040384  }
 0x2cc   : > { %v1370_v37 = vmul.f32 %v2820_v20, %v1369_v28  ;;  %vm1376_vm3 = vmor %vm1374_vm14, %vm1375_vm15 }
 0x2cd   : > { %v1337_v18 = vpop.xlane.xlu0 %1336  ;;  %v1351_v19 = vmul.f32 0.5, %v1350_v17 }
 0x2ce   : > { %v1342_v23 = vmul.f32 %v1337_v18, %v3184_v16  ;;  %v1371_v46 = vmul.f32 0.5, %v1370_v37 }
 0x2cf   : > { %v1352_v25 = vsub.f32 1.5, %v1351_v19 }
 0x2d0   : > { %v2822_v24 = vpop.eup %2821  ;;  %v1347_v31 = vadd.f32 1e-05, %v1342_v23  ;;  %v1372_v51 = vsub.f32 1.5, %v1371_v46 }
 0x2d1   : > { %v2824_v26 = vpop.eup %2823  ;;  %v1379_v27 = vmul.f32 %v2822_v24, %v1346_v12  ;;  %v1353_v29 = vmul.f32 %v2818_v14, %v1352_v25  ;;  %vm1385_vm13 = vweird.f32 %v2822_v24 }
 0x2d2   : > { %v1359_v30 = vmul.f32 %v2824_v26, %v1344_v13  ;;  %2825 = vrsqrt.f32 %v1347_v31  ;;  %vm1365_vm9 = vweird.f32 %v2824_v26  ;;  %vm1386_vm0 = vmor %vm1384_vm12, %vm1385_vm13  ;;  %v1373_v60 = vmul.f32 %v2820_v20, %v1372_v51 }
 0x2d3   : > { %v1380_v32 = vmul.f32 %v2822_v24, %v1379_v27  ;;  %v1357_v38 = vsel %vm1356_vm8, %v2818_v14, %v1353_v29  ;;  %vm1366_vm11 = vmor %vm1364_vm10, %vm1365_vm9  ;;  %vm1394_vm4 = vweird.f32 %v1347_v31  ;;  %v1423_v13 = vperm.slane %v1230_v10, 0 }
 0x2d4   : > { %v1360_v36 = vmul.f32 %v2824_v26, %v1359_v30  ;;  %v1398_v44 = vmul.f32 %v1357_v38, %v3190_v22  ;;  %v2810_v22 = vld [vmem:[%s3650_s19] ss:$0 sm:$0xff]  ;;  %v1377_v63 = vsel %vm1376_vm3, %v2820_v20, %v1373_v60  ;;  %v1424_v38 = vperm.slane %v1230_v10, 1  ;;  %s3657_s19 = sld [smem:[#allocation13_spill]] (!%p2722_p5) }
 0x2d5   : > { %v1381_v42 = vmul.f32 0.5, %v1380_v32  ;;  %v1400_v1 = vmul.f32 %v1377_v63, %v3188_v21 }
 0x2d6   : > { %v1361_v39 = vmul.f32 0.5, %v1360_v36  ;;  %v1406_v50 = vmul.f32 %v2809_v45, %v1398_v44 }
 0x2d7   : > { %v1382_v48 = vsub.f32 1.5, %v1381_v42  ;;  %v1408_v3 = vmul.f32 %v2809_v45, %v1400_v1 }
 0x2d8   : > { %v1362_v43 = vsub.f32 1.5, %v1361_v39  ;;  %v2826_v41 = vpop.eup %2825  ;;  %v1414_v58 = vadd.f32 %v2810_v22, %v1406_v50 }
 0x2d9   : > { %v1383_v55 = vmul.f32 %v2822_v24, %v1382_v48  ;;  %v1389_v57 = vmul.f32 %v2826_v41, %v1347_v31  ;;  %vm1395_vm1 = vweird.f32 %v2826_v41  ;;  %v1416_v6 = vadd.f32 %v2810_v22, %v1408_v3 }
 0x2da   : > { %v1363_v47 = vmul.f32 %v2824_v26, %v1362_v43  ;;  %vm1396_vm2 = vmor %vm1394_vm4, %vm1395_vm1 }
 0x2db   : > { %v1387_v61 = vsel %vm1386_vm0, %v2822_v24, %v1383_v55  ;;  %v1390_v62 = vmul.f32 %v2826_v41, %v1389_v57 }
 0x2dc   : > { %v1367_v40 = vsel %vm1366_vm11, %v2824_v26, %v1363_v47  ;;  %v1401_v52 = vmul.f32 %v1387_v61, %v3201_v33 }
 0x2dd   : > { %v1399_v49 = vmul.f32 %v1367_v40, %v3203_v34  ;;  %v1391_v0 = vmul.f32 0.5, %v1390_v62 }
 0x2de   : > { %v1409_v53 = vmul.f32 %v2809_v45, %v1401_v52 }
 0x2df   : > { %v1407_v54 = vmul.f32 %v2809_v45, %v1399_v49  ;;  %v1392_v2 = vsub.f32 1.5, %v1391_v0 }
 0x2e0   : > { %v1417_v4 = vadd.f32 %v2810_v22, %v1409_v53 }
 0x2e1   : > { %v1415_v59 = vadd.f32 %v2810_v22, %v1407_v54  ;;  %v1393_v5 = vmul.f32 %v2826_v41, %v1392_v2 }
 0x2e2   : > { %v1420_v56 = vpack.c.bf16 %v1417_v4, %v1416_v6 }
 0x2e3   : > { %v1419_v34 = vpack.c.bf16 %v1415_v59, %v1414_v58  ;;  %v1397_v7 = vsel %vm1396_vm2, %v2826_v41, %v1393_v5 }
 0x2e4   : > { %v1402_v33 = vmul.f32 %v1397_v7, %v3205_v35  ;;  %v993_v7 = vlaneseq }
 0x2e5   : > { %2589 = vmatmul.msk.bf16.vlgmr.msra.gmra.mxu0 %vm1284_vm5, %v1419_v34  ;;  %2592 = vmatmul.msk.bf16.vlgmr.msra.gmra.mxu1 %vm1284_vm5, %v1419_v34 }
 0x2e6   : > { %v1410_v8 = vmul.f32 %v2809_v45, %v1402_v33  ;;  %v3272_v33 = vshrl.u32 %v993_v7, 7 }
 0x2e8   : > { %v1418_v21 = vadd.f32 %v2810_v22, %v1410_v8  ;;  %v3274_v8 = vand.u32 127, %v993_v7  ;;  %v1005_v10 = vshrl.u32 %v3272_v33, 16 }
 0x2ea   : > { %v1421_v9 = vpack.c.bf16 %v1418_v21, %v1418_v21  ;;  %v1004_v21 = vand.u32 65535, %v3272_v33 }
 0x2f5   : > { %2590 = vmatmul.msk.bf16.gmra.mxu0 %vm1284_vm5, %v1420_v56  ;;  %2593 = vmatmul.msk.bf16.gmra.mxu1 %vm1284_vm5, %v1420_v56 }
 0x305   : > { %2591 = vmatmul.msk.bf16.gmra.mxu0 %vm1284_vm5, %v1421_v9  ;;  %2594 = vmatmul.msk.bf16.gmra.mxu1 %vm1284_vm5, %v1421_v9  ;;  %v1174_v9 = vand.u32 65535, %v3274_v8 }
 0x362   : > { %v1485_v11 = vpop.f32.mrf.mxu0  ;;  %v1508_v12 = vpop.f32.mrf.mxu1 }
 0x363   : > { %v1486_v14 = vadd.f32 %v1485_v11, %v1423_v13  ;;  %v1509_v51 = vadd.f32 %v1508_v12, %v1424_v38  ;;  %v1008_v11 = vmul.u32 61680, %v1004_v21  ;;  %v1175_v12 = vshrl.u32 %v3274_v8, 16 }
 0x365   : > { %v1522_v18 = vpack.c.bf16 %v1486_v14, %v1486_v14  ;;  %v1527_v62 = vpack.c.bf16 %v1509_v51, %v1509_v51  ;;  %v1007_v14 = vmul.u32 61681, %v1004_v21 }
 0x367   : > { %v1537_v23 = vunpack.c.l.b16 %v1522_v18  ;;  %v1672_v1 = vunpack.c.l.b16 %v1527_v62  ;;  %v1177_v18 = vmul.u32 61681, %v1174_v9 }
 0x36a   : > { %v1487_v15 = vpop.f32.mrf.mxu0  ;;  %v1510_v17 = vpop.f32.mrf.mxu1 }
 0x36b   : > { %v1488_v19 = vadd.f32 %v1487_v15, %v1423_v13  ;;  %v1511_v41 = vadd.f32 %v1510_v17, %v1424_v38  ;;  %v1009_v15 = vmul.u32 61681, %v1005_v10  ;;  %v1011_v17 = vshll.u32 %v1008_v11, 16 }
 0x36d   : > { %v1523_v20 = vpack.c.bf16 %v1488_v19, %v1488_v19  ;;  %v1528_v58 = vpack.c.bf16 %v1511_v41, %v1511_v41  ;;  %v1179_v19 = vmul.u32 61681, %v1175_v12  ;;  %vm1015_vm8 = vc.u32 %v1007_v14, %v1011_v17 }
 0x36e   : > { %v3290_v41 = vadd.s32 16, %v3272_v33 }
 0x36f   : > { %v1538_v24 = vunpack.c.l.b16 %v1523_v20  ;;  %v1673_v52 = vunpack.c.l.b16 %v1528_v58 }
 0x370   : > { %v1062_v51 = vand.u32 65535, %v3290_v41  ;;  %v1063_v58 = vshrl.u32 %v3290_v41, 16 }
 0x371   : > { %v3259_v35 = vpack.c.b16 %v1538_v24, %v1537_v23  ;;  %v1677_v53 = vpack.c.b16 %v1673_v52, %v1672_v1  ;;  %v1013_v23 = vshll.u32 %v1009_v15, 16  ;;  %v1017_v24 = vadd.s32 %v1011_v17, %v1007_v14 }
 0x372   : > { %v1490_v25 = vpop.f32.mrf.mxu0  ;;  %v1513_v26 = vpop.f32.mrf.mxu1  ;;  %v1065_v62 = vmul.u32 61681, %v1062_v51 }
 0x373   : > { %1545 = vrot.lane.b32.xlu0 %v3259_v35, %s2924_s0  ;;  %v1491_v27 = vadd.f32 %v1490_v25, %v1423_v13  ;;  %v1514_v47 = vadd.f32 %v1513_v26, %v1424_v38  ;;  %v1183_v25 = vshll.u32 %v1179_v19, 16  ;;  %vm1019_vm10 = vc.u32 %v1017_v24, %v1013_v23 }
 0x375   : > { %v1524_v30 = vpack.c.bf16 %v1491_v27, %v1491_v27  ;;  %v1529_v54 = vpack.c.bf16 %v1514_v47, %v1514_v47  ;;  %v3281_v27 = vadd.s32 8, %v3272_v33  ;;  %v1012_v47 = vshrl.u32 %v1008_v11, 16 }
 0x377   : > { %v1539_v36 = vunpack.c.l.b16 %v1524_v30  ;;  %v1674_v63 = vunpack.c.l.b16 %v1529_v54  ;;  %v1180_v30 = vmul.u32 61680, %v1175_v12  ;;  %v1014_v54 = vshrl.u32 %v1009_v15, 16 }
 0x37a   : > { %v1492_v28 = vpop.f32.mrf.mxu0  ;;  %v1515_v29 = vpop.f32.mrf.mxu1 }
 0x37b   : > { %v1493_v31 = vadd.f32 %v1492_v28, %v1423_v13  ;;  %v1516_v42 = vadd.f32 %v1515_v29, %v1424_v38  ;;  %v2925_v28 = vmov 0  }
 0x37c   : > { %v1016_v29 = vsel %vm1015_vm8, 1, %v2925_v28 }
 0x37d   : > { %v1525_v32 = vpack.c.bf16 %v1493_v31, %v1493_v31  ;;  %v1530_v49 = vpack.c.bf16 %v1516_v42, %v1516_v42  ;;  %v1033_v31 = vand.u32 65535, %v3281_v27 }
 0x37f   : > { %v1540_v37 = vunpack.c.l.b16 %v1525_v32  ;;  %v1675_v59 = vunpack.c.l.b16 %v1530_v49 }
 0x381   : > { %v1543_v39 = vpack.c.b16 %v1540_v37, %v1539_v36  ;;  %v1678_v0 = vpack.c.b16 %v1675_v59, %v1674_v63  ;;  %v1034_v37 = vshrl.u32 %v3281_v27, 16  ;;  %v3295_v63 = vmul.u32 61681, %v1063_v58 }
 0x382   : > { %v1495_v43 = vpop.f32.mrf.mxu0  ;;  %v1518_v44 = vpop.f32.mrf.mxu1 }
 0x383   : > { %v1496_v45 = vadd.f32 %v1495_v43, %v1423_v13  ;;  %v1519_v46 = vadd.f32 %v1518_v44, %v1424_v38  ;;  %1547 = vrot.lane.b32.xlu2 %v1543_v39, %s2924_s0  ;;  %v1178_v13 = vmul.u32 61680, %v1174_v9  ;;  %v1037_v38 = vmul.u32 61680, %v1033_v31 }
 0x384   : > { %v1036_v43 = vmul.u32 61681, %v1033_v31  ;;  %v1038_v44 = vmul.u32 61681, %v1034_v37  ;;  %v1068_v9 = vmul.u32 61680, %v1063_v58 }
 0x385   : > { %v1526_v48 = vpack.c.bf16 %v1496_v45, %v1496_v45  ;;  %v1531_v40 = vpack.c.bf16 %v1519_v46, %v1519_v46  ;;  %v1181_v20 = vshll.u32 %v1178_v13, 16  ;;  %v1040_v45 = vshll.u32 %v1037_v38, 16 }
 0x386   : > { %v1041_v7 = vshrl.u32 %v1037_v38, 16 }
 0x387   : > { %v1541_v50 = vunpack.c.l.b16 %v1526_v48  ;;  %v1676_v22 = vunpack.c.l.b16 %v1531_v40  ;;  %vm1185_vm9 = vc.u32 %v1177_v18, %v1181_v20  ;;  %v1187_v26 = vadd.s32 %v1181_v20, %v1177_v18 }
 0x388   : > { %v1186_v32 = vsel %vm1185_vm9, 1, %v2925_v28  ;;  %v1182_v40 = vshrl.u32 %v1178_v13, 16  ;;  %vm1044_vm12 = vc.u32 %v1036_v43, %v1040_v45 }
 0x389   : > { %v1544_v55 = vpack.c.b16 %v1541_v50, %v1541_v50  ;;  %v1679_v57 = vpack.c.b16 %v1676_v22, %v1676_v22  ;;  %vm1189_vm11 = vc.u32 %v1187_v26, %v1183_v25  ;;  %v1188_v42 = vadd.s32 %v1186_v32, %v1180_v30 }
 0x38a   : > { %v1497_v60 = vpop.f32.mrf.mxu0  ;;  %v1520_v34 = vpop.f32.mrf.mxu1  ;;  %v1190_v46 = vsel %vm1189_vm11, 1, %v2925_v28  ;;  %v1042_v50 = vshll.u32 %v1038_v44, 16  ;;  %v1046_v22 = vadd.s32 %v1040_v45, %v1036_v43  ;;  %v1045_v59 = vsel %vm1044_vm12, 1, %v2925_v28 }
 0x38b   : > { %1549 = vrot.lane.b32.xlu1 %v1544_v55, %s2924_s0  ;;  %v1693_v61 = vsel %vm1691_vm7, %v1679_v57, 0  ;;  %v1192_v49 = vadd.s32 %v1190_v46, %v1188_v42  ;;  %v1039_v57 = vmul.u32 61680, %v1034_v37  ;;  %v1066_v60 = vmul.u32 61680, %v1062_v51 }
 0x38c   : > { %1700 = vmatpush.bf16.msrb.mxu0 %v1693_v61  ;;  %2776 = vmatpush.bf16.msrb.mxu1 %v1693_v61  ;;  %v1184_v34 = vshrl.u32 %v1179_v19, 16  ;;  %vm1048_vm13 = vc.u32 %v1046_v22, %v1042_v50  ;;  %v1043_v19 = vshrl.u32 %v1038_v44, 16  ;;  %v3307_v25 = vadd.s32 32, %v3272_v33 }
 0x38d   : > { %2777 = vmatpush.bf16.msra.mxu3 %v1693_v61  ;;  %v1193_v61 = vadd.s32 %v1192_v49, %v1182_v40  ;;  %v1069_v52 = vshll.u32 %v1066_v60, 16  ;;  %v1047_v1 = vadd.s32 %v1045_v59, %v1039_v57 }
 0x38e   : > { %v1120_v32 = vand.u32 65535, %v3307_v25 }
 0x38f   : > { %vm1073_vm14 = vc.u32 %v1065_v62, %v1069_v52 }
 0x390   : > { %1701 = vmatpush.bf16.msrb.mxu0 %v1678_v0  ;;  %2778 = vmatpush.bf16.msrb.mxu1 %v1678_v0  ;;  %v1074_v13 = vsel %vm1073_vm14, 1, %v2925_v28  ;;  %v1124_v44 = vmul.u32 61680, %v1120_v32  ;;  %v1123_v45 = vmul.u32 61681, %v1120_v32 }
 0x391   : > { %2779 = vmatpush.bf16.msra.mxu3 %v1678_v0  ;;  %v1076_v23 = vadd.s32 %v1074_v13, %v1068_v9  ;;  %v2926_v9 = vmov -1e+30  }
 0x394   : > { %1702 = vmatpush.bf16.msrb.mxu0 %v1677_v53  ;;  %2780 = vmatpush.bf16.msrb.mxu1 %v1677_v53 }
 0x395   : > { %2781 = vmatpush.bf16.msra.mxu3 %v1677_v53  ;;  %v3298_v53 = vadd.s32 24, %v3272_v33 }
 0x3dd   : > { %v1548_v4 = vpop.permute.xlu2 %1547 }
 0x3de   : > { %v1564_v5 = vsel %vm1284_vm5, %v1548_v4, 0  ;;  %v1091_v4 = vand.u32 65535, %v3298_v53 }
 0x3e0   : > { %v1095_v11 = vmul.u32 61680, %v1091_v4  ;;  %v1094_v14 = vmul.u32 61681, %v1091_v4 }
 0x3e2   : > { %v1098_v17 = vshll.u32 %v1095_v11, 16  ;;  %v1099_v59 = vshrl.u32 %v1095_v11, 16 }
 0x3e4   : > { %vm1102_vm0 = vc.u32 %v1094_v14, %v1098_v17 }
 0x3e5   : > { %v1546_v6 = vpop.permute.xlu0 %1545  ;;  %v1103_v43 = vsel %vm1102_vm0, 1, %v2925_v28  ;;  %vm1592_vm0 = vcmask 277504  }
 0x3e6   : > { %v1561_v56 = vsel %vm1284_vm5, %v1546_v6, 0  ;;  %v1075_v6 = vadd.s32 %v1069_v52, %v1065_v62 }
 0x3fd   : > { %v1550_v2 = vpop.permute.xlu1 %1549 }
 0x3fe   : > { %v1567_v3 = vsel %vm1284_vm5, %v1550_v2, 0  ;;  %v1049_v2 = vsel %vm1048_vm13, 1, %v2925_v28 }
 0x3ff   : > { %1574 = vmatpush.bf16.xpose.msra.mxu2 %v1567_v3  ;;  %v1194_v3 = vadd.s32 %v1193_v61, %v1184_v34  ;;  %v1051_v21 = vadd.s32 %v1049_v2, %v1047_v1 }
 0x401   : > { %v1195_v12 = vshrl.u32 %v1194_v3, 4  ;;  %v1052_v20 = vadd.s32 %v1051_v21, %v1041_v7 }
 0x403   : > { %v1196_v24 = vmul.u32 17, %v1195_v12  ;;  %v1053_v31 = vadd.s32 %v1052_v20, %v1043_v19 }
 0x405   : > { %v1197_v42 = vsub.s32 %v3274_v8, %v1196_v24 }
 0x407   : > { %1575 = vmatpush.bf16.xpose.msra.mxu2 %v1564_v5  ;;  %v1071_v5 = vshll.u32 %v3295_v63, 16  ;;  %vm1200_vm2 = vcmp.ne.s32.totalorder %v1197_v42, 0  ;;  %vm1201_vm7 = vcmp.lt.s32.totalorder %v1197_v42, 0 }
 0x409   : > { %vm1077_vm15 = vc.u32 %v1075_v6, %v1071_v5 }
 0x40f   : > { %1576 = vmatpush.bf16.xpose.msra.mxu2 %v1561_v56 }
 0x416   : > { %2595 = vmatmul.msk.bf16.vlgmr.msra.gmra.mxu2 %vm1284_vm5, %v3259_v35  ;;  %v1010_v35 = vmul.u32 61680, %v1005_v10  ;;  %v1092_v10 = vshrl.u32 %v3298_v53, 16 }
 0x418   : > { %v1018_v36 = vadd.s32 %v1016_v29, %v1010_v35  ;;  %v1096_v15 = vmul.u32 61681, %v1092_v10  ;;  %v1078_v35 = vsel %vm1077_vm15, 1, %v2925_v28  ;;  %v1104_v29 = vadd.s32 %v1098_v17, %v1094_v14 }
 0x419   : > { %v1080_v37 = vadd.s32 %v1078_v35, %v1076_v23  ;;  %v1097_v38 = vmul.u32 61680, %v1092_v10 }
 0x41a   : > { %v1100_v26 = vshll.u32 %v1096_v15, 16  ;;  %v1101_v1 = vshrl.u32 %v1096_v15, 16 }
 0x41b   : > { %v1105_v49 = vadd.s32 %v1103_v43, %v1097_v38 }
 0x41c   : > { %vm1106_vm3 = vc.u32 %v1104_v29, %v1100_v26 }
 0x41d   : > { %v1107_v50 = vsel %vm1106_vm3, 1, %v2925_v28 }
 0x426   : > { %2596 = vmatmul.msk.bf16.gmra.mxu2 %vm1284_vm5, %v1543_v39  ;;  %v1020_v39 = vsel %vm1019_vm10, 1, %v2925_v28  ;;  %vm1202_vm10 = vmand %vm1201_vm7, %vm1200_vm2 }
 0x427   : > { %v1022_v48 = vadd.s32 %v1020_v39, %v1018_v36  ;;  %v1070_v36 = vshrl.u32 %v1066_v60, 16  ;;  %v1121_v39 = vshrl.u32 %v3307_v25, 16  ;;  %v1109_v60 = vadd.s32 %v1107_v50, %v1105_v49 }
 0x429   : > { %v1125_v46 = vmul.u32 61681, %v1121_v39  ;;  %v1081_v40 = vadd.s32 %v1080_v37, %v1070_v36  ;;  %v1126_v34 = vmul.u32 61680, %v1121_v39  ;;  %v1110_v2 = vadd.s32 %v1109_v60, %v1099_v59 }
 0x42b   : > { %v1129_v22 = vshll.u32 %v1125_v46, 16  ;;  %v1111_v6 = vadd.s32 %v1110_v2, %v1101_v1  ;;  %v1130_v12 = vshrl.u32 %v1125_v46, 16 }
 0x42d   : > { %v1112_v11 = vshrl.u32 %v1111_v6, 4 }
 0x42f   : > { %v1113_v17 = vmul.u32 17, %v1112_v11 }
 0x436   : > { %2597 = vmatmul.msk.bf16.gmra.mxu2 %vm1284_vm5, %v1544_v55  ;;  %v1023_v55 = vadd.s32 %v1022_v48, %v1012_v47  ;;  %v1054_v47 = vshrl.u32 %v1053_v31, 4  ;;  %v1127_v48 = vshll.u32 %v1124_v44, 16 }
 0x438   : > { %v1024_v0 = vadd.s32 %v1023_v55, %v1014_v54  ;;  %vm1131_vm8 = vc.u32 %v1123_v45, %v1127_v48  ;;  %v1133_v8 = vadd.s32 %v1127_v48, %v1123_v45  ;;  %v1203_v55 = vadd.s32 17, %v1197_v42 }
 0x439   : > { %v1055_v57 = vmul.u32 17, %v1054_v47  ;;  %v1132_v61 = vsel %vm1131_vm8, 1, %v2925_v28 }
 0x43a   : > { %v1025_v56 = vshrl.u32 %v1024_v0, 4  ;;  %vm1135_vm11 = vc.u32 %v1133_v8, %v1129_v22  ;;  %v1134_v3 = vadd.s32 %v1132_v61, %v1126_v34 }
 0x43b   : > { %v1056_v52 = vsub.s32 %v3281_v27, %v1055_v57  ;;  %v1136_v4 = vsel %vm1135_vm11, 1, %v2925_v28 }
 0x43c   : > { %v1026_v18 = vmul.u32 17, %v1025_v56  ;;  %v1128_v56 = vshrl.u32 %v1124_v44, 16  ;;  %v1138_v7 = vadd.s32 %v1136_v4, %v1134_v3 }
 0x43d   : > { %vm1147_vm13 = vcmp.ne.s32.totalorder %v1056_v52, 0  ;;  %vm1152_vm14 = vcmp.lt.s32.totalorder %v1056_v52, 0  ;;  %v1162_v21 = vadd.s32 17, %v1056_v52 }
 0x43e   : > { %v1027_v30 = vsub.s32 %v3272_v33, %v1026_v18  ;;  %v1072_v33 = vshrl.u32 %v3295_v63, 16  ;;  %v3323_v63 = vsel %vm1202_vm10, %v1203_v55, %v1197_v42  ;;  %vm1157_vm15 = vmand %vm1152_vm14, %vm1147_vm13  ;;  %v1139_v13 = vadd.s32 %v1138_v7, %v1128_v56 }
 0x43f   : > { %v1167_v28 = vsel %vm1157_vm15, %v1162_v21, %v1056_v52 }
 0x440   : > { %vm1146_vm4 = vcmp.ne.s32.totalorder %v1027_v30, 0  ;;  %vm1151_vm1 = vcmp.lt.s32.totalorder %v1027_v30, 0  ;;  %v1161_v54 = vadd.s32 17, %v1027_v30  ;;  %v1082_v58 = vadd.s32 %v1081_v40, %v1072_v33 }
 0x441   : > { %vm3316_vm9 = vmand %vm1151_vm1, %vm1146_vm4  ;;  %v1140_v18 = vadd.s32 %v1139_v13, %v1130_v12  ;;  %vm1206_vm1 = vcmp.eq.s32.totalorder %v1167_v28, %v3323_v63 }
 0x442   : > { %v1166_v62 = vsel %vm3316_vm9, %v1161_v54, %v1027_v30  ;;  %v1083_v0 = vshrl.u32 %v1082_v58, 4  ;;  %v1211_v23 = vsel %vm1206_vm1, 0.0, %v2926_v9 }
 0x443   : > { %vm1205_vm12 = vcmp.eq.s32.totalorder %v1166_v62, %v3323_v63  ;;  %v1141_v24 = vshrl.u32 %v1140_v18, 4 }
 0x444   : > { %v1084_v5 = vmul.u32 17, %v1083_v0  ;;  %v1210_v10 = vsel %vm1205_vm12, 0.0, %v2926_v9 }
 0x445   : > { %v1142_v30 = vmul.u32 17, %v1141_v24 }
 0x446   : > { %v1085_v27 = vsub.s32 %v3290_v41, %v1084_v5  ;;  %v1114_v41 = vsub.s32 %v3298_v53, %v1113_v17  ;;  %v2745_v17 = vld [vmem:[%s3069_s23 + $0x18] sm:$0xff] }
 0x447   : > { %v1143_v37 = vsub.s32 %v3307_v25, %v1142_v30  ;;  %1758 = vmatpush.bf16.msrb.mxu3 %v2745_v17 }
 0x448   : > { %vm1148_vm3 = vcmp.ne.s32.totalorder %v1085_v27, 0  ;;  %vm1153_vm4 = vcmp.lt.s32.totalorder %v1085_v27, 0  ;;  %v1163_v20 = vadd.s32 17, %v1085_v27  ;;  %vm1149_vm7 = vcmp.ne.s32.totalorder %v1114_v41, 0 }
 0x449   : > { %vm1158_vm2 = vmand %vm1153_vm4, %vm1148_vm3  ;;  %vm1154_vm8 = vcmp.lt.s32.totalorder %v1114_v41, 0  ;;  %v1164_v32 = vadd.s32 17, %v1114_v41  ;;  %vm1150_vm11 = vcmp.ne.s32.totalorder %v1143_v37, 0  ;;  %vm1155_vm12 = vcmp.lt.s32.totalorder %v1143_v37, 0 }
 0x44a   : > { %v1168_v26 = vsel %vm1158_vm2, %v1163_v20, %v1085_v27  ;;  %vm1159_vm10 = vmand %vm1154_vm8, %vm1149_vm7  ;;  %v1165_v43 = vadd.s32 17, %v1143_v37  ;;  %vm1605_vm3 = vcmask 271360  }
 0x44b   : > { %vm1207_vm9 = vcmp.eq.s32.totalorder %v1168_v26, %v3323_v63  ;;  %v1169_v39 = vsel %vm1159_vm10, %v1164_v32, %v1114_v41  ;;  %vm1160_vm14 = vmand %vm1155_vm12, %vm1150_vm11 }
 0x44c   : > { %v1212_v36 = vsel %vm1207_vm9, 0.0, %v2926_v9  ;;  %vm1208_vm13 = vcmp.eq.s32.totalorder %v1169_v39, %v3323_v63  ;;  %v1170_v46 = vsel %vm1160_vm14, %v1165_v43, %v1143_v37 }
 0x44d   : > { %v1213_v44 = vsel %vm1208_vm13, 0.0, %v2926_v9  ;;  %vm1209_vm15 = vcmp.eq.s32.totalorder %v1170_v46, %v3323_v63  ;;  %v2743_v46 = vld [vmem:[%s3069_s23 + $0x8] sm:$0xff] }
 0x44e   : > { %v1214_v25 = vsel %vm1209_vm15, 0.0, %v2926_v9 }
 0x499   : > { %v1578_v14 = vpop.f32.mrf.mxu2 }
 0x49a   : > { %v1579_v15 = vadd.f32 %v1578_v14, %v1210_v10 }
 0x49c   : > { %v1593_v19 = vsel %vm1592_vm0, %v1579_v15, -inf }
 0x49d   : > { %1594 = vmax.xlane.f32.xlu2 %v1593_v19  ;;  %v2744_v19 = vld [vmem:[%s3069_s23 + $0x10] sm:$0xff] }
 0x49e   : > { %1759 = vmatpush.bf16.msrb.mxu3 %v2744_v19 }
 0x4a1   : > { %v1580_v35 = vpop.f32.mrf.mxu2 }
 0x4a2   : > { %v1581_v29 = vadd.f32 %v1580_v35, %v1211_v23  ;;  %1760 = vmatpush.bf16.msrb.mxu3 %v2743_v46  ;;  %v2646_v46 = vld [vmem:[%s3082_s1 + $0x30] sm:$0xf] }
 0x4a4   : > { %v1596_v31 = vsel %vm1592_vm0, %v1581_v29, -inf }
 0x4a5   : > { %1597 = vmax.xlane.f32.xlu1 %v1596_v31 }
 0x4a9   : > { %v1583_v38 = vpop.f32.mrf.mxu2 }
 0x4aa   : > { %v1584_v53 = vadd.f32 %v1583_v38, %v1212_v36 }
 0x4ac   : > { %v1599_v42 = vsel %vm1592_vm0, %v1584_v53, -inf }
 0x4ad   : > { %1600 = vmax.xlane.f32.xlu0 %v1599_v42 }
 0x4b1   : > { %v1585_v45 = vpop.f32.mrf.mxu2 }
 0x4b2   : > { %v1586_v47 = vadd.f32 %v1585_v45, %v1213_v44 }
 0x4b4   : > { %v1602_v48 = vsel %vm1592_vm0, %v1586_v47, -inf }
 0x4b5   : > { %1603 = vmax.xlane.f32.xlu2 %v1602_v48 }
 0x4b9   : > { %v1588_v33 = vpop.f32.mrf.mxu2 }
 0x4ba   : > { %v1589_v40 = vadd.f32 %v1588_v33, %v1214_v25 }
 0x4bc   : > { %v1606_v49 = vsel %vm1605_vm3, %v1589_v40, -inf }
 0x4bd   : > { %1607 = vmax.xlane.f32.xlu1 %v1606_v49 }
 0x4c1   : > { %v1590_v50 = vpop.f32.mrf.mxu2 }
 0x510   : > { %v1595_v22 = vpop.xlane.xlu2 %1594 }
 0x511   : > { %v1609_v8 = vsub.f32 %v1579_v15, %v1595_v22 }
 0x513   : > { %v1614_v51 = vmul.f32 1.442695, %v1609_v8 }
 0x515   : > { %2827 = vpow2.f32 %v1614_v51 }
 0x518   : > { %v1598_v54 = vpop.xlane.xlu1 %1597 }
 0x519   : > { %v1610_v55 = vsub.f32 %v1581_v29, %v1598_v54 }
 0x51b   : > { %v2828_v57 = vpop.eup %2827  ;;  %v1616_v58 = vmul.f32 1.442695, %v1610_v55 }
 0x51c   : > { %v1624_v59 = vsel %vm1592_vm0, %v2828_v57, 0.0 }
 0x51d   : > { %2829 = vpow2.f32 %v1616_v58  ;;  %1625 = vadd.xlane.f32.xlu0 %v1624_v59 }
 0x520   : > { %v1601_v60 = vpop.xlane.xlu0 %1600 }
 0x521   : > { %v1611_v34 = vsub.f32 %v1584_v53, %v1601_v60 }
 0x523   : > { %v2830_v61 = vpop.eup %2829  ;;  %v1618_v62 = vmul.f32 1.442695, %v1611_v34 }
 0x524   : > { %v1627_v63 = vsel %vm1592_vm0, %v2830_v61, 0.0 }
 0x525   : > { %2831 = vpow2.f32 %v1618_v62  ;;  %1628 = vadd.xlane.f32.xlu2 %v1627_v63 }
 0x528   : > { %v1604_v52 = vpop.xlane.xlu2 %1603 }
 0x529   : > { %v1612_v0 = vsub.f32 %v1586_v47, %v1604_v52  ;;  %v2742_v47 = vld [vmem:[%s3069_s23] sm:$0xff]  ;;  %s3654_s23 = scalar_lea.vmem %s3614_s10, %s3039_s20 }
 0x52a   : > { %1761 = vmatpush.bf16.msrb.mxu3 %v2742_v47  ;;  %v2811_v54 = vld [vmem:[%s3654_s23] ss:$0 sm:$0xff]  ;;  %v2753_v47 = vld [vmem:[%s3082_s1 + $0x34] sm:$0xf0] }
 0x52b   : > { %v2832_v1 = vpop.eup %2831  ;;  %v1620_v2 = vmul.f32 1.442695, %v1612_v0 }
 0x52c   : > { %v1630_v3 = vsel %vm1592_vm0, %v2832_v1, 0.0 }
 0x52d   : > { %2833 = vpow2.f32 %v1620_v2  ;;  %1631 = vadd.xlane.f32.xlu1 %v1630_v3 }
 0x530   : > { %v1608_v4 = vpop.xlane.xlu1 %1607 }
 0x531   : > { %v1613_v5 = vsub.f32 %v1589_v40, %v1608_v4 }
 0x533   : > { %v2834_v6 = vpop.eup %2833  ;;  %v1622_v56 = vmul.f32 1.442695, %v1613_v5 }
 0x534   : > { %v1633_v7 = vsel %vm1592_vm0, %v2834_v6, 0.0 }
 0x535   : > { %2835 = vpow2.f32 %v1622_v56  ;;  %1634 = vadd.xlane.f32.xlu0 %v1633_v7 }
 0x53b   : > { %v2836_v21 = vpop.eup %2835 }
 0x53c   : > { %v1636_v9 = vsel %vm1605_vm3, %v2836_v21, 0.0 }
 0x53d   : > { %1637 = vadd.xlane.f32.xlu2 %v1636_v9 }
 0x590   : > { %v1626_v10 = vpop.xlane.xlu0 %1625 }
 0x591   : > { %2837 = vrcp.f32 %v1626_v10  ;;  %v2901_v10 = vld [vmem:[#allocation2 + $0x20] sm:$0x3] }
 0x597   : > { %v2838_v11 = vpop.eup %2837 }
 0x598   : > { %v1629_v27 = vpop.xlane.xlu2 %1628  ;;  %v1644_v12 = vmul.f32 %v2838_v11, %v2828_v57  ;;  %v2897_v57 = vld [vmem:[#allocation2] sm:$0xff] }
 0x599   : > { %2839 = vrcp.f32 %v1629_v27 }
 0x59a   : > { %v1649_v14 = vpack.c.bf16 %v1644_v12, %v1644_v12 }
 0x59c   : > { %v1659_v20 = vunpack.c.l.b16 %v1649_v14 }
 0x59f   : > { %v2840_v13 = vpop.eup %2839 }
 0x5a0   : > { %v1645_v28 = vmul.f32 %v2840_v13, %v2830_v61  ;;  %v1632_v15 = vpop.xlane.xlu1 %1631  ;;  %v2898_v61 = vld [vmem:[#allocation2 + $0x8] sm:$0xff] }
 0x5a1   : > { %2841 = vrcp.f32 %v1632_v15 }
 0x5a2   : > { %v1650_v18 = vpack.c.bf16 %v1645_v28, %v1645_v28 }
 0x5a4   : > { %v1660_v23 = vunpack.c.l.b16 %v1650_v18 }
 0x5a6   : > { %v1664_v41 = vpack.c.b16 %v1660_v23, %v1659_v20 }
 0x5a7   : > { %v2842_v35 = vpop.eup %2841 }
 0x5a8   : > { %v1635_v24 = vpop.xlane.xlu0 %1634  ;;  %2598 = vmatmul.msk.bf16.vlgmr.msrb.gmra.mxu0 %vm1592_vm0, %v1664_v41  ;;  %v1646_v26 = vmul.f32 %v2842_v35, %v2832_v1  ;;  %v2899_v1 = vld [vmem:[#allocation2 + $0x10] sm:$0xff] }
 0x5a9   : > { %2843 = vrcp.f32 %v1635_v24 }
 0x5aa   : > { %v1651_v30 = vpack.c.bf16 %v1646_v26, %v1646_v26 }
 0x5ac   : > { %v1661_v37 = vunpack.c.l.b16 %v1651_v30 }
 0x5af   : > { %v2844_v29 = vpop.eup %2843 }
 0x5b0   : > { %v1647_v31 = vmul.f32 %v2844_v29, %v2834_v6  ;;  %v1638_v32 = vpop.xlane.xlu2 %1637  ;;  %v2900_v6 = vld [vmem:[#allocation2 + $0x18] sm:$0xff] }
 0x5b1   : > { %2845 = vrcp.f32 %v1638_v32 }
 0x5b2   : > { %v1652_v36 = vpack.c.bf16 %v1647_v31, %v1647_v31 }
 0x5b4   : > { %v1662_v38 = vunpack.c.l.b16 %v1652_v36 }
 0x5b6   : > { %v1665_v39 = vpack.c.b16 %v1662_v38, %v1661_v37 }
 0x5b7   : > { %v2846_v53 = vpop.eup %2845 }
 0x5b8   : > { %2599 = vmatmul.msk.bf16.vlgmr.msrb.gmra.mxu1 %vm1592_vm0, %v1665_v39  ;;  %v1648_v42 = vmul.f32 %v2846_v53, %v2836_v21 }
 0x5ba   : > { %v1653_v43 = vpack.c.bf16 %v1648_v42, %v1648_v42 }
 0x5bc   : > { %v1663_v44 = vunpack.c.l.b16 %v1653_v43 }
 0x5be   : > { %v1666_v45 = vpack.c.b16 %v1663_v44, %v1663_v44 }
 0x5c0   : > { %2600 = vmatmul.msk.bf16.vlgmr.msra.gmra.mxu3 %vm1592_vm0, %v1666_v45 }
 0x625   : > { %v1704_v48 = vpop.f32.mrf.mxu0 }
 0x62d   : > { %v1706_v25 = vpop.f32.mrf.mxu0 }
 0x62e   : > { %v1718_v33 = vpack.c.bf16 %v1706_v25, %v1704_v48  ;;  %v2752_v48 = vld [vmem:[%s3082_s1 + $0x34] sm:$0xf]  ;;  %v2647_v25 = vor.u32 %v2753_v47, %v2646_v46 }
 0x630   : > { %2617 = vmatmul.msk.bf16.vlgmr.msrb.gmra.mxu3 %vm1284_vm5, %v1718_v33  ;;  %v2648_v33 = vld [vmem:[%s3082_s1 + $0x38] sm:$0xf0]  ;;  %1977 = vmatpush.bf16.msra.mxu0 %v2647_v25 }
 0x635   : > { %v1709_v40 = vpop.f32.mrf.mxu1 }
 0x63d   : > { %v1711_v49 = vpop.f32.mrf.mxu1 }
 0x63e   : > { %v1719_v50 = vpack.c.bf16 %v1711_v49, %v1709_v40  ;;  %v2651_v40 = vor.u32 %v2752_v48, %v2648_v33  ;;  %v2638_v49 = vld [vmem:[%s3082_s1 + $0x20] sm:$0xf] }
 0x63f   : > { %v3448_v48 = vld [vmem:[%s748_s29] ss:$0 sm:$0xff] }
 0x640   : > { %2618 = vmatmul.msk.bf16.gmra.mxu3 %vm1284_vm5, %v1719_v50  ;;  %2000 = vmatpush.bf16.msra.mxu1 %v2651_v40  ;;  %v2751_v50 = vld [vmem:[%s3082_s1 + $0x24] sm:$0xf0] }
 0x643   : > { %v1714_v22 = vpop.f32.mrf.mxu3 }
 0x644   : > { %v1720_v51 = vpack.c.bf16 %v1714_v22, %v1714_v22  ;;  %v2750_v22 = vld [vmem:[%s3082_s1 + $0x24] sm:$0xf] }
 0x64b   : > { %v1716_v8 = vpop.f32.mrf.mxu3 }
 0x64c   : > { %v2639_v8 = vor.u32 %v2751_v50, %v2638_v49 }
 0x64e   : > { %1978 = vmatpush.bf16.msra.mxu0 %v2639_v8 }
 0x650   : > { %2619 = vmatmul.msk.bf16.gmra.mxu3 %vm1284_vm5, %v1720_v51  ;;  %v2640_v51 = vld [vmem:[%s3082_s1 + $0x28] sm:$0xf0] }
 0x6b3   : > { %v1763_v55 = vpop.f32.mrf.mxu3 }
 0x6b4   : > { %v1777_v58 = vadd.f32 %v2897_v57, %v1763_v55  ;;  %v2630_v55 = vld [vmem:[%s3082_s1 + $0x10] sm:$0xf]  ;;  %v2749_v57 = vld [vmem:[%s3082_s1 + $0x14] sm:$0xf0] }
 0x6b6   : > { %v3360_v59 = vadd.f32 %v2811_v54, %v1777_v58  ;;  %v2748_v58 = vld [vmem:[%s3082_s1 + $0x14] sm:$0xf] }
 0x6b8   : > { %v1790_v60 = vsel %vm1284_vm5, %v3360_v59, 0.0 }
 0x6b9   : > { %1791 = vadd.xlane.f32.xlu1 %v1790_v60  ;;  %v2631_v60 = vor.u32 %v2749_v57, %v2630_v55 }
 0x6bb   : > { %v1765_v34 = vpop.f32.mrf.mxu3  ;;  %1979 = vmatpush.bf16.msra.mxu0 %v2631_v60 }
 0x6bc   : > { %v1778_v62 = vadd.f32 %v2898_v61, %v1765_v34  ;;  %v2632_v34 = vld [vmem:[%s3082_s1 + $0x18] sm:$0xf0] }
 0x6be   : > { %v3364_v63 = vadd.f32 %v2811_v54, %v1778_v62  ;;  %v2635_v62 = vor.u32 %v2748_v58, %v2632_v34  ;;  %v2761_v34 = vld [vmem:[%s3093_s6 + $0x38] sm:$0xff] }
 0x6bf   : > { %2184 = vmatpush.bf16.msrb.mxu2 %v2761_v34 }
 0x6c0   : > { %v1793_v52 = vsel %vm1284_vm5, %v3364_v63, 0.0 }
 0x6c1   : > { %1794 = vadd.xlane.f32.xlu0 %v1793_v52 }
 0x6c3   : > { %v1768_v0 = vpop.f32.mrf.mxu3 }
 0x6c4   : > { %v1779_v2 = vadd.f32 %v2899_v1, %v1768_v0  ;;  %v2622_v0 = vld [vmem:[%s3082_s1] sm:$0xf]  ;;  %v2747_v1 = vld [vmem:[%s3082_s1 + $0x4] sm:$0xf0] }
 0x6c6   : > { %v3368_v3 = vadd.f32 %v2811_v54, %v1779_v2  ;;  %v2746_v2 = vld [vmem:[%s3082_s1 + $0x4] sm:$0xf] }
 0x6c8   : > { %v1796_v4 = vsel %vm1284_vm5, %v3368_v3, 0.0 }
 0x6c9   : > { %1797 = vadd.xlane.f32.xlu2 %v1796_v4 }
 0x6cb   : > { %v1770_v5 = vpop.f32.mrf.mxu3 }
 0x6cc   : > { %v1780_v56 = vadd.f32 %v2900_v6, %v1770_v5  ;;  %v2623_v5 = vor.u32 %v2747_v1, %v2622_v0  ;;  %v2624_v6 = vld [vmem:[%s3082_s1 + $0x8] sm:$0xf0]  ;;  %v2760_v0 = vld [vmem:[%s3093_s6 + $0x30] sm:$0xff] }
 0x6cd   : > { %v2768_v1 = vld [vmem:[%s3093_s6 + $0x70] sm:$0xff]  ;;  %2185 = vmatpush.bf16.msrb.mxu2 %v2760_v0 }
 0x6ce   : > { %v3372_v7 = vadd.f32 %v2811_v54, %v1780_v56  ;;  %v2627_v56 = vor.u32 %v2746_v2, %v2624_v6  ;;  %1980 = vmatpush.bf16.msra.mxu0 %v2623_v5 }
 0x6d0   : > { %v1799_v21 = vsel %vm1284_vm5, %v3372_v7, 0.0 }
 0x6d1   : > { %1800 = vadd.xlane.f32.xlu1 %v1799_v21 }
 0x6d3   : > { %v1773_v9 = vpop.f32.mrf.mxu3 }
 0x6d4   : > { %v1781_v27 = vadd.f32 %v2901_v10, %v1773_v9 }
 0x6d6   : > { %v3376_v11 = vadd.f32 %v2811_v54, %v1781_v27  ;;  %v2643_v54 = vor.u32 %v2750_v22, %v2640_v51 }
 0x6d8   : > { %v1802_v12 = vsel %vm1297_vm6, %v3376_v11, 0.0  ;;  %2001 = vmatpush.bf16.msra.mxu1 %v2643_v54 }
 0x6d9   : > { %1803 = vadd.xlane.f32.xlu0 %v1802_v12 }
 0x6db   : > { %v1775_v13 = vpop.f32.mrf.mxu3 }
 0x6dc   : > { %2002 = vmatpush.bf16.msra.mxu1 %v2635_v62 }
 0x6e0   : > { %2003 = vmatpush.bf16.msra.mxu1 %v2627_v56 }
 0x72c   : > { %v1792_v14 = vpop.xlane.xlu1 %1791 }
 0x72d   : > { %v1805_v28 = vmul.f32 %v1792_v14, %v3184_v16 }
 0x72f   : > { %v3382_v15 = vsub.f32 %v3360_v59, %v1805_v28 }
 0x731   : > { %v1815_v17 = vmul.f32 %v3382_v15, %v3382_v15 }
 0x733   : > { %v1820_v18 = vsel %vm1284_vm5, %v1815_v17, 0.0 }
 0x734   : > { %v1795_v19 = vpop.xlane.xlu0 %1794  ;;  %1821 = vadd.xlane.f32.xlu2 %v1820_v18 }
 0x735   : > { %v1806_v20 = vmul.f32 %v1795_v19, %v3184_v16 }
 0x737   : > { %v3389_v23 = vsub.f32 %v3364_v63, %v1806_v20 }
 0x739   : > { %v1816_v41 = vmul.f32 %v3389_v23, %v3389_v23 }
 0x73b   : > { %v1823_v24 = vsel %vm1284_vm5, %v1816_v41, 0.0 }
 0x73c   : > { %v1798_v35 = vpop.xlane.xlu2 %1797  ;;  %1824 = vadd.xlane.f32.xlu1 %v1823_v24 }
 0x73d   : > { %v1807_v26 = vmul.f32 %v1798_v35, %v3184_v16 }
 0x73f   : > { %v3396_v29 = vsub.f32 %v3368_v3, %v1807_v26 }
 0x741   : > { %v1817_v30 = vmul.f32 %v3396_v29, %v3396_v29 }
 0x743   : > { %v1826_v31 = vsel %vm1284_vm5, %v1817_v30, 0.0 }
 0x744   : > { %1827 = vadd.xlane.f32.xlu0 %v1826_v31  ;;  %v1801_v32 = vpop.xlane.xlu1 %1800 }
 0x745   : > { %v1808_v36 = vmul.f32 %v1801_v32, %v3184_v16 }
 0x747   : > { %v3403_v37 = vsub.f32 %v3372_v7, %v1808_v36 }
 0x749   : > { %v1818_v38 = vmul.f32 %v3403_v37, %v3403_v37 }
 0x74b   : > { %v1829_v39 = vsel %vm1284_vm5, %v1818_v38, 0.0 }
 0x74c   : > { %v1804_v53 = vpop.xlane.xlu0 %1803  ;;  %1830 = vadd.xlane.f32.xlu2 %v1829_v39  ;;  %v3440_v39 = vld [vmem:[%s3655_s8] ss:$0 sm:$0xff] }
 0x74d   : > { %v1809_v42 = vmul.f32 %v1804_v53, %v3184_v16 }
 0x74f   : > { %v3410_v43 = vsub.f32 %v3376_v11, %v1809_v42 }
 0x751   : > { %v1819_v44 = vmul.f32 %v3410_v43, %v3410_v43 }
 0x753   : > { %v1832_v45 = vsel %vm1297_vm6, %v1819_v44, 0.0 }
 0x754   : > { %1833 = vadd.xlane.f32.xlu1 %v1832_v45 }
 0x7a7   : > { %v1822_v61 = vpop.xlane.xlu2 %1821 }
 0x7a8   : > { %v1835_v52 = vmul.f32 %v1822_v61, %v3184_v16  ;;  %v2769_v61 = vld [vmem:[%s3093_s6 + $0x78] sm:$0xff] }
 0x7a9   : > { %2207 = vmatpush.bf16.msra.mxu3 %v2769_v61 }
 0x7aa   : > { %v1840_v4 = vadd.f32 1e-05, %v1835_v52 }
 0x7ac   : > { %2847 = vrsqrt.f32 %v1840_v4  ;;  %vm1851_vm4 = vweird.f32 %v1840_v4 }
 0x7ad   : > { %2208 = vmatpush.bf16.msra.mxu3 %v2768_v1 }
 0x7af   : > { %v1825_v21 = vpop.xlane.xlu1 %1824 }
 0x7b0   : > { %v1836_v9 = vmul.f32 %v1825_v21, %v3184_v16  ;;  %v2759_v21 = vld [vmem:[%s3093_s6 + $0x28] sm:$0xff] }
 0x7b1   : > { %2186 = vmatpush.bf16.msrb.mxu2 %v2759_v21 }
 0x7b2   : > { %v2848_v10 = vpop.eup %2847  ;;  %v1841_v27 = vadd.f32 1e-05, %v1836_v9  ;;  %v2767_v9 = vld [vmem:[%s3093_s6 + $0x68] sm:$0xff] }
 0x7b3   : > { %v1846_v12 = vmul.f32 %v2848_v10, %v1840_v4  ;;  %vm1852_vm0 = vweird.f32 %v2848_v10  ;;  %2209 = vmatpush.bf16.msra.mxu3 %v2767_v9 }
 0x7b4   : > { %2849 = vrsqrt.f32 %v1841_v27  ;;  %vm1853_vm1 = vmor %vm1851_vm4, %vm1852_vm0  ;;  %vm1861_vm7 = vweird.f32 %v1841_v27 }
 0x7b5   : > { %v1847_v13 = vmul.f32 %v2848_v10, %v1846_v12 }
 0x7b7   : > { %v1848_v14 = vmul.f32 0.5, %v1847_v13  ;;  %v1828_v28 = vpop.xlane.xlu0 %1827 }
 0x7b8   : > { %v1837_v17 = vmul.f32 %v1828_v28, %v3184_v16 }
 0x7b9   : > { %v1849_v18 = vsub.f32 1.5, %v1848_v14 }
 0x7ba   : > { %v2850_v19 = vpop.eup %2849  ;;  %v1842_v20 = vadd.f32 1e-05, %v1837_v17 }
 0x7bb   : > { %v1850_v41 = vmul.f32 %v2848_v10, %v1849_v18  ;;  %v1856_v24 = vmul.f32 %v2850_v19, %v1841_v27  ;;  %vm1862_vm2 = vweird.f32 %v2850_v19 }
 0x7bc   : > { %2851 = vrsqrt.f32 %v1842_v20  ;;  %vm1863_vm8 = vmor %vm1861_vm7, %vm1862_vm2  ;;  %vm1871_vm10 = vweird.f32 %v1842_v20 }
 0x7bd   : > { %v1857_v35 = vmul.f32 %v2850_v19, %v1856_v24  ;;  %v1854_v26 = vsel %vm1853_vm1, %v2848_v10, %v1850_v41 }
 0x7be   : > { %v1895_v53 = vmul.f32 %v1854_v26, %v3382_v15 }
 0x7bf   : > { %v1858_v30 = vmul.f32 0.5, %v1857_v35  ;;  %v1831_v31 = vpop.xlane.xlu2 %1830 }
 0x7c0   : > { %v1838_v32 = vmul.f32 %v1831_v31, %v3184_v16  ;;  %v1903_v25 = vmul.f32 %v3440_v39, %v1895_v53  ;;  %v2766_v31 = vld [vmem:[%s3093_s6 + $0x60] sm:$0xff] }
 0x7c1   : > { %v1859_v36 = vsub.f32 1.5, %v1858_v30  ;;  %v2758_v30 = vld [vmem:[%s3093_s6 + $0x20] sm:$0xff]  ;;  %2210 = vmatpush.bf16.msra.mxu3 %v2766_v31 }
 0x7c2   : > { %v2852_v38 = vpop.eup %2851  ;;  %v1843_v42 = vadd.f32 1e-05, %v1838_v32  ;;  %v1911_v51 = vadd.f32 %v3448_v48, %v1903_v25  ;;  %2187 = vmatpush.bf16.msrb.mxu2 %v2758_v30  ;;  %v2757_v32 = vld [vmem:[%s3093_s6 + $0x18] sm:$0xff] }
 0x7c3   : > { %v1860_v44 = vmul.f32 %v2850_v19, %v1859_v36  ;;  %v1866_v45 = vmul.f32 %v2852_v38, %v1842_v20  ;;  %vm1872_vm9 = vweird.f32 %v2852_v38  ;;  %v2765_v36 = vld [vmem:[%s3093_s6 + $0x58] sm:$0xff] }
 0x7c4   : > { %2853 = vrsqrt.f32 %v1843_v42  ;;  %vm1873_vm11 = vmor %vm1871_vm10, %vm1872_vm9  ;;  %vm1881_vm13 = vweird.f32 %v1843_v42 }
 0x7c5   : > { %v1864_v46 = vsel %vm1863_vm8, %v2850_v19, %v1860_v44  ;;  %v1867_v47 = vmul.f32 %v2852_v38, %v1866_v45  ;;  %2211 = vmatpush.bf16.msra.mxu3 %v2765_v36  ;;  %v2755_v44 = vld [vmem:[%s3093_s6 + $0x8] sm:$0xff] }
 0x7c6   : > { %v1896_v33 = vmul.f32 %v1864_v46, %v3389_v23  ;;  %2188 = vmatpush.bf16.msrb.mxu2 %v2757_v32  ;;  %v2763_v45 = vld [vmem:[%s3093_s6 + $0x48] sm:$0xff] }
 0x7c7   : > { %v1868_v40 = vmul.f32 0.5, %v1867_v47  ;;  %v1834_v15 = vpop.xlane.xlu1 %1833 }
 0x7c8   : > { %v1904_v49 = vmul.f32 %v3440_v39, %v1896_v33  ;;  %v1839_v50 = vmul.f32 %v1834_v15, %v3184_v16  ;;  %v2754_v33 = vld [vmem:[%s3093_s6] sm:$0xff] }
 0x7c9   : > { %v1869_v22 = vsub.f32 1.5, %v1868_v40  ;;  %v2762_v40 = vld [vmem:[%s3093_s6 + $0x40] sm:$0xff] }
 0x7ca   : > { %v2854_v8 = vpop.eup %2853  ;;  %v1912_v54 = vadd.f32 %v3448_v48, %v1904_v49  ;;  %v1844_v55 = vadd.f32 1e-05, %v1839_v50 }
 0x7cb   : > { %v1870_v57 = vmul.f32 %v2852_v38, %v1869_v22  ;;  %v1876_v23 = vmul.f32 %v2854_v8, %v1843_v42  ;;  %vm1882_vm12 = vweird.f32 %v2854_v8 }
 0x7cc   : > { %2855 = vrsqrt.f32 %v1844_v55  ;;  %v1916_v58 = vpack.c.bf16 %v1912_v54, %v1911_v51  ;;  %vm1883_vm14 = vmor %vm1881_vm13, %vm1882_vm12  ;;  %vm1891_vm3 = vweird.f32 %v1844_v55 }
 0x7cd   : > { %v1877_v60 = vmul.f32 %v2854_v8, %v1876_v23  ;;  %v1874_v62 = vsel %vm1873_vm11, %v2852_v38, %v1870_v57  ;;  %v2764_v38 = vld [vmem:[%s3093_s6 + $0x50] sm:$0xff] }
 0x7ce   : > { %2652 = vmatmul.msk.bf16.vlgmr.msra.gmra.mxu0 %vm1284_vm5, %v1916_v58  ;;  %2655 = vmatmul.msk.bf16.vlgmr.msra.gmra.mxu1 %vm1284_vm5, %v1916_v58  ;;  %v1897_v5 = vmul.f32 %v1874_v62, %v3396_v29 }
 0x7cf   : > { %v1878_v52 = vmul.f32 0.5, %v1877_v60  ;;  %2212 = vmatpush.bf16.msra.mxu3 %v2764_v38 }
 0x7d0   : > { %v1905_v13 = vmul.f32 %v3440_v39, %v1897_v5 }
 0x7d1   : > { %v1879_v2 = vsub.f32 1.5, %v1878_v52 }
 0x7d2   : > { %v2856_v4 = vpop.eup %2855  ;;  %v1913_v17 = vadd.f32 %v3448_v48, %v1905_v13 }
 0x7d3   : > { %v1880_v6 = vmul.f32 %v2854_v8, %v1879_v2  ;;  %v1886_v56 = vmul.f32 %v2856_v4, %v1844_v55  ;;  %vm1892_vm15 = vweird.f32 %v2856_v4  ;;  %2213 = vmatpush.bf16.msra.mxu3 %v2763_v45 }
 0x7d4   : > { %vm1893_vm0 = vmor %vm1891_vm3, %vm1892_vm15 }
 0x7d5   : > { %v1884_v10 = vsel %vm1883_vm14, %v2854_v8, %v1880_v6  ;;  %v1887_v27 = vmul.f32 %v2856_v4, %v1886_v56 }
 0x7d6   : > { %v1898_v12 = vmul.f32 %v1884_v10, %v3403_v37 }
 0x7d7   : > { %v1888_v14 = vmul.f32 0.5, %v1887_v27  ;;  %2214 = vmatpush.bf16.msra.mxu3 %v2762_v40 }
 0x7d8   : > { %v1906_v28 = vmul.f32 %v3440_v39, %v1898_v12 }
 0x7d9   : > { %v1889_v29 = vsub.f32 1.5, %v1888_v14 }
 0x7da   : > { %v1914_v18 = vadd.f32 %v3448_v48, %v1906_v28 }
 0x7db   : > { %v1890_v19 = vmul.f32 %v2856_v4, %v1889_v29 }
 0x7dc   : > { %v1917_v37 = vpack.c.bf16 %v1914_v18, %v1913_v17 }
 0x7dd   : > { %v1894_v20 = vsel %vm1893_vm0, %v2856_v4, %v1890_v19 }
 0x7de   : > { %2653 = vmatmul.msk.bf16.gmra.mxu0 %vm1284_vm5, %v1917_v37  ;;  %2656 = vmatmul.msk.bf16.gmra.mxu1 %vm1284_vm5, %v1917_v37  ;;  %v1899_v41 = vmul.f32 %v1894_v20, %v3410_v43  ;;  %v2756_v43 = vld [vmem:[%s3093_s6 + $0x10] sm:$0xff]  ;;  %s3656_s6 = sld [smem:[#allocation12_spill]] (!%p2722_p5) }
 0x7df   : > { %2189 = vmatpush.bf16.msrb.mxu2 %v2756_v43 }
 0x7e0   : > { %v1907_v24 = vmul.f32 %v3440_v39, %v1899_v41  ;;  %v1250_v39 = vld [vmem:[%s3087_s22] sm:$0x3] }
 0x7e1   : > { %v3484_v53 = vperm.slane %v1250_v39, 0  ;;  %v3486_v42 = vperm.slane %v1250_v39, 1 }
 0x7e2   : > { %v1915_v35 = vadd.f32 %v3448_v48, %v1907_v24 }
 0x7e3   : > { %2190 = vmatpush.bf16.msrb.mxu2 %v2755_v44 }
 0x7e4   : > { %v1918_v26 = vpack.c.bf16 %v1915_v35, %v1915_v35 }
 0x7e7   : > { %2191 = vmatpush.bf16.msrb.mxu2 %v2754_v33 }
 0x7ee   : > { %2654 = vmatmul.msk.bf16.gmra.mxu0 %vm1284_vm5, %v1918_v26  ;;  %2657 = vmatmul.msk.bf16.gmra.mxu1 %vm1284_vm5, %v1918_v26 }
 0x84b   : > { %v1982_v46 = vpop.f32.mrf.mxu0  ;;  %v2005_v47 = vpop.f32.mrf.mxu1 }
 0x84c   : > { %v1983_v48 = vadd.f32 %v1982_v46, %v3484_v53  ;;  %v3492_v25 = vadd.f32 %v2005_v47, %v3486_v42 }
 0x84e   : > { %v2019_v15 = vmul.f32 -1.702, %v1983_v48  ;;  %v2020_v49 = vmul.f32 -1.702, %v3492_v25 }
 0x850   : > { %v2029_v50 = vmul.f32 1.442695, %v2019_v15  ;;  %v2031_v22 = vmul.f32 1.442695, %v2020_v49 }
 0x852   : > { %2857 = vpow2.f32 %v2029_v50 }
 0x853   : > { %v1984_v8 = vpop.f32.mrf.mxu0  ;;  %v2007_v51 = vpop.f32.mrf.mxu1  ;;  %2859 = vpow2.f32 %v2031_v22 }
 0x854   : > { %v1985_v54 = vadd.f32 %v1984_v8, %v3484_v53  ;;  %v2008_v55 = vadd.f32 %v2007_v51, %v3486_v42 }
 0x856   : > { %v2021_v57 = vmul.f32 -1.702, %v1985_v54  ;;  %v2022_v23 = vmul.f32 -1.702, %v2008_v55 }
 0x858   : > { %v2033_v58 = vmul.f32 1.442695, %v2021_v57  ;;  %v2858_v60 = vpop.eup %2857  ;;  %v2035_v34 = vmul.f32 1.442695, %v2022_v23 }
 0x859   : > { %v2860_v61 = vpop.eup %2859  ;;  %v2049_v0 = vadd.f32 1.0, %v2858_v60 }
 0x85a   : > { %2861 = vpow2.f32 %v2033_v58  ;;  %v2050_v4 = vadd.f32 1.0, %v2860_v61 }
 0x85b   : > { %v1987_v62 = vpop.f32.mrf.mxu0  ;;  %v2010_v52 = vpop.f32.mrf.mxu1  ;;  %2863 = vpow2.f32 %v2035_v34 }
 0x85c   : > { %v3500_v1 = vadd.f32 %v1987_v62, %v3484_v53  ;;  %v3503_v2 = vadd.f32 %v2010_v52, %v3486_v42  ;;  %2865 = vrcp.f32 %v2049_v0 }
 0x85d   : > { %2867 = vrcp.f32 %v2050_v4 }
 0x85e   : > { %v2023_v5 = vmul.f32 -1.702, %v3500_v1  ;;  %v2024_v6 = vmul.f32 -1.702, %v3503_v2 }
 0x860   : > { %v2862_v56 = vpop.eup %2861  ;;  %v2037_v21 = vmul.f32 1.442695, %v2023_v5  ;;  %v2039_v9 = vmul.f32 1.442695, %v2024_v6 }
 0x861   : > { %v2051_v10 = vadd.f32 1.0, %v2862_v56  ;;  %v2864_v27 = vpop.eup %2863 }
 0x862   : > { %2869 = vpow2.f32 %v2037_v21  ;;  %v2052_v14 = vadd.f32 1.0, %v2864_v27  ;;  %v2866_v17 = vpop.eup %2865 }
 0x863   : > { %2871 = vrcp.f32 %v2051_v10  ;;  %v1989_v12 = vpop.f32.mrf.mxu0  ;;  %v2012_v13 = vpop.f32.mrf.mxu1  ;;  %v2069_v30 = vmul.f32 %v2866_v17, %v1983_v48 }
 0x864   : > { %2873 = vpow2.f32 %v2039_v9  ;;  %v1990_v28 = vadd.f32 %v1989_v12, %v3484_v53  ;;  %v2013_v29 = vadd.f32 %v2012_v13, %v3486_v42  ;;  %v2868_v37 = vpop.eup %2867 }
 0x865   : > { %2875 = vrcp.f32 %v2052_v14  ;;  %v2070_v46 = vmul.f32 %v2868_v37, %v3492_v25 }
 0x866   : > { %v2025_v18 = vmul.f32 -1.702, %v1990_v28  ;;  %v2026_v19 = vmul.f32 -1.702, %v2013_v29 }
 0x868   : > { %v2870_v20 = vpop.eup %2869  ;;  %v2041_v41 = vmul.f32 1.442695, %v2025_v18  ;;  %v2043_v24 = vmul.f32 1.442695, %v2026_v19 }
 0x869   : > { %v2872_v35 = vpop.eup %2871  ;;  %v2053_v32 = vadd.f32 1.0, %v2870_v20 }
 0x86a   : > { %v2874_v26 = vpop.eup %2873  ;;  %v2071_v31 = vmul.f32 %v2872_v35, %v1985_v54  ;;  %2877 = vpow2.f32 %v2041_v41 }
 0x86b   : > { %v1992_v36 = vpop.f32.mrf.mxu0  ;;  %v2015_v43 = vpop.f32.mrf.mxu1  ;;  %2879 = vpow2.f32 %v2043_v24  ;;  %v2054_v33 = vadd.f32 1.0, %v2874_v26 }
 0x86c   : > { %v2876_v38 = vpop.eup %2875  ;;  %v1993_v39 = vadd.f32 %v1992_v36, %v3484_v53  ;;  %v2016_v44 = vadd.f32 %v2015_v43, %v3486_v42  ;;  %v2079_v45 = vpack.c.bf16 %v2071_v31, %v2069_v30  ;;  %2881 = vrcp.f32 %v2053_v32 }
 0x86d   : > { %v2072_v47 = vmul.f32 %v2876_v38, %v2008_v55  ;;  %2883 = vrcp.f32 %v2054_v33 }
 0x86e   : > { %v2027_v40 = vmul.f32 -1.702, %v1993_v39  ;;  %v2028_v15 = vmul.f32 -1.702, %v2016_v44  ;;  %2192 = vmatmul.bf16.vlgmr.msrb.gmra.mxu2 %v2079_v45 }
 0x86f   : > { %v2080_v48 = vpack.c.bf16 %v2072_v47, %v2070_v46 }
 0x870   : > { %v2878_v49 = vpop.eup %2877  ;;  %v2045_v50 = vmul.f32 1.442695, %v2027_v40  ;;  %v2047_v22 = vmul.f32 1.442695, %v2028_v15 }
 0x871   : > { %v2055_v8 = vadd.f32 1.0, %v2878_v49  ;;  %2215 = vmatmul.bf16.vlgmr.msra.gmra.mxu3 %v2080_v48  ;;  %v2880_v51 = vpop.eup %2879 }
 0x872   : > { %2885 = vpow2.f32 %v2045_v50  ;;  %v2056_v53 = vadd.f32 1.0, %v2880_v51  ;;  %v2882_v25 = vpop.eup %2881 }
 0x873   : > { %2887 = vrcp.f32 %v2055_v8  ;;  %v1994_v42 = vpop.f32.mrf.mxu0  ;;  %v2017_v54 = vpop.f32.mrf.mxu1  ;;  %v2073_v60 = vmul.f32 %v2882_v25, %v3500_v1 }
 0x874   : > { %2889 = vpow2.f32 %v2047_v22  ;;  %v2884_v55 = vpop.eup %2883 }
 0x875   : > { %2891 = vrcp.f32 %v2056_v53  ;;  %v2074_v52 = vmul.f32 %v2884_v55, %v3503_v2  ;;  %v2814_v2 = vld [vmem:[%s765_s7] ss:$0 sm:$0xff] }
 0x878   : > { %v2886_v57 = vpop.eup %2885 }
 0x879   : > { %v2888_v23 = vpop.eup %2887  ;;  %v2057_v62 = vadd.f32 1.0, %v2886_v57 }
 0x87a   : > { %v2890_v58 = vpop.eup %2889  ;;  %v2075_v34 = vmul.f32 %v2888_v23, %v1990_v28 }
 0x87b   : > { %v2892_v61 = vpop.eup %2891  ;;  %v2058_v5 = vadd.f32 1.0, %v2890_v58  ;;  %2893 = vrcp.f32 %v2057_v62 }
 0x87c   : > { %v2076_v0 = vmul.f32 %v2892_v61, %v2013_v29  ;;  %v2081_v4 = vpack.c.bf16 %v2075_v34, %v2073_v60 }
 0x87d   : > { %2895 = vrcp.f32 %v2058_v5 }
 0x87e   : > { %2197 = vmatmul.bf16.gmra.mxu2 %v2081_v4  ;;  %v2082_v6 = vpack.c.bf16 %v2076_v0, %v2074_v52 }
 0x881   : > { %2220 = vmatmul.bf16.gmra.mxu3 %v2082_v6  ;;  %v2894_v56 = vpop.eup %2893 }
 0x882   : > { %v2077_v9 = vmul.f32 %v2894_v56, %v1993_v39 }
 0x883   : > { %v2896_v21 = vpop.eup %2895 }
 0x884   : > { %v2078_v10 = vmul.f32 %v2896_v21, %v2016_v44  ;;  %v2083_v27 = vpack.c.bf16 %v2077_v9, %v2077_v9 }
 0x886   : > { %v2084_v1 = vpack.c.bf16 %v2078_v10, %v2078_v10 }
 0x88e   : > { %2202 = vmatmul.bf16.gmra.mxu2 %v2083_v27 }
 0x891   : > { %2225 = vmatmul.bf16.gmra.mxu3 %v2084_v1 }
 0x8f1   : > { %v2193_v12 = vpop.f32.mrf.mxu2 }
 0x8f2   : > { %v2194_v13 = vadd.f32 %v2814_v2, %v2193_v12 }
 0x8f4   : > { %v2216_v14 = vpop.f32.mrf.mxu3 }
 0x8f5   : > { %v2217_v28 = vadd.f32 %v2216_v14, %v2194_v13 }
 0x8f7   : > { %v2230_v29 = vadd.f32 %v2217_v28, %v3360_v59 }
 0x8f9   : > { %2235 = vst.msk [vmem:[#allocation2] sm:$0xff] %vm1284_vm5, %v2230_v29  ;;  %v2195_v17 = vpop.f32.mrf.mxu2 }
 0x8fa   : > { %v2196_v18 = vadd.f32 %v2814_v2, %v2195_v17 }
 0x8fc   : > { %v2218_v19 = vpop.f32.mrf.mxu3 }
 0x8fd   : > { %v2219_v37 = vadd.f32 %v2218_v19, %v2196_v18 }
 0x8ff   : > { %v2231_v20 = vadd.f32 %v2219_v37, %v3364_v63 }
 0x901   : > { %2236 = vst.msk [vmem:[#allocation2 + $0x8] sm:$0xff] %vm1284_vm5, %v2231_v20  ;;  %v2198_v41 = vpop.f32.mrf.mxu2 }
 0x902   : > { %v2199_v24 = vadd.f32 %v2814_v2, %v2198_v41 }
 0x904   : > { %v2221_v35 = vpop.f32.mrf.mxu3 }
 0x905   : > { %v2222_v26 = vadd.f32 %v2221_v35, %v2199_v24 }
 0x907   : > { %v2232_v30 = vadd.f32 %v2222_v26, %v3368_v3 }
 0x909   : > { %2237 = vst.msk [vmem:[#allocation2 + $0x10] sm:$0xff] %vm1284_vm5, %v2232_v30  ;;  %v2200_v31 = vpop.f32.mrf.mxu2 }
 0x90a   : > { %v2201_v59 = vadd.f32 %v2814_v2, %v2200_v31 }
 0x90c   : > { %v2223_v32 = vpop.f32.mrf.mxu3 }
 0x90d   : > { %v2224_v36 = vadd.f32 %v2223_v32, %v2201_v59 }
 0x90f   : > { %v2233_v43 = vadd.f32 %v2224_v36, %v3372_v7 }
 0x911   : > { %2238 = vst.msk [vmem:[#allocation2 + $0x18] sm:$0xff] %vm1284_vm5, %v2233_v43  ;;  %v2203_v38 = vpop.f32.mrf.mxu2 }
 0x912   : > { %v2204_v63 = vadd.f32 %v2814_v2, %v2203_v38 }
 0x914   : > { %v2226_v39 = vpop.f32.mrf.mxu3 }
 0x915   : > { %v2227_v44 = vadd.f32 %v2226_v39, %v2204_v63 }
 0x917   : > { %v2234_v45 = vadd.f32 %v2227_v44, %v3376_v11 }
 0x918   : > { %2243 = sbr.rel (%p2722_p5) target bundleno = 2618 (0xa3a), region = 104 }
 0x919   : > { %2239 = vst.msk [vmem:[#allocation2 + $0x20] sm:$0x3] %vm1297_vm6, %v2234_v45  ;;  %v2205_v46 = vpop.f32.mrf.mxu2 }
 0x91c   : > { %v2228_v3 = vpop.f32.mrf.mxu3 }
 0x91d   : > { %v2252_v47 = vsel %vm1284_vm5, %v2232_v30, 0.0  ;;  %v2246_v33 = vsel %vm1284_vm5, %v2230_v29, 0.0  ;;  %v2258_v7 = vsel %vm1297_vm6, %v2234_v45, 0.0  ;;  %v2255_v40 = vsel %vm1284_vm5, %v2233_v43, 0.0  ;;  %v2902_v44 = vld [vmem:[%s3656_s6] ss:$0 sm:$0xff] }
 0x91e   : > { %2253 = vadd.xlane.f32.xlu1 %v2252_v47  ;;  %2247 = vadd.xlane.f32.xlu0 %v2246_v33  ;;  %v2249_v11 = vsel %vm1284_vm5, %v2231_v20, 0.0  ;;  %v2903_v33 = vld [vmem:[%s3657_s19] ss:$0 sm:$0xff] }
 0x91f   : > { %2259 = vadd.xlane.f32.xlu2 %v2258_v7 }
 0x926   : > { %2256 = vadd.xlane.f32.xlu1 %v2255_v40  ;;  %2250 = vadd.xlane.f32.xlu0 %v2249_v11 }
 0x991   : > { %v2254_v15 = vpop.xlane.xlu1 %2253  ;;  %v2248_v48 = vpop.xlane.xlu0 %2247 }
 0x992   : > { %v2263_v49 = vmul.f32 %v2254_v15, %v3184_v16  ;;  %v2261_v50 = vmul.f32 %v2248_v48, %v3184_v16  ;;  %v2260_v42 = vpop.xlane.xlu2 %2259 }
 0x993   : > { %v2265_v60 = vmul.f32 %v2260_v42, %v3184_v16 }
 0x994   : > { %v3537_v22 = vsub.f32 %v2232_v30, %v2263_v49  ;;  %v3539_v8 = vsub.f32 %v2230_v29, %v2261_v50 }
 0x995   : > { %v3554_v62 = vsub.f32 %v2234_v45, %v2265_v60 }
 0x996   : > { %v2273_v51 = vmul.f32 %v3537_v22, %v3537_v22  ;;  %v2271_v53 = vmul.f32 %v3539_v8, %v3539_v8 }
 0x997   : > { %v2275_v6 = vmul.f32 %v3554_v62, %v3554_v62 }
 0x998   : > { %v2282_v54 = vsel %vm1284_vm5, %v2273_v51, 0.0  ;;  %v2276_v25 = vsel %vm1284_vm5, %v2271_v53, 0.0 }
 0x999   : > { %2283 = vadd.xlane.f32.xlu1 %v2282_v54  ;;  %v2257_v55 = vpop.xlane.xlu1 %2256  ;;  %2277 = vadd.xlane.f32.xlu2 %v2276_v25  ;;  %v2251_v57 = vpop.xlane.xlu0 %2250  ;;  %v2288_v56 = vsel %vm1297_vm6, %v2275_v6, 0.0 }
 0x99a   : > { %v2264_v23 = vmul.f32 %v2257_v55, %v3184_v16  ;;  %v2262_v58 = vmul.f32 %v2251_v57, %v3184_v16 }
 0x99c   : > { %v3550_v34 = vsub.f32 %v2233_v43, %v2264_v23  ;;  %v3552_v61 = vsub.f32 %v2231_v20, %v2262_v58 }
 0x99e   : > { %v2274_v52 = vmul.f32 %v3550_v34, %v3550_v34  ;;  %v2272_v0 = vmul.f32 %v3552_v61, %v3552_v61 }
 0x9a0   : > { %v2285_v4 = vsel %vm1284_vm5, %v2274_v52, 0.0  ;;  %v2279_v5 = vsel %vm1284_vm5, %v2272_v0, 0.0 }
 0x9a1   : > { %2286 = vadd.xlane.f32.xlu2 %v2285_v4  ;;  %2280 = vadd.xlane.f32.xlu0 %v2279_v5 }
 0x9a9   : > { %2289 = vadd.xlane.f32.xlu0 %v2288_v56 }
 0xa0c   : > { %v2284_v21 = vpop.xlane.xlu1 %2283  ;;  %v2278_v9 = vpop.xlane.xlu2 %2277 }
 0xa0d   : > { %v2293_v10 = vmul.f32 %v2284_v21, %v3184_v16  ;;  %v2291_v27 = vmul.f32 %v2278_v9, %v3184_v16 }
 0xa0f   : > { %v2298_v1 = vadd.f32 1e-05, %v2293_v10  ;;  %v2296_v2 = vadd.f32 1e-05, %v2291_v27 }
 0xa11   : > { %2904 = vrsqrt.f32 %v2298_v1  ;;  %vm2327_vm4 = vweird.f32 %v2298_v1  ;;  %vm2307_vm8 = vweird.f32 %v2296_v2 }
 0xa12   : > { %2906 = vrsqrt.f32 %v2296_v2 }
 0xa14   : > { %v2287_v12 = vpop.xlane.xlu2 %2286  ;;  %v2281_v13 = vpop.xlane.xlu0 %2280 }
 0xa15   : > { %v2294_v14 = vmul.f32 %v2287_v12, %v3184_v16  ;;  %v2292_v28 = vmul.f32 %v2281_v13, %v3184_v16 }
 0xa17   : > { %v2905_v29 = vpop.eup %2904  ;;  %v2299_v17 = vadd.f32 1e-05, %v2294_v14  ;;  %v2297_v18 = vadd.f32 1e-05, %v2292_v28 }
 0xa18   : > { %v2907_v19 = vpop.eup %2906  ;;  %v2322_v37 = vmul.f32 %v2905_v29, %v2298_v1  ;;  %vm2328_vm1 = vweird.f32 %v2905_v29 }
 0xa19   : > { %v2302_v20 = vmul.f32 %v2907_v19, %v2296_v2  ;;  %2908 = vrsqrt.f32 %v2299_v17  ;;  %vm2308_vm2 = vweird.f32 %v2907_v19  ;;  %vm2329_vm7 = vmor %vm2327_vm4, %vm2328_vm1  ;;  %vm2337_vm10 = vweird.f32 %v2299_v17 }
 0xa1a   : > { %v2323_v41 = vmul.f32 %v2905_v29, %v2322_v37  ;;  %2910 = vrsqrt.f32 %v2297_v18  ;;  %vm2309_vm9 = vmor %vm2307_vm8, %vm2308_vm2  ;;  %vm2317_vm14 = vweird.f32 %v2297_v18 }
 0xa1b   : > { %v2303_v24 = vmul.f32 %v2907_v19, %v2302_v20 }
 0xa1c   : > { %v2324_v35 = vmul.f32 0.5, %v2323_v41  ;;  %v2290_v26 = vpop.xlane.xlu0 %2289 }
 0xa1d   : > { %v2304_v30 = vmul.f32 0.5, %v2303_v24  ;;  %v2295_v31 = vmul.f32 %v2290_v26, %v3184_v16 }
 0xa1e   : > { %v2325_v59 = vsub.f32 1.5, %v2324_v35 }
 0xa1f   : > { %v2909_v32 = vpop.eup %2908  ;;  %v2305_v36 = vsub.f32 1.5, %v2304_v30  ;;  %v2300_v43 = vadd.f32 1e-05, %v2295_v31 }
 0xa20   : > { %v2911_v38 = vpop.eup %2910  ;;  %v2326_v63 = vmul.f32 %v2905_v29, %v2325_v59  ;;  %v2332_v39 = vmul.f32 %v2909_v32, %v2299_v17  ;;  %vm2338_vm11 = vweird.f32 %v2909_v32 }
 0xa21   : > { %v2306_v45 = vmul.f32 %v2907_v19, %v2305_v36  ;;  %v2312_v46 = vmul.f32 %v2911_v38, %v2297_v18  ;;  %2912 = vrsqrt.f32 %v2300_v43  ;;  %vm2318_vm12 = vweird.f32 %v2911_v38  ;;  %vm2339_vm13 = vmor %vm2337_vm10, %vm2338_vm11 }
 0xa22   : > { %v2330_v16 = vsel %vm2329_vm7, %v2905_v29, %v2326_v63  ;;  %v2333_v3 = vmul.f32 %v2909_v32, %v2332_v39  ;;  %vm2319_vm15 = vmor %vm2317_vm14, %vm2318_vm12  ;;  %vm2347_vm0 = vweird.f32 %v2300_v43 }
 0xa23   : > { %v2353_v47 = vmul.f32 %v2330_v16, %v3537_v22  ;;  %v2310_v7 = vsel %vm2309_vm9, %v2907_v19, %v2306_v45  ;;  %v2313_v40 = vmul.f32 %v2911_v38, %v2312_v46 }
 0xa24   : > { %v2351_v11 = vmul.f32 %v2310_v7, %v3539_v8  ;;  %v2334_v15 = vmul.f32 0.5, %v2333_v3 }
 0xa25   : > { %v2361_v48 = vmul.f32 %v2902_v44, %v2353_v47  ;;  %v2314_v49 = vmul.f32 0.5, %v2313_v40 }
 0xa26   : > { %v2359_v50 = vmul.f32 %v2902_v44, %v2351_v11  ;;  %v2335_v51 = vsub.f32 1.5, %v2334_v15 }
 0xa27   : > { %v2913_v53 = vpop.eup %2912  ;;  %v2369_v42 = vadd.f32 %v2903_v33, %v2361_v48  ;;  %v2315_v54 = vsub.f32 1.5, %v2314_v49 }
 0xa28   : > { %v2367_v22 = vadd.f32 %v2903_v33, %v2359_v50  ;;  %v2336_v25 = vmul.f32 %v2909_v32, %v2335_v51  ;;  %v2342_v55 = vmul.f32 %v2913_v53, %v2300_v43  ;;  %vm2348_vm3 = vweird.f32 %v2913_v53 }
 0xa29   : > { %2374 = vst.msk [vmem:[%s3658_s2 + $0x10] sm:$0xff] %vm1284_vm5, %v2369_v42  ;;  %v2316_v8 = vmul.f32 %v2911_v38, %v2315_v54  ;;  %vm2349_vm4 = vmor %vm2347_vm0, %vm2348_vm3 }
 0xa2a   : > { %2372 = vst.msk [vmem:[%s3658_s2] sm:$0xff] %vm1284_vm5, %v2367_v22  ;;  %v2340_v57 = vsel %vm2339_vm13, %v2909_v32, %v2336_v25  ;;  %v2343_v23 = vmul.f32 %v2913_v53, %v2342_v55 }
 0xa2b   : > { %v2354_v58 = vmul.f32 %v2340_v57, %v3550_v34  ;;  %v2320_v60 = vsel %vm2319_vm15, %v2911_v38, %v2316_v8 }
 0xa2c   : > { %v2352_v52 = vmul.f32 %v2320_v60, %v3552_v61  ;;  %v2344_v0 = vmul.f32 0.5, %v2343_v23 }
 0xa2d   : > { %v2362_v4 = vmul.f32 %v2902_v44, %v2354_v58 }
 0xa2e   : > { %v2360_v5 = vmul.f32 %v2902_v44, %v2352_v52  ;;  %v2345_v6 = vsub.f32 1.5, %v2344_v0 }
 0xa2f   : > { %v2370_v56 = vadd.f32 %v2903_v33, %v2362_v4 }
 0xa30   : > { %v2368_v21 = vadd.f32 %v2903_v33, %v2360_v5  ;;  %v2346_v9 = vmul.f32 %v2913_v53, %v2345_v6 }
 0xa31   : > { %2375 = vst.msk [vmem:[%s3658_s2 + $0x18] sm:$0xff] %vm1284_vm5, %v2370_v56 }
 0xa32   : > { %2373 = vst.msk [vmem:[%s3658_s2 + $0x8] sm:$0xff] %vm1284_vm5, %v2368_v21  ;;  %v2350_v34 = vsel %vm2349_vm4, %v2913_v53, %v2346_v9 }
 0xa33   : > { %v2355_v61 = vmul.f32 %v2350_v34, %v3554_v62 }
 0xa35   : > { %v2363_v10 = vmul.f32 %v2902_v44, %v2355_v61 }
 0xa37   : > { %v2371_v27 = vadd.f32 %v2903_v33, %v2363_v10 }
 0xa39   : > { %2376 = vst.msk [vmem:[%s3658_s2 + $0x20] sm:$0x3] %vm1297_vm6, %v2371_v27 }
 0xa3a PF: > { %s3659_s29 = sld [smem:[#allocation3_spill]] }
 0xa40   : > { %s29_s0 = sadd.s32 1, %s3659_s29  }
 0xa41   : > { %p26_p6 = scmp.ge.s32.totalorder %s29_s0, 4  }
 0xa43   :  { %28 = sbr.rel (!%p26_p6) target bundleno = 11 (0xb), region = 163 }

// kernel: clip_forward.3
= control target key start
LH: loop header
LB: loop body
LE: loop exit
PB: predicated region body
PF: predicated region fallthrough
CT: control target
= control target key end

     0   :  { %s2242_s18 = smov 0   ;;  %s2562_s0 = inlined_call_operand.vmem [shape: f32[16,64], index: 0, kind: input, shape index: {}]   ;;  %s2563_s1 = inlined_call_operand.vmem [shape: f32[2,1,64], index: 1, kind: input, shape index: {}]   ;;  %s2564_s2 = inlined_call_operand.vmem [shape: f32[2,1,64], index: 2, kind: input, shape index: {}]   ;;  %s2565_s3 = inlined_call_operand.vmem [shape: bf16[2,64,192], index: 3, kind: input, shape index: {}]   ;;  %s2566_s4 = inlined_call_operand.vmem [shape: f32[2,1,192], index: 4, kind: input, shape index: {}]   ;;  %s2567_s5 = inlined_call_operand.vmem [shape: bf16[2,64,64], index: 5, kind: input, shape index: {}]   ;;  %s2568_s6 = inlined_call_operand.vmem [shape: f32[2,1,64], index: 6, kind: input, shape index: {}]   ;;  %s2569_s7 = inlined_call_operand.vmem [shape: f32[2,1,64], index: 7, kind: input, shape index: {}]   ;;  %s2570_s8 = inlined_call_operand.vmem [shape: f32[2,1,64], index: 8, kind: input, shape index: {}]   ;;  %s2571_s9 = inlined_call_operand.vmem [shape: bf16[2,64,256], index: 9, kind: input, shape index: {}]   ;;  %s2572_s10 = inlined_call_operand.vmem [shape: f32[2,1,256], index: 10, kind: input, shape index: {}]   ;;  %s2573_s11 = inlined_call_operand.vmem [shape: bf16[2,256,64], index: 11, kind: input, shape index: {}]   ;;  %s2574_s12 = inlined_call_operand.vmem [shape: f32[2,1,64], index: 12, kind: input, shape index: {}]   ;;  %s2575_s13 = inlined_call_operand.vmem [shape: f32[1,64], index: 13, kind: input, shape index: {}]   ;;  %s2576_s14 = inlined_call_operand.vmem [shape: f32[1,64], index: 14, kind: input, shape index: {}]   ;;  %s2577_s15 = inlined_call_operand.vmem [shape: f32[16,64], index: 15, kind: output, shape index: {}]  }
   0x1   :  { %2580 = sst [smem:[#allocation4_spill]] %s2563_s1 }
   0x2   :  { %2581 = sst [smem:[#allocation5_spill]] %s2564_s2 }
   0x3   :  { %2582 = sst [smem:[#allocation6_spill]] %s2565_s3 }
   0x4   :  { %2583 = sst [smem:[#allocation7_spill]] %s2566_s4 }
   0x5   :  { %2584 = sst [smem:[#allocation8_spill]] %s2575_s13 }
   0x6   :  { %2585 = sst [smem:[#allocation9_spill]] %s2576_s14 }
   0x7   :  { %2586 = sst [smem:[#allocation10_spill]] %s2577_s15 }
   0x8 LB: > { %2587 = sst [smem:[#allocation3_spill]] %s2151_s18  ;;  %s2248_s19 = sadd.s32 4294967295, %s2151_s18   ;;  %s2151_s18 = sphi %s2242_s18, %s25_s18  }
   0x9   : > { %p1831_p0 = scmp.ge.s32.totalorder %s2151_s18, 1  ;;  %p528_p1 = scmp.lt.s32.totalorder %s2151_s18, 3 }
   0xb   : > { %p529_p2 = pnand %p1831_p0, %p528_p1 }
   0xc   : > { %p612_p3 = scmp.lt.s32.totalorder (!%p529_p2), %s2248_s19, 1  ;;  %s2590_s3 = sld [smem:[#allocation6_spill]] (!%p529_p2) }
   0xd   : > { %532 = sbr.rel (%p529_p2) target bundleno = 2351 (0x92f), region = 80  ;;  %s2591_s4 = sld [smem:[#allocation7_spill]] (!%p529_p2) }
   0xe   : > { %p1842_p4 = scmp.ne.s32.totalorder (!%p529_p2), %s2248_s19, 0 }
  0x12   : > { %s2254_s20 = scalar_select %p612_p3, %s2248_s19, 1 }
  0x14   : > { %s2003_s27 = sshll.u32 %s2254_s20, 6  ;;  %s1834_s28 = sshll.u32 %s2254_s20, 1 }
  0x15   : > { %s2269_s16 = scalar_lea.vmem %s2590_s3, %s2003_s27  ;;  %s2274_s22 = scalar_lea.vmem %s2591_s4, %s1834_s28 }
  0x16   : > { %s2004_s18 = sshll.u32 %s2254_s20, 5  ;;  %s640_s17 = scalar_lea.vmem %s2570_s8, %s2254_s20 }
  0x17   : > { %s2284_s25 = scalar_lea.vmem %s2567_s5, %s2004_s18  ;;  %s2297_s1 = scalar_lea.vmem %s2571_s9, %s2003_s27 }
  0x18   : > { %s2302_s23 = scalar_lea.vmem %s2572_s10, %s1834_s28  ;;  %s2006_s13 = sshll.u32 %s2254_s20, 7 }
  0x19   : > { %s2308_s2 = scalar_lea.vmem %s2573_s11, %s2006_s13  ;;  %s657_s3 = scalar_lea.vmem %s2574_s12, %s2254_s20 }
  0x1a   : > { %662 = sbr.rel (%p1842_p4) target bundleno = 34 (0x22), region = 84 }
  0x1f   : > { %v663_v0 = vld [vmem:[%s2562_s0] sm:$0xff]  ;;  %vm665_vm0 = vcmask 523264   ;;  %v664_v1 = vld [vmem:[%s2562_s0 + $0x8] sm:$0xff] }
  0x20   : > { %666 = vst.msk [vmem:[#allocation2] sm:$0xff] %vm665_vm0, %v663_v0 }
  0x21   : > { %667 = vst.msk [vmem:[#allocation2 + $0x8] sm:$0xff] %vm665_vm0, %v664_v1 }
  0x22 PF: > { %vm783_vm1 = vcmask 523264   ;;  %v2153_v6 = vmov 64.0   ;;  %v1869_v23 = vld [vmem:[%s2269_s16 + $0x30] sm:$0xf]  ;;  %v2014_v24 = vld [vmem:[%s2269_s16 + $0x34] sm:$0xf0]  ;;  %s2597_s15 = scalar_lea.vmem %s2569_s7, %s2254_s20 }
  0x23   : > { %2081 = vrcp.f32 %v2153_v6  ;;  %v1870_v25 = vor.u32 %v2014_v24, %v1869_v23  ;;  %v1861_v26 = vld [vmem:[%s2269_s16 + $0x20] sm:$0xf]  ;;  %v2012_v27 = vld [vmem:[%s2269_s16 + $0x24] sm:$0xf0]  ;;  %v1853_v29 = vld [vmem:[%s2269_s16 + $0x10] sm:$0xf] }
  0x24   : > { %v1862_v28 = vor.u32 %v2012_v27, %v1861_v26  ;;  %v2010_v30 = vld [vmem:[%s2269_s16 + $0x14] sm:$0xf0]  ;;  %v1845_v32 = vld [vmem:[%s2269_s16] sm:$0xf]  ;;  %v2008_v33 = vld [vmem:[%s2269_s16 + $0x4] sm:$0xf0] }
  0x25   : > { %898 = vmatpush.bf16.msra.mxu1 %v1870_v25  ;;  %v1854_v31 = vor.u32 %v2010_v30, %v1853_v29  ;;  %v1846_v35 = vor.u32 %v2008_v33, %v1845_v32  ;;  %v2013_v38 = vld [vmem:[%s2269_s16 + $0x34] sm:$0xf]  ;;  %v1871_v39 = vld [vmem:[%s2269_s16 + $0x38] sm:$0xf0]  ;;  %v2011_v41 = vld [vmem:[%s2269_s16 + $0x24] sm:$0xf] }
  0x26   : > { %v1874_v40 = vor.u32 %v2013_v38, %v1871_v39  ;;  %v1863_v42 = vld [vmem:[%s2269_s16 + $0x28] sm:$0xf0]  ;;  %v2009_v46 = vld [vmem:[%s2269_s16 + $0x14] sm:$0xf]  ;;  %v1855_v47 = vld [vmem:[%s2269_s16 + $0x18] sm:$0xf0] }
  0x27   : > { %v2321_v2 = vld [vmem:[#allocation2] sm:$0xff]  ;;  %v1866_v44 = vor.u32 %v2011_v41, %v1863_v42  ;;  %v1858_v51 = vor.u32 %v2009_v46, %v1855_v47  ;;  %v1847_v53 = vld [vmem:[%s2269_s16 + $0x8] sm:$0xf0]  ;;  %s2592_s21 = sld [smem:[#allocation4_spill]]  ;;  %s2154_s26 = smov 96   ;;  %vm959_vm9 = vcmask 130048  }
  0x28   : > { %v784_v3 = vsel %vm783_vm1, %v2321_v2, 0.0  ;;  %v2325_v4 = vld [vmem:[#allocation2 + $0x8] sm:$0xff]  ;;  %v2007_v52 = vld [vmem:[%s2269_s16 + $0x4] sm:$0xf]  ;;  %s2594_s18 = sld [smem:[#allocation5_spill]]  ;;  %s2155_s4 = smov 112  }
  0x29   : > { %785 = vadd.xlane.f32.xlu0 %v784_v3  ;;  %v787_v5 = vsel %vm783_vm1, %v2325_v4, 0.0  ;;  %v2082_v7 = vpop.eup %2081  ;;  %899 = vmatpush.bf16.msra.mxu1 %v1862_v28  ;;  %v1850_v56 = vor.u32 %v2007_v52, %v1847_v53  ;;  %s2157_s27 = smov 64   ;;  %s2159_s28 = smov 16   ;;  %vm1281_vm0 = vcmask 261120  }
  0x2a   : > { %v791_v8 = vmul.f32 64.0, %v2082_v7  ;;  %vm795_vm2 = vweird.f32 %v2082_v7  ;;  %s2160_s30 = smov 32   ;;  %s2161_s16 = smov 48  }
  0x2b   : > { %p2000_p5 = scmp.ne.s32.totalorder %s2248_s19, 1 }
  0x2c   : > { %v792_v9 = vsub.f32 1.0, %v791_v8 }
  0x2d   : > { %900 = vmatpush.bf16.msra.mxu1 %v1854_v31  ;;  %s2593_s14 = scalar_lea.vmem %s2592_s21, %s2254_s20  ;;  %s2596_s21 = scalar_lea.vmem %s2568_s6, %s2254_s20 }
  0x2e   : > { %v793_v10 = vmul.f32 %v2082_v7, %v792_v9  ;;  %v2075_v3 = vld [vmem:[%s2593_s14] ss:$0 sm:$0xff]  ;;  %s2595_s24 = scalar_lea.vmem %s2594_s18, %s2254_s20 }
  0x2f   : > { %v2076_v9 = vld [vmem:[%s2595_s24] ss:$0 sm:$0xff] }
  0x30   : > { %v794_v11 = vadd.f32 %v2082_v7, %v793_v10 }
  0x31   : > { %788 = vadd.xlane.f32.xlu0 %v787_v5  ;;  %901 = vmatpush.bf16.msra.mxu1 %v1846_v35 }
  0x32   : > { %v2329_v12 = vsel %vm795_vm2, %v2082_v7, %v794_v11  ;;  %vm1284_vm2 = vcmask 392192  }
  0x35   : > { %912 = vmatpush.bf16.msrb.mxu1 %v1874_v40 }
  0x39   : > { %913 = vmatpush.bf16.msrb.mxu1 %v1866_v44 }
  0x3d   : > { %914 = vmatpush.bf16.msrb.mxu1 %v1858_v51 }
  0x41   : > { %915 = vmatpush.bf16.msrb.mxu1 %v1850_v56 }
  0x9c   : > { %v786_v13 = vpop.xlane.xlu0 %785 }
  0x9d   : > { %v797_v14 = vmul.f32 %v2329_v12, %v786_v13 }
  0x9f   : > { %v2333_v15 = vsub.f32 %v2321_v2, %v797_v14 }
  0xa1   : > { %v801_v16 = vmul.f32 %v2333_v15, %v2333_v15 }
  0xa3   : > { %v803_v17 = vsel %vm783_vm1, %v801_v16, 0.0 }
  0xa4   : > { %804 = vadd.xlane.f32.xlu1 %v803_v17  ;;  %v789_v18 = vpop.xlane.xlu0 %788 }
  0xa5   : > { %v798_v19 = vmul.f32 %v2329_v12, %v789_v18 }
  0xa7   : > { %v2340_v20 = vsub.f32 %v2325_v4, %v798_v19 }
  0xa9   : > { %v802_v21 = vmul.f32 %v2340_v20, %v2340_v20 }
  0xab   : > { %v806_v22 = vsel %vm783_vm1, %v802_v21, 0.0 }
  0xac   : > { %807 = vadd.xlane.f32.xlu1 %v806_v22 }
 0x117   : > { %v805_v34 = vpop.xlane.xlu1 %804 }
 0x118   : > { %v809_v36 = vmul.f32 %v805_v34, %v2329_v12 }
 0x11a   : > { %v811_v37 = vadd.f32 1e-05, %v809_v36 }
 0x11c   : > { %2083 = vrsqrt.f32 %v811_v37  ;;  %vm819_vm4 = vweird.f32 %v811_v37 }
 0x11f   : > { %v808_v43 = vpop.xlane.xlu1 %807 }
 0x120   : > { %v810_v45 = vmul.f32 %v808_v43, %v2329_v12 }
 0x122   : > { %v2084_v48 = vpop.eup %2083  ;;  %v812_v49 = vadd.f32 1e-05, %v810_v45 }
 0x123   : > { %v814_v50 = vmul.f32 %v2084_v48, %v811_v37  ;;  %vm820_vm3 = vweird.f32 %v2084_v48 }
 0x124   : > { %2085 = vrsqrt.f32 %v812_v49  ;;  %vm821_vm5 = vmor %vm819_vm4, %vm820_vm3  ;;  %vm829_vm7 = vweird.f32 %v812_v49 }
 0x125   : > { %v815_v54 = vmul.f32 %v2084_v48, %v814_v50 }
 0x127   : > { %v816_v55 = vmul.f32 0.5, %v815_v54 }
 0x129   : > { %v817_v57 = vsub.f32 1.5, %v816_v55 }
 0x12a   : > { %v2086_v58 = vpop.eup %2085 }
 0x12b   : > { %v818_v59 = vmul.f32 %v2084_v48, %v817_v57  ;;  %v824_v60 = vmul.f32 %v2086_v58, %v812_v49  ;;  %vm830_vm6 = vweird.f32 %v2086_v58 }
 0x12c   : > { %vm831_vm8 = vmor %vm829_vm7, %vm830_vm6 }
 0x12d   : > { %v825_v61 = vmul.f32 %v2086_v58, %v824_v60  ;;  %v822_v62 = vsel %vm821_vm5, %v2084_v48, %v818_v59  ;;  %v668_v59 = vlaneseq }
 0x12e   : > { %v833_v1 = vmul.f32 %v822_v62, %v2333_v15  ;;  %v729_v15 = vld [vmem:[%s2274_s22] sm:$0x3]  ;;  %s2156_s22 = smov 80  }
 0x12f   : > { %v826_v63 = vmul.f32 0.5, %v825_v61  ;;  %v847_v16 = vperm.slane %v729_v15, 0  ;;  %v848_v24 = vperm.slane %v729_v15, 1  ;;  %v669_v60 = vshrl.u32 %v668_v59, 7 }
 0x130   : > { %v838_v8 = vmul.f32 %v2075_v3, %v833_v1  ;;  %v672_v61 = vand.u32 127, %v668_v59 }
 0x131   : > { %v827_v0 = vsub.f32 1.5, %v826_v63  ;;  %v677_v62 = vand.u32 1, %v669_v60 }
 0x132   : > { %v843_v11 = vadd.f32 %v2076_v9, %v838_v8  ;;  %v701_v63 = vand.u32 1, %v672_v61  ;;  %vm711_vm11 = vcmp.le.s32.totalorder %v672_v61, %v669_v60 }
 0x133   : > { %v828_v5 = vmul.f32 %v2086_v58, %v827_v0  ;;  %v670_v0 = vadd.s32 8, %v669_v60 }
 0x134   : > { %vm709_vm10 = vcmp.eq.s32.totalorder %v677_v62, %v701_v63 }
 0x135   : > { %v832_v6 = vsel %vm831_vm8, %v2086_v58, %v828_v5  ;;  %vm713_vm12 = vmand %vm709_vm10, %vm711_vm11  ;;  %v684_v1 = vand.u32 1, %v670_v0  ;;  %vm712_vm14 = vcmp.le.s32.totalorder %v672_v61, %v670_v0 }
 0x136   : > { %v834_v7 = vmul.f32 %v832_v6, %v2340_v20 }
 0x137   : > { %vm710_vm13 = vcmp.eq.s32.totalorder %v684_v1, %v701_v63 }
 0x138   : > { %v839_v10 = vmul.f32 %v2075_v3, %v834_v7  ;;  %v2158_v3 = vmov -1e+30   ;;  %vm714_vm15 = vmand %vm710_vm13, %vm712_vm14 }
 0x139   : > { %v715_v5 = vsel %vm713_vm12, 0.0, %v2158_v3 }
 0x13a   : > { %v844_v13 = vadd.f32 %v2076_v9, %v839_v10  ;;  %v716_v9 = vsel %vm714_vm15, 0.0, %v2158_v3 }
 0x13c   : > { %v845_v14 = vpack.c.bf16 %v844_v13, %v843_v11 }
 0x13e   : > { %1875 = vmatmul.msk.bf16.vlgmr.msra.gmra.mxu1 %vm783_vm1, %v845_v14 }
 0x14e   : > { %1876 = vmatmul.msk.bf16.vlgmr.msrb.gmra.mxu1 %vm783_vm1, %v845_v14 }
 0x1bb   : > { %v903_v17 = vpop.f32.mrf.mxu1 }
 0x1bc   : > { %v904_v18 = vadd.f32 %v903_v17, %v847_v16 }
 0x1be   : > { %v922_v19 = vpack.c.bf16 %v904_v18, %v904_v18 }
 0x1c0   : > { %932 = vrot.lane.b32.xlu0 %v922_v19, %s2154_s26  ;;  %928 = vrot.lane.b32.xlu2 %v922_v19, %s2155_s4  ;;  %v954_v34 = vunpack.c.l.b16 %v922_v19 }
 0x1c3   : > { %v905_v20 = vpop.f32.mrf.mxu1 }
 0x1c4   : > { %v906_v21 = vadd.f32 %v905_v20, %v847_v16 }
 0x1c6   : > { %v923_v22 = vpack.c.bf16 %v906_v21, %v906_v21 }
 0x1c8   : > { %934 = vrot.lane.b32.xlu1 %v923_v22, %s2154_s26  ;;  %930 = vrot.lane.b32.xlu2 %v923_v22, %s2155_s4  ;;  %v955_v33 = vunpack.c.l.b16 %v923_v22 }
 0x1ca   : > { %v956_v35 = vpack.c.b16 %v955_v33, %v954_v34 }
 0x1cb   : > { %v917_v23 = vpop.f32.mrf.mxu1 }
 0x1cc   : > { %v918_v25 = vadd.f32 %v917_v23, %v848_v24 }
 0x1ce   : > { %v2383_v27 = vpack.c.bf16 %v918_v25, %v918_v25 }
 0x1d0   : > { %936 = vrot.lane.b32.xlu2 %v922_v19, %s2156_s22  ;;  %v1156_v30 = vunpack.c.l.b16 %v2383_v27 }
 0x1d3   : > { %v919_v26 = vpop.f32.mrf.mxu1 }
 0x1d4   : > { %v920_v28 = vadd.f32 %v919_v26, %v848_v24 }
 0x1d6   : > { %v2385_v29 = vpack.c.bf16 %v920_v28, %v920_v28 }
 0x1d8   : > { %938 = vrot.lane.b32.xlu2 %v923_v22, %s2156_s22  ;;  %v1157_v31 = vunpack.c.l.b16 %v2385_v29 }
 0x1da   : > { %v1158_v32 = vpack.c.b16 %v1157_v31, %v1156_v30 }
 0x1dc   : > { %1170 = vmatpush.bf16.msra.mxu0 %v1158_v32 }
 0x1e0   : > { %957 = vrot.lane.b32.xlu2 %v956_v35, %s2157_s27 }
 0x21a   : > { %v929_v36 = vpop.permute.xlu2 %928 }
 0x21b   : > { %v980_v38 = vunpack.c.l.b16 %v929_v36 }
 0x222   : > { %v931_v37 = vpop.permute.xlu2 %930 }
 0x223   : > { %v981_v39 = vunpack.c.l.b16 %v931_v37 }
 0x225   : > { %v982_v40 = vpack.c.b16 %v981_v39, %v980_v38 }
 0x227   : > { %983 = vrot.lane.b32.xlu0 %v982_v40, %s2157_s27 }
 0x22a   : > { %v937_v41 = vpop.permute.xlu2 %936 }
 0x22b   : > { %v1030_v43 = vunpack.c.l.b16 %v937_v41 }
 0x232   : > { %v939_v42 = vpop.permute.xlu2 %938  ;;  %v933_v46 = vpop.permute.xlu0 %932 }
 0x233   : > { %v1031_v44 = vunpack.c.l.b16 %v939_v42  ;;  %v1005_v49 = vunpack.c.l.b16 %v933_v46 }
 0x235   : > { %v1032_v45 = vpack.c.b16 %v1031_v44, %v1030_v43 }
 0x237   : > { %1033 = vrot.lane.b32.xlu1 %v1032_v45, %s2157_s27 }
 0x23a   : > { %v935_v47 = vpop.permute.xlu1 %934  ;;  %v958_v48 = vpop.permute.xlu2 %957 }
 0x23b   : > { %v1006_v50 = vunpack.c.l.b16 %v935_v47  ;;  %v964_v51 = vsel %vm959_vm9, %v958_v48, 0 }
 0x23c   : > { %973 = vmatpush.bf16.xpose.msra.mxu2 %v964_v51 }
 0x23d   : > { %v1007_v52 = vpack.c.b16 %v1006_v50, %v1005_v49 }
 0x23f   : > { %1008 = vrot.lane.b32.xlu2 %v1007_v52, %s2157_s27  ;;  %s2600_s27 = sld [smem:[#allocation10_spill]] (!%p2000_p5) }
 0x243   : > { %1877 = vmatmul.msk.bf16.vlgmr.msra.gmra.mxu2 %vm959_vm9, %v956_v35 }
 0x299   : > { %v984_v53 = vpop.permute.xlu0 %983  ;;  %v1009_v54 = vpop.permute.xlu2 %1008 }
 0x29a   : > { %v989_v55 = vsel %vm959_vm9, %v984_v53, 0  ;;  %v1014_v56 = vsel %vm959_vm9, %v1009_v54, 0 }
 0x29b   : > { %998 = vmatpush.bf16.xpose.msra.mxu3 %v989_v55  ;;  %1023 = vmatpush.bf16.xpose.msrb.mxu2 %v1014_v56 }
 0x2a2   : > { %1878 = vmatmul.msk.bf16.vlgmr.msra.gmra.mxu3 %vm959_vm9, %v982_v40  ;;  %1879 = vmatmul.msk.bf16.vlgmr.msrb.gmra.mxu2 %vm959_vm9, %v1007_v52 }
 0x2a9   : > { %v1034_v57 = vpop.permute.xlu1 %1033 }
 0x2aa   : > { %v1039_v58 = vsel %vm959_vm9, %v1034_v57, 0 }
 0x2ab   : > { %1048 = vmatpush.bf16.xpose.msrb.mxu3 %v1039_v58 }
 0x2b2   : > { %1880 = vmatmul.msk.bf16.vlgmr.msrb.gmra.mxu3 %vm959_vm9, %v1032_v45 }
 0x2c6   : > { %v975_v6 = vpop.f32.mrf.mxu2 }
 0x2c7   : > { %v976_v7 = vadd.f32 %v975_v6, %v715_v5 }
 0x2c9   : > { %v1055_v8 = vsel %vm959_vm9, %v976_v7, -inf }
 0x2ca   : > { %1056 = vmax.xlane.f32.xlu0 %v1055_v8 }
 0x2ce   : > { %v977_v10 = vpop.f32.mrf.mxu2 }
 0x2cf   : > { %v978_v11 = vadd.f32 %v977_v10, %v716_v9 }
 0x2d1   : > { %v1058_v13 = vsel %vm959_vm9, %v978_v11, -inf }
 0x2d2   : > { %1059 = vmax.xlane.f32.xlu2 %v1058_v13 }
 0x325   : > { %v1000_v14 = vpop.f32.mrf.mxu3  ;;  %v1025_v15 = vpop.f32.mrf.mxu2 }
 0x326   : > { %v1001_v16 = vadd.f32 %v1000_v14, %v715_v5  ;;  %v1026_v17 = vadd.f32 %v1025_v15, %v715_v5 }
 0x328   : > { %v1067_v18 = vsel %vm959_vm9, %v1026_v17, -inf  ;;  %v1061_v19 = vsel %vm959_vm9, %v1001_v16, -inf }
 0x329   : > { %1068 = vmax.xlane.f32.xlu1 %v1067_v18  ;;  %1062 = vmax.xlane.f32.xlu2 %v1061_v19 }
 0x32d   : > { %v1002_v20 = vpop.f32.mrf.mxu3  ;;  %v1027_v21 = vpop.f32.mrf.mxu2 }
 0x32e   : > { %v1003_v22 = vadd.f32 %v1002_v20, %v716_v9  ;;  %v1028_v23 = vadd.f32 %v1027_v21, %v716_v9 }
 0x330   : > { %v1070_v24 = vsel %vm959_vm9, %v1028_v23, -inf  ;;  %v1064_v25 = vsel %vm959_vm9, %v1003_v22, -inf }
 0x331   : > { %1071 = vmax.xlane.f32.xlu0 %v1070_v24  ;;  %1065 = vmax.xlane.f32.xlu1 %v1064_v25 }
 0x335   : > { %v1050_v26 = vpop.f32.mrf.mxu3 }
 0x336   : > { %v1051_v28 = vadd.f32 %v1050_v26, %v715_v5 }
 0x338   : > { %v1073_v30 = vsel %vm959_vm9, %v1051_v28, -inf }
 0x339   : > { %1074 = vmax.xlane.f32.xlu0 %v1073_v30 }
 0x33d   : > { %v1052_v31 = vpop.f32.mrf.mxu3  ;;  %v1057_v32 = vpop.xlane.xlu0 %1056 }
 0x33e   : > { %v1053_v33 = vadd.f32 %v1052_v31, %v716_v9  ;;  %v1079_v34 = vsub.f32 %v976_v7, %v1057_v32 }
 0x340   : > { %v1087_v35 = vmul.f32 1.442695, %v1079_v34  ;;  %v1076_v36 = vsel %vm959_vm9, %v1053_v33, -inf }
 0x341   : > { %1077 = vmax.xlane.f32.xlu2 %v1076_v36 }
 0x342   : > { %2087 = vpow2.f32 %v1087_v35 }
 0x345   : > { %v1060_v37 = vpop.xlane.xlu2 %1059 }
 0x346   : > { %v1080_v38 = vsub.f32 %v978_v11, %v1060_v37 }
 0x348   : > { %v2088_v39 = vpop.eup %2087  ;;  %v1089_v40 = vmul.f32 1.442695, %v1080_v38 }
 0x349   : > { %v1103_v41 = vsel %vm959_vm9, %v2088_v39, 0.0 }
 0x34a   : > { %2089 = vpow2.f32 %v1089_v40  ;;  %1104 = vadd.xlane.f32.xlu1 %v1103_v41 }
 0x350   : > { %v2090_v42 = vpop.eup %2089 }
 0x351   : > { %v1106_v43 = vsel %vm959_vm9, %v2090_v42, 0.0 }
 0x352   : > { %1107 = vadd.xlane.f32.xlu0 %v1106_v43 }
 0x359   : > { %946 = vrot.lane.b32.xlu2 %v2383_v27, %s2154_s26 }
 0x363   : > { %948 = vrot.lane.b32.xlu1 %v2385_v29, %s2154_s26  ;;  %s2599_s26 = sld [smem:[#allocation9_spill]] (!%p2000_p5) }
 0x366   : > { %942 = vrot.lane.b32.xlu0 %v2383_v27, %s2155_s4 }
 0x39c   : > { %v1069_v44 = vpop.xlane.xlu1 %1068  ;;  %v1063_v45 = vpop.xlane.xlu2 %1062 }
 0x39d   : > { %v1083_v46 = vsub.f32 %v1026_v17, %v1069_v44  ;;  %v1081_v47 = vsub.f32 %v1001_v16, %v1063_v45 }
 0x39f   : > { %v1095_v48 = vmul.f32 1.442695, %v1083_v46  ;;  %v1091_v49 = vmul.f32 1.442695, %v1081_v47 }
 0x3a1   : > { %2091 = vpow2.f32 %v1095_v48 }
 0x3a2   : > { %2093 = vpow2.f32 %v1091_v49 }
 0x3a4   : > { %v1072_v50 = vpop.xlane.xlu0 %1071  ;;  %v1066_v51 = vpop.xlane.xlu1 %1065 }
 0x3a5   : > { %v1084_v52 = vsub.f32 %v1028_v23, %v1072_v50  ;;  %v1082_v53 = vsub.f32 %v1003_v22, %v1066_v51 }
 0x3a7   : > { %v2414_v54 = vpop.eup %2091  ;;  %v1097_v55 = vmul.f32 1.442695, %v1084_v52  ;;  %v1093_v56 = vmul.f32 1.442695, %v1082_v53 }
 0x3a8   : > { %v2094_v57 = vpop.eup %2093  ;;  %v1115_v58 = vsel %vm959_vm9, %v2414_v54, 0.0 }
 0x3a9   : > { %2095 = vpow2.f32 %v1097_v55  ;;  %1116 = vadd.xlane.f32.xlu2 %v1115_v58  ;;  %v1109_v59 = vsel %vm959_vm9, %v2094_v57, 0.0 }
 0x3aa   : > { %2097 = vpow2.f32 %v1093_v56  ;;  %1110 = vadd.xlane.f32.xlu0 %v1109_v59 }
 0x3ac   : > { %v1075_v60 = vpop.xlane.xlu0 %1074 }
 0x3ad   : > { %v1085_v61 = vsub.f32 %v1051_v28, %v1075_v60 }
 0x3af   : > { %v2096_v62 = vpop.eup %2095  ;;  %v1099_v63 = vmul.f32 1.442695, %v1085_v61 }
 0x3b0   : > { %v2098_v0 = vpop.eup %2097  ;;  %v1118_v1 = vsel %vm959_vm9, %v2096_v62, 0.0 }
 0x3b1   : > { %2099 = vpow2.f32 %v1099_v63  ;;  %1119 = vadd.xlane.f32.xlu1 %v1118_v1  ;;  %v1112_v3 = vsel %vm959_vm9, %v2098_v0, 0.0 }
 0x3b2   : > { %1113 = vadd.xlane.f32.xlu2 %v1112_v3 }
 0x3b4   : > { %v1078_v5 = vpop.xlane.xlu2 %1077 }
 0x3b5   : > { %v1086_v6 = vsub.f32 %v1053_v33, %v1078_v5 }
 0x3b7   : > { %v2421_v7 = vpop.eup %2099  ;;  %v1101_v8 = vmul.f32 1.442695, %v1086_v6 }
 0x3b8   : > { %v1121_v9 = vsel %vm959_vm9, %v2421_v7, 0.0 }
 0x3b9   : > { %2101 = vpow2.f32 %v1101_v8  ;;  %1122 = vadd.xlane.f32.xlu1 %v1121_v9 }
 0x3bc   : > { %v947_v23 = vpop.permute.xlu2 %946 }
 0x3bd   : > { %v1105_v10 = vpop.xlane.xlu1 %1104  ;;  %v1208_v26 = vunpack.c.l.b16 %v947_v23  ;;  %v2017_v23 = vld [vmem:[%s2284_s25 + $0x10] sm:$0xff] }
 0x3be   : > { %2103 = vrcp.f32 %v1105_v10 }
 0x3bf   : > { %v2425_v11 = vpop.eup %2101 }
 0x3c0   : > { %v1124_v13 = vsel %vm959_vm9, %v2425_v11, 0.0 }
 0x3c1   : > { %1125 = vadd.xlane.f32.xlu0 %v1124_v13 }
 0x3c4   : > { %v2104_v15 = vpop.eup %2103 }
 0x3c5   : > { %v1108_v14 = vpop.xlane.xlu0 %1107  ;;  %v1135_v16 = vmul.f32 %v2104_v15, %v2088_v39 }
 0x3c6   : > { %2105 = vrcp.f32 %v1108_v14 }
 0x3c7   : > { %v1143_v19 = vpack.c.bf16 %v1135_v16, %v1135_v16 }
 0x3c9   : > { %v1153_v21 = vunpack.c.l.b16 %v1143_v19 }
 0x3ca   : > { %944 = vrot.lane.b32.xlu2 %v2385_v29, %s2155_s4 }
 0x3cc   : > { %v2106_v17 = vpop.eup %2105 }
 0x3cd   : > { %v1136_v18 = vmul.f32 %v2106_v17, %v2090_v42 }
 0x3cf   : > { %v1144_v20 = vpack.c.bf16 %v1136_v18, %v1136_v18 }
 0x3d1   : > { %v1154_v22 = vunpack.c.l.b16 %v1144_v20 }
 0x3d2   : > { %952 = vrot.lane.b32.xlu1 %v2385_v29, %s2156_s22 }
 0x3d3   : > { %v1155_v24 = vpack.c.b16 %v1154_v22, %v1153_v21  ;;  %v2018_v22 = vld [vmem:[%s2284_s25 + $0x18] sm:$0xff] }
 0x3d5   : > { %v949_v25 = vpop.permute.xlu1 %948  ;;  %1881 = vmatmul.msk.bf16.vlgmr.msra.gmra.mxu0 %vm959_vm9, %v1155_v24  ;;  %950 = vrot.lane.b32.xlu0 %v2383_v27, %s2156_s22  ;;  %v2016_v24 = vld [vmem:[%s2284_s25 + $0x8] sm:$0xff] }
 0x3d6   : > { %v1209_v28 = vunpack.c.l.b16 %v949_v25  ;;  %v2015_v25 = vld [vmem:[%s2284_s25] sm:$0xff] }
 0x3d8   : > { %v1210_v30 = vpack.c.b16 %v1209_v28, %v1208_v26  ;;  %v943_v31 = vpop.permute.xlu0 %942 }
 0x3d9   : > { %v1182_v45 = vunpack.c.l.b16 %v943_v31 }
 0x3da   : > { %1222 = vmatpush.bf16.msra.mxu2 %v1210_v30 }
 0x41c   : > { %v1117_v32 = vpop.xlane.xlu2 %1116 }
 0x41d   : > { %v1111_v33 = vpop.xlane.xlu0 %1110  ;;  %2107 = vrcp.f32 %v1117_v32 }
 0x41e   : > { %2109 = vrcp.f32 %v1111_v33 }
 0x423   : > { %v2108_v35 = vpop.eup %2107 }
 0x424   : > { %v1120_v34 = vpop.xlane.xlu1 %1119  ;;  %v2110_v36 = vpop.eup %2109  ;;  %v1139_v37 = vmul.f32 %v2108_v35, %v2414_v54 }
 0x425   : > { %2111 = vrcp.f32 %v1120_v34  ;;  %v1114_v29 = vpop.xlane.xlu2 %1113  ;;  %v1137_v38 = vmul.f32 %v2110_v36, %v2094_v57 }
 0x426   : > { %2113 = vrcp.f32 %v1114_v29  ;;  %v1147_v40 = vpack.c.bf16 %v1139_v37, %v1139_v37 }
 0x427   : > { %v1145_v42 = vpack.c.bf16 %v1137_v38, %v1137_v38 }
 0x428   : > { %v1205_v49 = vunpack.c.l.b16 %v1147_v40 }
 0x429   : > { %v1179_v52 = vunpack.c.l.b16 %v1145_v42  ;;  %v2077_v42 = vld [vmem:[%s2596_s21] ss:$0 sm:$0xff] }
 0x42b   : > { %v2112_v39 = vpop.eup %2111 }
 0x42c   : > { %v2114_v27 = vpop.eup %2113  ;;  %v1140_v41 = vmul.f32 %v2112_v39, %v2096_v62  ;;  %v1123_v57 = vpop.xlane.xlu1 %1122 }
 0x42d   : > { %v1138_v43 = vmul.f32 %v2114_v27, %v2098_v0  ;;  %v945_v44 = vpop.permute.xlu2 %944 }
 0x42e   : > { %v1148_v46 = vpack.c.bf16 %v1140_v41, %v1140_v41  ;;  %v1183_v47 = vunpack.c.l.b16 %v945_v44 }
 0x42f   : > { %v1146_v48 = vpack.c.bf16 %v1138_v43, %v1138_v43 }
 0x430   : > { %v1206_v50 = vunpack.c.l.b16 %v1148_v46  ;;  %v1184_v51 = vpack.c.b16 %v1183_v47, %v1182_v45 }
 0x431   : > { %v1180_v53 = vunpack.c.l.b16 %v1146_v48 }
 0x432   : > { %v1207_v55 = vpack.c.b16 %v1206_v50, %v1205_v49  ;;  %1196 = vmatpush.bf16.msra.mxu1 %v1184_v51 }
 0x433   : > { %v1181_v54 = vpack.c.b16 %v1180_v53, %v1179_v52 }
 0x434   : > { %1883 = vmatmul.msk.bf16.vlgmr.msra.gmra.mxu2 %vm959_vm9, %v1207_v55  ;;  %v1126_v56 = vpop.xlane.xlu0 %1125 }
 0x435   : > { %1882 = vmatmul.msk.bf16.vlgmr.msra.gmra.mxu1 %vm959_vm9, %v1181_v54  ;;  %2115 = vrcp.f32 %v1126_v56 }
 0x436   : > { %2117 = vrcp.f32 %v1123_v57 }
 0x43b   : > { %v2116_v58 = vpop.eup %2115 }
 0x43c   : > { %v2118_v59 = vpop.eup %2117  ;;  %v1142_v60 = vmul.f32 %v2116_v58, %v2425_v11 }
 0x43d   : > { %v1141_v61 = vmul.f32 %v2118_v59, %v2421_v7  ;;  %v1928_v59 = vld [vmem:[%s2297_s1 + $0x30] sm:$0xf] }
 0x43e   : > { %v1150_v62 = vpack.c.bf16 %v1142_v60, %v1142_v60  ;;  %v2026_v60 = vld [vmem:[%s2297_s1 + $0x34] sm:$0xf0] }
 0x43f   : > { %v1149_v0 = vpack.c.bf16 %v1141_v61, %v1141_v61  ;;  %v2025_v61 = vld [vmem:[%s2297_s1 + $0x34] sm:$0xf] }
 0x440   : > { %v1232_v6 = vunpack.c.l.b16 %v1150_v62  ;;  %v1929_v62 = vor.u32 %v2026_v60, %v1928_v59  ;;  %v2039_v59 = vld [vmem:[%s2308_s2 + $0x60] sm:$0xff]  ;;  %v2029_v60 = vld [vmem:[%s2308_s2 + $0x10] sm:$0xff] }
 0x441   : > { %v1231_v9 = vunpack.c.l.b16 %v1149_v0 }
 0x442   : > { %1443 = vmatpush.bf16.msrb.mxu1 %v1929_v62  ;;  %v749_v62 = vld [vmem:[%s2302_s23] sm:$0x3] }
 0x443   : > { %v1233_v10 = vpack.c.b16 %v1232_v6, %v1231_v9 }
 0x444   : > { %v953_v63 = vpop.permute.xlu1 %952 }
 0x445   : > { %v1235_v3 = vunpack.c.l.b16 %v953_v63  ;;  %v1930_v63 = vld [vmem:[%s2297_s1 + $0x38] sm:$0xf0] }
 0x446   : > { %v1933_v0 = vor.u32 %v2025_v61, %v1930_v63  ;;  %v2038_v61 = vld [vmem:[%s2308_s2 + $0x58] sm:$0xff]  ;;  %v2028_v63 = vld [vmem:[%s2308_s2 + $0x8] sm:$0xff] }
 0x447   : > { %v951_v1 = vpop.permute.xlu0 %950 }
 0x448   : > { %v1234_v5 = vunpack.c.l.b16 %v951_v1  ;;  %1457 = vmatpush.bf16.msrb.mxu2 %v1933_v0  ;;  %v1920_v1 = vld [vmem:[%s2297_s1 + $0x20] sm:$0xf]  ;;  %v1392_v0 = vperm.slane %v749_v62, 0 }
 0x44a   : > { %v1236_v8 = vpack.c.b16 %v1235_v3, %v1234_v5  ;;  %v2024_v3 = vld [vmem:[%s2297_s1 + $0x24] sm:$0xf0]  ;;  %v2023_v5 = vld [vmem:[%s2297_s1 + $0x24] sm:$0xf] }
 0x44b   : > { %v1921_v6 = vor.u32 %v2024_v3, %v1920_v1  ;;  %v2037_v1 = vld [vmem:[%s2308_s2 + $0x50] sm:$0xff]  ;;  %v2027_v3 = vld [vmem:[%s2308_s2] sm:$0xff] }
 0x44c   : > { %1248 = vmatpush.bf16.msrb.mxu0 %v1236_v8  ;;  %v1922_v8 = vld [vmem:[%s2297_s1 + $0x28] sm:$0xf0] }
 0x44d   : > { %v1925_v9 = vor.u32 %v2023_v5, %v1922_v8  ;;  %1444 = vmatpush.bf16.msrb.mxu1 %v1921_v6  ;;  %v2036_v8 = vld [vmem:[%s2308_s2 + $0x48] sm:$0xff] }
 0x44f   : > { %1884 = vmatmul.msk.bf16.vlgmr.msrb.gmra.mxu0 %vm959_vm9, %v1233_v10  ;;  %1458 = vmatpush.bf16.msrb.mxu2 %v1925_v9  ;;  %v1912_v10 = vld [vmem:[%s2297_s1 + $0x10] sm:$0xf] }
 0x450   : > { %1319 = vmatpush.bf16.msra.mxu0 %v2018_v22 }
 0x452   : > { %v1172_v15 = vpop.f32.mrf.mxu0 }
 0x454   : > { %1320 = vmatpush.bf16.msra.mxu0 %v2017_v23  ;;  %v1906_v23 = vld [vmem:[%s2297_s1 + $0x8] sm:$0xf0] }
 0x458   : > { %1321 = vmatpush.bf16.msra.mxu0 %v2016_v24 }
 0x45a   : > { %v1174_v18 = vpop.f32.mrf.mxu0 }
 0x45c   : > { %1322 = vmatpush.bf16.msra.mxu0 %v2015_v25 }
 0x4b2   : > { %v1198_v13 = vpop.f32.mrf.mxu1 }
 0x4b7   : > { %v1224_v14 = vpop.f32.mrf.mxu2 }
 0x4ba   : > { %v1200_v11 = vpop.f32.mrf.mxu1 }
 0x4bb   : > { %v2060_v7 = vpack.i.bf16 %v1200_v11, %v1198_v13  ;;  %v2022_v13 = vld [vmem:[%s2297_s1 + $0x14] sm:$0xf0]  ;;  %v1914_v11 = vld [vmem:[%s2297_s1 + $0x18] sm:$0xf0] }
 0x4bd   : > { %2061 = vrot.lane.b32.xlu2 %v2060_v7, %s2159_s28 }
 0x4bf   : > { %v1226_v16 = vpop.f32.mrf.mxu2 }
 0x4c0   : > { %v2065_v17 = vpack.i.bf16 %v1226_v16, %v1224_v14  ;;  %v2021_v14 = vld [vmem:[%s2297_s1 + $0x14] sm:$0xf] }
 0x4c1   : > { %v1917_v16 = vor.u32 %v2021_v14, %v1914_v11  ;;  %v2035_v14 = vld [vmem:[%s2308_s2 + $0x40] sm:$0xff] }
 0x4c2   : > { %2066 = vrot.lane.b32.xlu0 %v2065_v17, %s2160_s30 }
 0x4c3   : > { %1459 = vmatpush.bf16.msrb.mxu2 %v1917_v16 }
 0x4cc   : > { %v1250_v19 = vpop.f32.mrf.mxu0 }
 0x4d4   : > { %v1252_v20 = vpop.f32.mrf.mxu0 }
 0x4d5   : > { %v2070_v21 = vpack.i.bf16 %v1252_v20, %v1250_v19  ;;  %v2020_v19 = vld [vmem:[%s2297_s1 + $0x4] sm:$0xf0]  ;;  %v2019_v20 = vld [vmem:[%s2297_s1 + $0x4] sm:$0xf] }
 0x4d6   : > { %v1909_v24 = vor.u32 %v2019_v20, %v1906_v23 }
 0x4d7   : > { %2071 = vrot.lane.b32.xlu1 %v2070_v21, %s2161_s16 }
 0x4d8   : > { %1460 = vmatpush.bf16.msrb.mxu2 %v1909_v24 }
 0x517   : > { %v2062_v26 = vpop.permute.xlu2 %2061 }
 0x518   : > { %v2064_v30 = vunpack.i.h.bf16 %v2062_v26  ;;  %v2063_v31 = vunpack.i.l.bf16 %v2062_v26 }
 0x51a   : > { %v1280_v35 = vsel %vm959_vm9, %v1174_v18, %v2064_v30  ;;  %v1279_v29 = vsel %vm959_vm9, %v1172_v15, %v2063_v31  ;;  %v1913_v15 = vor.u32 %v2022_v13, %v1912_v10  ;;  %v1904_v18 = vld [vmem:[%s2297_s1] sm:$0xf]  ;;  %v1393_v10 = vperm.slane %v749_v62, 1 }
 0x51b   : > { %v1905_v22 = vor.u32 %v2020_v19, %v1904_v18 }
 0x51c   : > { %1445 = vmatpush.bf16.msrb.mxu1 %v1913_v15 }
 0x520   : > { %1446 = vmatpush.bf16.msrb.mxu1 %v1905_v22 }
 0x534   : > { %v2067_v28 = vpop.permute.xlu0 %2066 }
 0x535   : > { %v2069_v32 = vunpack.i.h.bf16 %v2067_v28  ;;  %v2068_v33 = vunpack.i.l.bf16 %v2067_v28 }
 0x537   : > { %v1282_v38 = vsel %vm1281_vm0, %v1279_v29, %v2068_v33  ;;  %v1283_v39 = vsel %vm1281_vm0, %v1280_v35, %v2069_v32 }
 0x549   : > { %v2072_v34 = vpop.permute.xlu1 %2071 }
 0x54a   : > { %v2074_v36 = vunpack.i.h.bf16 %v2072_v34  ;;  %v2073_v37 = vunpack.i.l.bf16 %v2072_v34 }
 0x54c   : > { %v1285_v27 = vsel %vm1284_vm2, %v1282_v38, %v2073_v37  ;;  %v1286_v40 = vsel %vm1284_vm2, %v1283_v39, %v2074_v36 }
 0x54d   : > { %v1287_v41 = vpack.c.bf16 %v1286_v40, %v1285_v27  ;;  %v2078_v40 = vld [vmem:[%s2597_s15] ss:$0 sm:$0xff] }
 0x54f   : > { %1901 = vmatmul.msk.bf16.vlgmr.msra.gmra.mxu0 %vm783_vm1, %v1287_v41 }
 0x5cc   : > { %v1324_v43 = vpop.f32.mrf.mxu0 }
 0x5cd   : > { %v1329_v44 = vadd.f32 %v1324_v43, %v2321_v2 }
 0x5cf   : > { %v2455_v45 = vadd.f32 %v2077_v42, %v1329_v44  ;;  %v2079_v44 = vld [vmem:[%s640_s17] ss:$0 sm:$0xff] }
 0x5d1   : > { %v1336_v46 = vsel %vm783_vm1, %v2455_v45, 0.0 }
 0x5d2   : > { %1337 = vadd.xlane.f32.xlu2 %v1336_v46 }
 0x5d4   : > { %v1326_v47 = vpop.f32.mrf.mxu0 }
 0x5d5   : > { %v1330_v48 = vadd.f32 %v1326_v47, %v2325_v4 }
 0x5d7   : > { %v2460_v49 = vadd.f32 %v2077_v42, %v1330_v48 }
 0x5d9   : > { %v1339_v50 = vsel %vm783_vm1, %v2460_v49, 0.0 }
 0x5da   : > { %1340 = vadd.xlane.f32.xlu0 %v1339_v50 }
 0x645   : > { %v1338_v51 = vpop.xlane.xlu2 %1337 }
 0x646   : > { %v1342_v2 = vmul.f32 %v1338_v51, %v2329_v12 }
 0x648   : > { %v2466_v52 = vsub.f32 %v2455_v45, %v1342_v2 }
 0x64a   : > { %v1346_v53 = vmul.f32 %v2466_v52, %v2466_v52 }
 0x64c   : > { %v1348_v4 = vsel %vm783_vm1, %v1346_v53, 0.0  ;;  %v2033_v53 = vld [vmem:[%s2308_s2 + $0x30] sm:$0xff] }
 0x64d   : > { %1349 = vadd.xlane.f32.xlu1 %v1348_v4  ;;  %v1341_v55 = vpop.xlane.xlu0 %1340  ;;  %v2042_v4 = vld [vmem:[%s2308_s2 + $0x78] sm:$0xff] }
 0x64e   : > { %v1343_v54 = vmul.f32 %v1341_v55, %v2329_v12  ;;  %1606 = vmatpush.bf16.msrb.mxu0 %v2042_v4  ;;  %v2032_v55 = vld [vmem:[%s2308_s2 + $0x28] sm:$0xff] }
 0x650   : > { %v2473_v56 = vsub.f32 %v2460_v49, %v1343_v54  ;;  %v2041_v54 = vld [vmem:[%s2308_s2 + $0x70] sm:$0xff] }
 0x652   : > { %v1347_v57 = vmul.f32 %v2473_v56, %v2473_v56  ;;  %1607 = vmatpush.bf16.msrb.mxu0 %v2041_v54 }
 0x654   : > { %v1351_v58 = vsel %vm783_vm1, %v1347_v57, 0.0  ;;  %v2040_v57 = vld [vmem:[%s2308_s2 + $0x68] sm:$0xff] }
 0x655   : > { %1352 = vadd.xlane.f32.xlu2 %v1351_v58  ;;  %v2030_v58 = vld [vmem:[%s2308_s2 + $0x18] sm:$0xff] }
 0x656   : > { %1608 = vmatpush.bf16.msrb.mxu0 %v2040_v57 }
 0x65a   : > { %1609 = vmatpush.bf16.msrb.mxu0 %v2039_v59 }
 0x65e   : > { %1610 = vmatpush.bf16.msrb.mxu0 %v2038_v61 }
 0x662   : > { %1611 = vmatpush.bf16.msrb.mxu0 %v2037_v1 }
 0x666   : > { %1612 = vmatpush.bf16.msrb.mxu0 %v2036_v8 }
 0x66a   : > { %1613 = vmatpush.bf16.msrb.mxu0 %v2035_v14 }
 0x6c0   : > { %v1350_v7 = vpop.xlane.xlu1 %1349 }
 0x6c1   : > { %v1354_v17 = vmul.f32 %v1350_v7, %v2329_v12 }
 0x6c3   : > { %v1356_v21 = vadd.f32 1e-05, %v1354_v17 }
 0x6c5   : > { %2119 = vrsqrt.f32 %v1356_v21  ;;  %vm1364_vm4 = vweird.f32 %v1356_v21 }
 0x6c8   : > { %v1353_v25 = vpop.xlane.xlu2 %1352 }
 0x6c9   : > { %v1355_v26 = vmul.f32 %v1353_v25, %v2329_v12 }
 0x6cb   : > { %v2120_v28 = vpop.eup %2119  ;;  %v1357_v30 = vadd.f32 1e-05, %v1355_v26 }
 0x6cc   : > { %v1359_v31 = vmul.f32 %v2120_v28, %v1356_v21  ;;  %vm1365_vm3 = vweird.f32 %v2120_v28 }
 0x6cd   : > { %2121 = vrsqrt.f32 %v1357_v30  ;;  %vm1366_vm5 = vmor %vm1364_vm4, %vm1365_vm3  ;;  %vm1374_vm7 = vweird.f32 %v1357_v30 }
 0x6ce   : > { %v1360_v32 = vmul.f32 %v2120_v28, %v1359_v31 }
 0x6d0   : > { %v1361_v33 = vmul.f32 0.5, %v1360_v32 }
 0x6d2   : > { %v1362_v34 = vsub.f32 1.5, %v1361_v33 }
 0x6d3   : > { %v2122_v35 = vpop.eup %2121 }
 0x6d4   : > { %v1363_v29 = vmul.f32 %v2120_v28, %v1362_v34  ;;  %v1369_v36 = vmul.f32 %v2122_v35, %v1357_v30  ;;  %vm1375_vm6 = vweird.f32 %v2122_v35 }
 0x6d5   : > { %vm1376_vm8 = vmor %vm1374_vm7, %vm1375_vm6 }
 0x6d6   : > { %v1370_v37 = vmul.f32 %v2122_v35, %v1369_v36  ;;  %v1367_v38 = vsel %vm1366_vm5, %v2120_v28, %v1363_v29 }
 0x6d7   : > { %v1378_v41 = vmul.f32 %v1367_v38, %v2466_v52  ;;  %v2034_v52 = vld [vmem:[%s2308_s2 + $0x38] sm:$0xff] }
 0x6d8   : > { %v1371_v39 = vmul.f32 0.5, %v1370_v37  ;;  %1592 = vmatpush.bf16.msra.mxu3 %v2034_v52 }
 0x6d9   : > { %v1383_v46 = vmul.f32 %v2078_v40, %v1378_v41 }
 0x6da   : > { %v1372_v27 = vsub.f32 1.5, %v1371_v39 }
 0x6db   : > { %v1388_v50 = vadd.f32 %v2079_v44, %v1383_v46 }
 0x6dc   : > { %v1373_v42 = vmul.f32 %v2122_v35, %v1372_v27  ;;  %1593 = vmatpush.bf16.msra.mxu3 %v2033_v53 }
 0x6de   : > { %v1377_v43 = vsel %vm1376_vm8, %v2122_v35, %v1373_v42 }
 0x6df   : > { %v1379_v47 = vmul.f32 %v1377_v43, %v2473_v56  ;;  %v2031_v56 = vld [vmem:[%s2308_s2 + $0x20] sm:$0xff]  ;;  %s2598_s2 = sld [smem:[#allocation8_spill]] (!%p2000_p5) }
 0x6e0   : > { %1594 = vmatpush.bf16.msra.mxu3 %v2032_v55  ;;  %v2080_v43 = vld [vmem:[%s657_s3] ss:$0 sm:$0xff] }
 0x6e1   : > { %v1384_v48 = vmul.f32 %v2078_v40, %v1379_v47 }
 0x6e3   : > { %v1389_v51 = vadd.f32 %v2079_v44, %v1384_v48 }
 0x6e4   : > { %1595 = vmatpush.bf16.msra.mxu3 %v2031_v56 }
 0x6e5   : > { %v1390_v2 = vpack.c.bf16 %v1389_v51, %v1388_v50 }
 0x6e7   : > { %1934 = vmatmul.msk.bf16.vlgmr.msrb.gmra.mxu1 %vm783_vm1, %v1390_v2  ;;  %1935 = vmatmul.msk.bf16.vlgmr.msrb.gmra.mxu2 %vm783_vm1, %v1390_v2 }
 0x6e8   : > { %1596 = vmatpush.bf16.msra.mxu3 %v2030_v58 }
 0x6ec   : > { %1597 = vmatpush.bf16.msra.mxu3 %v2029_v60 }
 0x6f0   : > { %1598 = vmatpush.bf16.msra.mxu3 %v2028_v63 }
 0x6f4   : > { %1599 = vmatpush.bf16.msra.mxu3 %v2027_v3 }
 0x764   : > { %v1448_v5 = vpop.f32.mrf.mxu1 }
 0x765   : > { %v1449_v6 = vadd.f32 %v1448_v5, %v1392_v0 }
 0x767   : > { %v1467_v9 = vmul.f32 -1.702, %v1449_v6 }
 0x769   : > { %v1471_v13 = vmul.f32 1.442695, %v1467_v9 }
 0x76a   : > { %v1462_v15 = vpop.f32.mrf.mxu2 }
 0x76b   : > { %v1463_v11 = vadd.f32 %v1462_v15, %v1393_v10  ;;  %2123 = vpow2.f32 %v1471_v13 }
 0x76c   : > { %v1450_v7 = vpop.f32.mrf.mxu1 }
 0x76d   : > { %v1468_v16 = vmul.f32 -1.702, %v1463_v11  ;;  %v1451_v17 = vadd.f32 %v1450_v7, %v1392_v0 }
 0x76f   : > { %v1473_v18 = vmul.f32 1.442695, %v1468_v16  ;;  %v1469_v19 = vmul.f32 -1.702, %v1451_v17 }
 0x771   : > { %v1475_v20 = vmul.f32 1.442695, %v1469_v19  ;;  %2125 = vpow2.f32 %v1473_v18  ;;  %v2124_v22 = vpop.eup %2123 }
 0x772   : > { %v1464_v21 = vpop.f32.mrf.mxu2  ;;  %v1479_v25 = vadd.f32 1.0, %v2124_v22 }
 0x773   : > { %2127 = vpow2.f32 %v1475_v20  ;;  %v1465_v23 = vadd.f32 %v1464_v21, %v1393_v10 }
 0x775   : > { %v1470_v24 = vmul.f32 -1.702, %v1465_v23 }
 0x777   : > { %v1477_v26 = vmul.f32 1.442695, %v1470_v24  ;;  %v2126_v28 = vpop.eup %2125 }
 0x778   : > { %v1480_v32 = vadd.f32 1.0, %v2126_v28 }
 0x779   : > { %v2128_v30 = vpop.eup %2127  ;;  %2129 = vpow2.f32 %v1477_v26 }
 0x77a   : > { %2131 = vrcp.f32 %v1479_v25  ;;  %v1481_v31 = vadd.f32 1.0, %v2128_v30 }
 0x77c   : > { %2133 = vrcp.f32 %v1481_v31 }
 0x77d   : > { %2135 = vrcp.f32 %v1480_v32 }
 0x77f   : > { %v2130_v33 = vpop.eup %2129 }
 0x780   : > { %v2132_v34 = vpop.eup %2131  ;;  %v1482_v35 = vadd.f32 1.0, %v2130_v33 }
 0x781   : > { %v1487_v36 = vmul.f32 %v2132_v34, %v1449_v6 }
 0x782   : > { %v2134_v29 = vpop.eup %2133  ;;  %2137 = vrcp.f32 %v1482_v35 }
 0x783   : > { %v1489_v37 = vmul.f32 %v2134_v29, %v1451_v17  ;;  %v2136_v39 = vpop.eup %2135 }
 0x784   : > { %v1488_v40 = vmul.f32 %v2136_v39, %v1463_v11 }
 0x785   : > { %v1491_v38 = vpack.c.bf16 %v1489_v37, %v1487_v36 }
 0x787   : > { %1600 = vmatmul.bf16.vlgmr.msra.gmra.mxu3 %v1491_v38 }
 0x788   : > { %v2138_v27 = vpop.eup %2137 }
 0x789   : > { %v1490_v41 = vmul.f32 %v2138_v27, %v1465_v23 }
 0x78b   : > { %v1492_v42 = vpack.c.bf16 %v1490_v41, %v1488_v40 }
 0x78d   : > { %1614 = vmatmul.bf16.vlgmr.msrb.gmra.mxu0 %v1492_v42 }
 0x80a   : > { %v1601_v44 = vpop.f32.mrf.mxu3  ;;  %v1615_v46 = vpop.f32.mrf.mxu0 }
 0x80b   : > { %v1602_v47 = vadd.f32 %v2080_v43, %v1601_v44 }
 0x80d   : > { %v1616_v48 = vadd.f32 %v1615_v46, %v1602_v47 }
 0x80f   : > { %v1620_v50 = vadd.f32 %v1616_v48, %v2455_v45 }
 0x811   : > { %1622 = vst.msk [vmem:[#allocation2] sm:$0xff] %vm783_vm1, %v1620_v50 }
 0x812   : > { %v1603_v51 = vpop.f32.mrf.mxu3  ;;  %v1617_v52 = vpop.f32.mrf.mxu0 }
 0x813   : > { %v1604_v2 = vadd.f32 %v2080_v43, %v1603_v51 }
 0x815   : > { %v1618_v53 = vadd.f32 %v1617_v52, %v1604_v2  ;;  %1627 = sbr.rel (%p2000_p5) target bundleno = 2351 (0x92f), region = 88 }
 0x817   : > { %v1621_v4 = vadd.f32 %v1618_v53, %v2460_v49 }
 0x819   : > { %1623 = vst.msk [vmem:[#allocation2 + $0x8] sm:$0xff] %vm783_vm1, %v1621_v4 }
 0x81a   : > { %v1630_v55 = vsel %vm783_vm1, %v1620_v50, 0.0  ;;  %v1633_v54 = vsel %vm783_vm1, %v1621_v4, 0.0  ;;  %v2139_v17 = vld [vmem:[%s2598_s2] ss:$0 sm:$0xff] }
 0x81b   : > { %1631 = vadd.xlane.f32.xlu0 %v1630_v55  ;;  %v2140_v20 = vld [vmem:[%s2599_s26] ss:$0 sm:$0xff] }
 0x823   : > { %1634 = vadd.xlane.f32.xlu0 %v1633_v54 }
 0x88e   : > { %v1632_v45 = vpop.xlane.xlu0 %1631 }
 0x88f   : > { %v1636_v56 = vmul.f32 %v1632_v45, %v2329_v12 }
 0x891   : > { %v1638_v57 = vsub.f32 %v1620_v50, %v1636_v56 }
 0x893   : > { %v1640_v58 = vmul.f32 %v1638_v57, %v1638_v57 }
 0x895   : > { %v1642_v59 = vsel %vm783_vm1, %v1640_v58, 0.0 }
 0x896   : > { %1643 = vadd.xlane.f32.xlu1 %v1642_v59  ;;  %v1635_v49 = vpop.xlane.xlu0 %1634 }
 0x897   : > { %v1637_v60 = vmul.f32 %v1635_v49, %v2329_v12 }
 0x899   : > { %v1639_v61 = vsub.f32 %v1621_v4, %v1637_v60 }
 0x89b   : > { %v1641_v62 = vmul.f32 %v1639_v61, %v1639_v61 }
 0x89d   : > { %v1645_v63 = vsel %vm783_vm1, %v1641_v62, 0.0 }
 0x89e   : > { %1646 = vadd.xlane.f32.xlu1 %v1645_v63 }
 0x909   : > { %v1644_v0 = vpop.xlane.xlu1 %1643 }
 0x90a   : > { %v1648_v1 = vmul.f32 %v1644_v0, %v2329_v12 }
 0x90c   : > { %v1650_v3 = vadd.f32 1e-05, %v1648_v1 }
 0x90e   : > { %2141 = vrsqrt.f32 %v1650_v3  ;;  %vm1658_vm10 = vweird.f32 %v1650_v3 }
 0x911   : > { %v1647_v5 = vpop.xlane.xlu1 %1646 }
 0x912   : > { %v1649_v6 = vmul.f32 %v1647_v5, %v2329_v12 }
 0x914   : > { %v2142_v8 = vpop.eup %2141  ;;  %v1651_v9 = vadd.f32 1e-05, %v1649_v6 }
 0x915   : > { %v1653_v10 = vmul.f32 %v2142_v8, %v1650_v3  ;;  %vm1659_vm9 = vweird.f32 %v2142_v8 }
 0x916   : > { %2143 = vrsqrt.f32 %v1651_v9  ;;  %vm1660_vm11 = vmor %vm1658_vm10, %vm1659_vm9  ;;  %vm1668_vm13 = vweird.f32 %v1651_v9 }
 0x917   : > { %v1654_v13 = vmul.f32 %v2142_v8, %v1653_v10 }
 0x919   : > { %v1655_v14 = vmul.f32 0.5, %v1654_v13 }
 0x91b   : > { %v1656_v15 = vsub.f32 1.5, %v1655_v14 }
 0x91c   : > { %v2144_v11 = vpop.eup %2143 }
 0x91d   : > { %v1657_v7 = vmul.f32 %v2142_v8, %v1656_v15  ;;  %v1663_v16 = vmul.f32 %v2144_v11, %v1651_v9  ;;  %vm1669_vm12 = vweird.f32 %v2144_v11 }
 0x91e   : > { %vm1670_vm14 = vmor %vm1668_vm13, %vm1669_vm12 }
 0x91f   : > { %v1661_v18 = vsel %vm1660_vm11, %v2142_v8, %v1657_v7  ;;  %v1664_v19 = vmul.f32 %v2144_v11, %v1663_v16 }
 0x920   : > { %v1672_v12 = vmul.f32 %v1661_v18, %v1638_v57 }
 0x921   : > { %v1665_v21 = vmul.f32 0.5, %v1664_v19 }
 0x922   : > { %v1677_v22 = vmul.f32 %v2139_v17, %v1672_v12 }
 0x923   : > { %v1666_v23 = vsub.f32 1.5, %v1665_v21 }
 0x924   : > { %v1682_v24 = vadd.f32 %v2140_v20, %v1677_v22 }
 0x925   : > { %v1667_v25 = vmul.f32 %v2144_v11, %v1666_v23 }
 0x926   : > { %1684 = vst.msk [vmem:[%s2600_s27] sm:$0xff] %vm783_vm1, %v1682_v24 }
 0x927   : > { %v1671_v26 = vsel %vm1670_vm14, %v2144_v11, %v1667_v25 }
 0x928   : > { %v1673_v28 = vmul.f32 %v1671_v26, %v1639_v61 }
 0x92a   : > { %v1678_v30 = vmul.f32 %v2139_v17, %v1673_v28 }
 0x92c   : > { %v1683_v31 = vadd.f32 %v2140_v20, %v1678_v30 }
 0x92e   : > { %1685 = vst.msk [vmem:[%s2600_s27 + $0x8] sm:$0xff] %vm783_vm1, %v1683_v31 }
 0x92f PF: > { %s2601_s16 = sld [smem:[#allocation3_spill]] }
 0x935   : > { %s25_s18 = sadd.s32 1, %s2601_s16  }
 0x936   : > { %p22_p6 = scmp.ge.s32.totalorder %s25_s18, 4  }
 0x938   :  { %24 = sbr.rel (!%p22_p6) target bundleno = 8 (0x8), region = 147 }

</bundles_post_ra>
